<compile_context>
chip_gen: v7x
topology: tpu7x:2x2x1
jax: 0.10.0
libtpu: 0.0.40
codegen_flags: <defaults>
</compile_context>

<pallas_src>
import jax
import jax.numpy as jnp
from jax.experimental import pallas as pl
from jax.experimental.pallas import tpu as pltpu


def _resblock_kernel(x_ref, w1_ref, b1_ref, w2_ref, b2_ref, alpha_ref,
                     o_ref, pad_ref):
    # x_ref    : (1, H*W, C)   one image, NHWC with spatial flattened
    # w1_ref   : (9*C, C)      conv1 weights, row = tap*C + cin, tap = 3*dy + dx
    # b1_ref   : (1, C)        conv1 bias (f32)
    # w2_ref   : (9*C, C)      conv2 weights
    # b2_ref   : (1, C)        conv2 bias (f32)
    # alpha_ref: (1,) in SMEM  PReLU slope
    # o_ref    : (1, H*W, C)   output tile (f32)
    # pad_ref  : (H+2, W+2, C) f32 VMEM scratch: padded input, then padded PReLU
    Hp, Wp, C = pad_ref.shape
    H, W = Hp - 2, Wp - 2
    HW = H * W

    # Zero only the 1-pixel halo; the interior is always fully overwritten.
    # Done unconditionally every step: with dimension_semantics=("parallel",)
    # the scratch is per-TensorCore, so a program_id()==0 guard would leave
    # stale VMEM in the second core's halo on v7x.
    zrow = jnp.zeros((1, Wp, C), jnp.float32)
    zcol = jnp.zeros((Hp, 1, C), jnp.float32)
    pad_ref[0:1, :, :] = zrow
    pad_ref[Hp - 1:Hp, :, :] = zrow
    pad_ref[:, 0:1, :] = zcol
    pad_ref[:, Wp - 1:Wp, :] = zcol

    # Padded input (pad handled in-kernel, not in the wrapper).
    pad_ref[1:1 + H, 1:1 + W, :] = x_ref[0].astype(jnp.float32).reshape(H, W, C)

    def conv3x3(w_ref, b_ref):
        # Build the im2col slab (H*W, 9*C) once and do a single MXU matmul
        # with K = 9*C instead of nine K = C matmuls.  The slab is grown
        # incrementally so at most two (H*W, C) windows are live at a time.
        slab = None
        for dy in range(3):
            for dx in range(3):
                tap = pad_ref[dy:dy + H, dx:dx + W, :].reshape(HW, C)
                slab = tap if slab is None else jnp.concatenate([slab, tap],
                                                                axis=1)
        acc = jnp.dot(slab.astype(w_ref.dtype), w_ref[...],
                      preferred_element_type=jnp.float32)        # (H*W, C) f32
        return acc + b_ref[...]                                  # (1, C) bcast

    # ---- conv1 + PReLU (f32 elementwise, slope from SMEM) ----------------
    r = conv3x3(w1_ref, b1_ref)
    alpha = alpha_ref[0]
    r = jnp.where(r >= 0.0, r, alpha * r)

    # ---- re-pad the intermediate into the same scratch (halo still zero) --
    pad_ref[1:1 + H, 1:1 + W, :] = r.reshape(H, W, C)

    # ---- conv2 + residual add ---------------------------------------------
    r = conv3x3(w2_ref, b2_ref)
    o_ref[0] = (x_ref[0].astype(jnp.float32) + r).astype(o_ref.dtype)


def residual_block(x_nchw, w1, b1, alpha, w2, b2, *,
                   operand_dtype=jnp.float32):
    """ResidualBlock forward.

    x_nchw: (N, C, H, W); w*: (C, C, 3, 3) OIHW; b*: (C,); alpha: scalar.
    operand_dtype: dtype of the activations / conv weights fed to the MXU
    (use jnp.bfloat16 on v6e/v7x; accumulation and elementwise math stay f32).
    """
    N, C, H, W = x_nchw.shape
    HW = H * W

    # NCHW -> NHWC-flat (N, H*W, C).  No spatial padding here (done in-kernel).
    x_flat = jnp.transpose(x_nchw, (0, 2, 3, 1)).reshape(N, HW, C)
    x_flat = x_flat.astype(operand_dtype)

    # OIHW -> (tap*Cin, Cout) with tap = 3*kh + kw, so one (9C, C) matrix per conv.
    w1m = jnp.transpose(w1, (2, 3, 1, 0)).reshape(9 * C, C).astype(operand_dtype)
    w2m = jnp.transpose(w2, (2, 3, 1, 0)).reshape(9 * C, C).astype(operand_dtype)
    b1r = b1.reshape(1, C).astype(jnp.float32)
    b2r = b2.reshape(1, C).astype(jnp.float32)
    alpha_r = jnp.reshape(alpha, (1,)).astype(jnp.float32)

    # TODO(synk): for real SR image sizes add a spatial (row-block) grid axis
    # with a 2-row halo so blocks stay under the 16/32 MiB scoped-VMEM ceiling
    # and both v7x TensorCores get work even at N=1.
    out_flat = pl.pallas_call(
        _resblock_kernel,
        out_shape=jax.ShapeDtypeStruct((N, HW, C), jnp.float32),
        grid_spec=pltpu.PrefetchScalarGridSpec(
            num_scalar_prefetch=0,
            grid=(N,),
            in_specs=[
                pl.BlockSpec((1, HW, C), lambda n: (n, 0, 0)),
                pl.BlockSpec((9 * C, C), lambda n: (0, 0)),
                pl.BlockSpec((1, C), lambda n: (0, 0)),
                pl.BlockSpec((9 * C, C), lambda n: (0, 0)),
                pl.BlockSpec((1, C), lambda n: (0, 0)),
                pl.BlockSpec(memory_space=pltpu.MemorySpace.SMEM),   # alpha
            ],
            out_specs=pl.BlockSpec((1, HW, C), lambda n: (n, 0, 0)),
            scratch_shapes=[pltpu.VMEM((H + 2, W + 2, C), jnp.float32)],
        ),
        compiler_params=pltpu.CompilerParams(
            dimension_semantics=("parallel",)),
    )(x_flat, w1m, b1r, w2m, b2r, alpha_r)

    # NHWC-flat -> NCHW (reshape is free; only the transpose touches data).
    return jnp.transpose(out_flat.reshape(N, H, W, C), (0, 3, 1, 2))


def _reference_forward(x, w1, b1, alpha, w2, b2):
    """Pure-JAX reference (NCHW), mirrors the PyTorch module exactly."""
    dn = ('NCHW', 'OIHW', 'NCHW')
    r = jax.lax.conv_general_dilated(x, w1, (1, 1), 'SAME',
                                     dimension_numbers=dn)
    r = r + b1[None, :, None, None]
    r = jnp.where(r >= 0.0, r, alpha * r)                       # PReLU
    r = jax.lax.conv_general_dilated(r, w2, (1, 1), 'SAME',
                                     dimension_numbers=dn)
    r = r + b2[None, :, None, None]
    return x + r


if __name__ == "__main__":
    N, C, H, W = 2, 4, 16, 16

    key = jax.random.PRNGKey(0)
    kx, kw1, kb1, kw2, kb2 = jax.random.split(key, 5)

    x = jax.random.normal(kx, (N, C, H, W), dtype=jnp.float32)

    # Deterministic synthetic parameters (shapes match nn.Conv2d(C, C, 3, padding=1)).
    fan_in = C * 3 * 3
    bound = 1.0 / (fan_in ** 0.5)
    w1 = jax.random.uniform(kw1, (C, C, 3, 3), jnp.float32, -bound, bound)
    b1 = jax.random.uniform(kb1, (C,), jnp.float32, -bound, bound)
    w2 = jax.random.uniform(kw2, (C, C, 3, 3), jnp.float32, -bound, bound)
    b2 = jax.random.uniform(kb2, (C,), jnp.float32, -bound, bound)
    alpha = jnp.float32(0.25)  # nn.PReLU() default init

    ref = _reference_forward(x, w1, b1, alpha, w2, b2)

    # f32 path (tight check).
    out = jax.block_until_ready(residual_block(x, w1, b1, alpha, w2, b2))
    assert out.shape == (N, C, H, W)
    assert jnp.allclose(out, ref, atol=2e-4, rtol=2e-4), "f32 mismatch vs reference"

    # bf16 MXU-operand path (v6e/v7x fast path); elementwise math stays f32.
    out_bf16 = jax.block_until_ready(
        residual_block(x, w1, b1, alpha, w2, b2, operand_dtype=jnp.bfloat16))
    assert jnp.allclose(out_bf16, ref, atol=5e-2, rtol=5e-2), "bf16 mismatch vs reference"

    print("KERNEL_OK")
</pallas_src>

<mosaic_0001>
module attributes {stable_mosaic.version = 11 : i64} {
  func.func @_resblock_kernel(%arg0: i32, %arg1: memref<1x256x4xf32, #tpu.memory_space<vmem>>, %arg2: memref<36x4xf32, #tpu.memory_space<vmem>>, %arg3: memref<1x4xf32, #tpu.memory_space<vmem>>, %arg4: memref<36x4xf32, #tpu.memory_space<vmem>>, %arg5: memref<1x4xf32, #tpu.memory_space<vmem>>, %arg6: memref<1xf32, #tpu.memory_space<smem>>, %arg7: memref<1x256x4xf32, #tpu.memory_space<vmem>>, %arg8: memref<18x18x4xf32, #tpu.memory_space<vmem>>) attributes {dimension_semantics = [#tpu.dimension_semantics<parallel>], iteration_bounds = array<i64: 2>, scalar_prefetch = 0 : i64, scratch_operands = 1 : i64, tpu.core_type = #tpu.core_type<tc>, window_params = [{transform_indices = @transform_0, window_bounds = array<i64: 1, 256, 4>}, {pipeline_mode = #tpu.pipeline_mode<synchronous>, transform_indices = @transform_1, window_bounds = array<i64: 36, 4>}, {pipeline_mode = #tpu.pipeline_mode<synchronous>, transform_indices = @transform_2, window_bounds = array<i64: 1, 4>}, {pipeline_mode = #tpu.pipeline_mode<synchronous>, transform_indices = @transform_3, window_bounds = array<i64: 36, 4>}, {pipeline_mode = #tpu.pipeline_mode<synchronous>, transform_indices = @transform_4, window_bounds = array<i64: 1, 4>}, {transform_indices = @transform_5, window_bounds = array<i64: 1>}, {transform_indices = @transform_6, window_bounds = array<i64: 1, 256, 4>}]} {
    %cst = arith.constant 0.000000e+00 : f32
    %0 = vector.broadcast %cst : f32 to vector<1x18x4xf32>
    %cst_0 = arith.constant 0.000000e+00 : f32
    %1 = vector.broadcast %cst_0 : f32 to vector<18x1x4xf32>
    %c0 = arith.constant 0 : index
    %c0_1 = arith.constant 0 : index
    %c0_2 = arith.constant 0 : index
    %2 = vector.load %arg8[%c0, %c0_1, %c0_2] : memref<18x18x4xf32, #tpu.memory_space<vmem>>, vector<1x18x4xf32>
    tpu.vector_store %arg8[%c0, %c0_1, %c0_2], %0 {strides = array<i32>} : memref<18x18x4xf32, #tpu.memory_space<vmem>>, vector<1x18x4xf32>,
    %c17 = arith.constant 17 : index
    %c0_3 = arith.constant 0 : index
    %c0_4 = arith.constant 0 : index
    %3 = vector.load %arg8[%c17, %c0_3, %c0_4] : memref<18x18x4xf32, #tpu.memory_space<vmem>>, vector<1x18x4xf32>
    tpu.vector_store %arg8[%c17, %c0_3, %c0_4], %0 {strides = array<i32>} : memref<18x18x4xf32, #tpu.memory_space<vmem>>, vector<1x18x4xf32>,
    %c0_5 = arith.constant 0 : index
    %c0_6 = arith.constant 0 : index
    %c0_7 = arith.constant 0 : index
    %4 = vector.load %arg8[%c0_5, %c0_6, %c0_7] : memref<18x18x4xf32, #tpu.memory_space<vmem>>, vector<18x1x4xf32>
    tpu.vector_store %arg8[%c0_5, %c0_6, %c0_7], %1 {strides = array<i32>} : memref<18x18x4xf32, #tpu.memory_space<vmem>>, vector<18x1x4xf32>,
    %c0_8 = arith.constant 0 : index
    %c17_9 = arith.constant 17 : index
    %c0_10 = arith.constant 0 : index
    %5 = vector.load %arg8[%c0_8, %c17_9, %c0_10] : memref<18x18x4xf32, #tpu.memory_space<vmem>>, vector<18x1x4xf32>
    tpu.vector_store %arg8[%c0_8, %c17_9, %c0_10], %1 {strides = array<i32>} : memref<18x18x4xf32, #tpu.memory_space<vmem>>, vector<18x1x4xf32>,
    %c0_11 = arith.constant 0 : index
    %c0_12 = arith.constant 0 : index
    %c0_13 = arith.constant 0 : index
    %6 = vector.load %arg1[%c0_11, %c0_12, %c0_13] : memref<1x256x4xf32, #tpu.memory_space<vmem>>, vector<1x256x4xf32>
    %7 = vector.shape_cast %6 : vector<1x256x4xf32> to vector<256x4xf32>
    %8 = vector.shape_cast %7 : vector<256x4xf32> to vector<16x16x4xf32>
    %c1 = arith.constant 1 : index
    %c1_14 = arith.constant 1 : index
    %c0_15 = arith.constant 0 : index
    %9 = vector.load %arg8[%c1, %c1_14, %c0_15] : memref<18x18x4xf32, #tpu.memory_space<vmem>>, vector<16x16x4xf32>
    tpu.vector_store %arg8[%c1, %c1_14, %c0_15], %8 {strides = array<i32>} : memref<18x18x4xf32, #tpu.memory_space<vmem>>, vector<16x16x4xf32>,
    %c0_16 = arith.constant 0 : index
    %c0_17 = arith.constant 0 : index
    %c0_18 = arith.constant 0 : index
    %10 = vector.load %arg8[%c0_16, %c0_17, %c0_18] : memref<18x18x4xf32, #tpu.memory_space<vmem>>, vector<16x16x4xf32>
    %11 = vector.shape_cast %10 : vector<16x16x4xf32> to vector<256x4xf32>
    %c0_19 = arith.constant 0 : index
    %c1_20 = arith.constant 1 : index
    %c0_21 = arith.constant 0 : index
    %12 = vector.load %arg8[%c0_19, %c1_20, %c0_21] : memref<18x18x4xf32, #tpu.memory_space<vmem>>, vector<16x16x4xf32>
    %13 = vector.shape_cast %12 : vector<16x16x4xf32> to vector<256x4xf32>
    %14 = tpu.concatenate %11, %13 in 1 : vector<256x4xf32>, vector<256x4xf32> -> vector<256x8xf32>
    %c0_22 = arith.constant 0 : index
    %c2 = arith.constant 2 : index
    %c0_23 = arith.constant 0 : index
    %15 = vector.load %arg8[%c0_22, %c2, %c0_23] : memref<18x18x4xf32, #tpu.memory_space<vmem>>, vector<16x16x4xf32>
    %16 = vector.shape_cast %15 : vector<16x16x4xf32> to vector<256x4xf32>
    %17 = tpu.concatenate %14, %16 in 1 : vector<256x8xf32>, vector<256x4xf32> -> vector<256x12xf32>
    %c1_24 = arith.constant 1 : index
    %c0_25 = arith.constant 0 : index
    %c0_26 = arith.constant 0 : index
    %18 = vector.load %arg8[%c1_24, %c0_25, %c0_26] : memref<18x18x4xf32, #tpu.memory_space<vmem>>, vector<16x16x4xf32>
    %19 = vector.shape_cast %18 : vector<16x16x4xf32> to vector<256x4xf32>
    %20 = tpu.concatenate %17, %19 in 1 : vector<256x12xf32>, vector<256x4xf32> -> vector<256x16xf32>
    %c1_27 = arith.constant 1 : index
    %c1_28 = arith.constant 1 : index
    %c0_29 = arith.constant 0 : index
    %21 = vector.load %arg8[%c1_27, %c1_28, %c0_29] : memref<18x18x4xf32, #tpu.memory_space<vmem>>, vector<16x16x4xf32>
    %22 = vector.shape_cast %21 : vector<16x16x4xf32> to vector<256x4xf32>
    %23 = tpu.concatenate %20, %22 in 1 : vector<256x16xf32>, vector<256x4xf32> -> vector<256x20xf32>
    %c1_30 = arith.constant 1 : index
    %c2_31 = arith.constant 2 : index
    %c0_32 = arith.constant 0 : index
    %24 = vector.load %arg8[%c1_30, %c2_31, %c0_32] : memref<18x18x4xf32, #tpu.memory_space<vmem>>, vector<16x16x4xf32>
    %25 = vector.shape_cast %24 : vector<16x16x4xf32> to vector<256x4xf32>
    %26 = tpu.concatenate %23, %25 in 1 : vector<256x20xf32>, vector<256x4xf32> -> vector<256x24xf32>
    %c2_33 = arith.constant 2 : index
    %c0_34 = arith.constant 0 : index
    %c0_35 = arith.constant 0 : index
    %27 = vector.load %arg8[%c2_33, %c0_34, %c0_35] : memref<18x18x4xf32, #tpu.memory_space<vmem>>, vector<16x16x4xf32>
    %28 = vector.shape_cast %27 : vector<16x16x4xf32> to vector<256x4xf32>
    %29 = tpu.concatenate %26, %28 in 1 : vector<256x24xf32>, vector<256x4xf32> -> vector<256x28xf32>
    %c2_36 = arith.constant 2 : index
    %c1_37 = arith.constant 1 : index
    %c0_38 = arith.constant 0 : index
    %30 = vector.load %arg8[%c2_36, %c1_37, %c0_38] : memref<18x18x4xf32, #tpu.memory_space<vmem>>, vector<16x16x4xf32>
    %31 = vector.shape_cast %30 : vector<16x16x4xf32> to vector<256x4xf32>
    %32 = tpu.concatenate %29, %31 in 1 : vector<256x28xf32>, vector<256x4xf32> -> vector<256x32xf32>
    %c2_39 = arith.constant 2 : index
    %c2_40 = arith.constant 2 : index
    %c0_41 = arith.constant 0 : index
    %33 = vector.load %arg8[%c2_39, %c2_40, %c0_41] : memref<18x18x4xf32, #tpu.memory_space<vmem>>, vector<16x16x4xf32>
    %34 = vector.shape_cast %33 : vector<16x16x4xf32> to vector<256x4xf32>
    %35 = tpu.concatenate %32, %34 in 1 : vector<256x32xf32>, vector<256x4xf32> -> vector<256x36xf32>
    %c0_42 = arith.constant 0 : index
    %c0_43 = arith.constant 0 : index
    %36 = vector.load %arg2[%c0_42, %c0_43] : memref<36x4xf32, #tpu.memory_space<vmem>>, vector<36x4xf32>
    %cst_44 = arith.constant dense<0.000000e+00> : vector<256x4xf32>
    %37 = tpu.matmul %35, %36, %cst_44 {dimension_numbers = #tpu.dot_dimension_numbers<[1], [0], [0], [1], [0, 0, 1, 1], [], []>} : vector<256x36xf32>, vector<36x4xf32>, vector<256x4xf32> -> vector<256x4xf32>
    %c0_45 = arith.constant 0 : index
    %c0_46 = arith.constant 0 : index
    %38 = vector.load %arg3[%c0_45, %c0_46] : memref<1x4xf32, #tpu.memory_space<vmem>>, vector<1x4xf32>
    %39 = vector.broadcast %38 : vector<1x4xf32> to vector<256x4xf32>
    %40 = arith.addf %37, %39 : vector<256x4xf32>
    %c0_47 = arith.constant 0 : index
    %41 = memref.load %arg6[%c0_47] : memref<1xf32, #tpu.memory_space<smem>>
    %cst_48 = arith.constant 0.000000e+00 : f32
    %42 = vector.broadcast %cst_48 : f32 to vector<256x4xf32>
    %43 = arith.cmpf oge, %40, %42 : vector<256x4xf32>
    %44 = vector.broadcast %41 : f32 to vector<256x4xf32>
    %45 = arith.mulf %44, %40 : vector<256x4xf32>
    %46 = arith.select %43, %40, %45 : vector<256x4xi1>, vector<256x4xf32>
    %47 = vector.shape_cast %46 : vector<256x4xf32> to vector<16x16x4xf32>
    %c1_49 = arith.constant 1 : index
    %c1_50 = arith.constant 1 : index
    %c0_51 = arith.constant 0 : index
    %48 = vector.load %arg8[%c1_49, %c1_50, %c0_51] : memref<18x18x4xf32, #tpu.memory_space<vmem>>, vector<16x16x4xf32>
    tpu.vector_store %arg8[%c1_49, %c1_50, %c0_51], %47 {strides = array<i32>} : memref<18x18x4xf32, #tpu.memory_space<vmem>>, vector<16x16x4xf32>,
    %c0_52 = arith.constant 0 : index
    %c0_53 = arith.constant 0 : index
    %c0_54 = arith.constant 0 : index
    %49 = vector.load %arg8[%c0_52, %c0_53, %c0_54] : memref<18x18x4xf32, #tpu.memory_space<vmem>>, vector<16x16x4xf32>
    %50 = vector.shape_cast %49 : vector<16x16x4xf32> to vector<256x4xf32>
    %c0_55 = arith.constant 0 : index
    %c1_56 = arith.constant 1 : index
    %c0_57 = arith.constant 0 : index
    %51 = vector.load %arg8[%c0_55, %c1_56, %c0_57] : memref<18x18x4xf32, #tpu.memory_space<vmem>>, vector<16x16x4xf32>
    %52 = vector.shape_cast %51 : vector<16x16x4xf32> to vector<256x4xf32>
    %53 = tpu.concatenate %50, %52 in 1 : vector<256x4xf32>, vector<256x4xf32> -> vector<256x8xf32>
    %c0_58 = arith.constant 0 : index
    %c2_59 = arith.constant 2 : index
    %c0_60 = arith.constant 0 : index
    %54 = vector.load %arg8[%c0_58, %c2_59, %c0_60] : memref<18x18x4xf32, #tpu.memory_space<vmem>>, vector<16x16x4xf32>
    %55 = vector.shape_cast %54 : vector<16x16x4xf32> to vector<256x4xf32>
    %56 = tpu.concatenate %53, %55 in 1 : vector<256x8xf32>, vector<256x4xf32> -> vector<256x12xf32>
    %c1_61 = arith.constant 1 : index
    %c0_62 = arith.constant 0 : index
    %c0_63 = arith.constant 0 : index
    %57 = vector.load %arg8[%c1_61, %c0_62, %c0_63] : memref<18x18x4xf32, #tpu.memory_space<vmem>>, vector<16x16x4xf32>
    %58 = vector.shape_cast %57 : vector<16x16x4xf32> to vector<256x4xf32>
    %59 = tpu.concatenate %56, %58 in 1 : vector<256x12xf32>, vector<256x4xf32> -> vector<256x16xf32>
    %c1_64 = arith.constant 1 : index
    %c1_65 = arith.constant 1 : index
    %c0_66 = arith.constant 0 : index
    %60 = vector.load %arg8[%c1_64, %c1_65, %c0_66] : memref<18x18x4xf32, #tpu.memory_space<vmem>>, vector<16x16x4xf32>
    %61 = vector.shape_cast %60 : vector<16x16x4xf32> to vector<256x4xf32>
    %62 = tpu.concatenate %59, %61 in 1 : vector<256x16xf32>, vector<256x4xf32> -> vector<256x20xf32>
    %c1_67 = arith.constant 1 : index
    %c2_68 = arith.constant 2 : index
    %c0_69 = arith.constant 0 : index
    %63 = vector.load %arg8[%c1_67, %c2_68, %c0_69] : memref<18x18x4xf32, #tpu.memory_space<vmem>>, vector<16x16x4xf32>
    %64 = vector.shape_cast %63 : vector<16x16x4xf32> to vector<256x4xf32>
    %65 = tpu.concatenate %62, %64 in 1 : vector<256x20xf32>, vector<256x4xf32> -> vector<256x24xf32>
    %c2_70 = arith.constant 2 : index
    %c0_71 = arith.constant 0 : index
    %c0_72 = arith.constant 0 : index
    %66 = vector.load %arg8[%c2_70, %c0_71, %c0_72] : memref<18x18x4xf32, #tpu.memory_space<vmem>>, vector<16x16x4xf32>
    %67 = vector.shape_cast %66 : vector<16x16x4xf32> to vector<256x4xf32>
    %68 = tpu.concatenate %65, %67 in 1 : vector<256x24xf32>, vector<256x4xf32> -> vector<256x28xf32>
    %c2_73 = arith.constant 2 : index
    %c1_74 = arith.constant 1 : index
    %c0_75 = arith.constant 0 : index
    %69 = vector.load %arg8[%c2_73, %c1_74, %c0_75] : memref<18x18x4xf32, #tpu.memory_space<vmem>>, vector<16x16x4xf32>
    %70 = vector.shape_cast %69 : vector<16x16x4xf32> to vector<256x4xf32>
    %71 = tpu.concatenate %68, %70 in 1 : vector<256x28xf32>, vector<256x4xf32> -> vector<256x32xf32>
    %c2_76 = arith.constant 2 : index
    %c2_77 = arith.constant 2 : index
    %c0_78 = arith.constant 0 : index
    %72 = vector.load %arg8[%c2_76, %c2_77, %c0_78] : memref<18x18x4xf32, #tpu.memory_space<vmem>>, vector<16x16x4xf32>
    %73 = vector.shape_cast %72 : vector<16x16x4xf32> to vector<256x4xf32>
    %74 = tpu.concatenate %71, %73 in 1 : vector<256x32xf32>, vector<256x4xf32> -> vector<256x36xf32>
    %c0_79 = arith.constant 0 : index
    %c0_80 = arith.constant 0 : index
    %75 = vector.load %arg4[%c0_79, %c0_80] : memref<36x4xf32, #tpu.memory_space<vmem>>, vector<36x4xf32>
    %cst_81 = arith.constant dense<0.000000e+00> : vector<256x4xf32>
    %76 = tpu.matmul %74, %75, %cst_81 {dimension_numbers = #tpu.dot_dimension_numbers<[1], [0], [0], [1], [0, 0, 1, 1], [], []>} : vector<256x36xf32>, vector<36x4xf32>, vector<256x4xf32> -> vector<256x4xf32>
    %c0_82 = arith.constant 0 : index
    %c0_83 = arith.constant 0 : index
    %77 = vector.load %arg5[%c0_82, %c0_83] : memref<1x4xf32, #tpu.memory_space<vmem>>, vector<1x4xf32>
    %78 = vector.broadcast %77 : vector<1x4xf32> to vector<256x4xf32>
    %79 = arith.addf %76, %78 : vector<256x4xf32>
    %c0_84 = arith.constant 0 : index
    %c0_85 = arith.constant 0 : index
    %c0_86 = arith.constant 0 : index
    %80 = vector.load %arg1[%c0_84, %c0_85, %c0_86] : memref<1x256x4xf32, #tpu.memory_space<vmem>>, vector<1x256x4xf32>
    %81 = vector.shape_cast %80 : vector<1x256x4xf32> to vector<256x4xf32>
    %82 = arith.addf %81, %79 : vector<256x4xf32>
    %c0_87 = arith.constant 0 : index
    %c0_88 = arith.constant 0 : index
    %c0_89 = arith.constant 0 : index
    %83 = vector.load %arg7[%c0_87, %c0_88, %c0_89] : memref<1x256x4xf32, #tpu.memory_space<vmem>>, vector<1x256x4xf32>
    %84 = vector.shape_cast %83 : vector<1x256x4xf32> to vector<256x4xf32>
    %85 = vector.shape_cast %82 : vector<256x4xf32> to vector<1x256x4xf32>
    tpu.vector_store %arg7[%c0_87, %c0_88, %c0_89], %85 {strides = array<i32>} : memref<1x256x4xf32, #tpu.memory_space<vmem>>, vector<1x256x4xf32>,
    return
  }
  func.func @transform_0(%arg0: i32) -> (i32, i32, i32) {
    %c0_i32 = arith.constant 0 : i32
    %c0_i32_0 = arith.constant 0 : i32
    %c0_i32_1 = arith.constant 0 : i32
    return %arg0, %c0_i32, %c0_i32_0 : i32, i32, i32
  }
  func.func @transform_1(%arg0: i32) -> (i32, i32) {
    %c0_i32 = arith.constant 0 : i32
    %c0_i32_0 = arith.constant 0 : i32
    %c0_i32_1 = arith.constant 0 : i32
    return %c0_i32, %c0_i32_0 : i32, i32
  }
  func.func @transform_2(%arg0: i32) -> (i32, i32) {
    %c0_i32 = arith.constant 0 : i32
    %c0_i32_0 = arith.constant 0 : i32
    %c0_i32_1 = arith.constant 0 : i32
    return %c0_i32, %c0_i32_0 : i32, i32
  }
  func.func @transform_3(%arg0: i32) -> (i32, i32) {
    %c0_i32 = arith.constant 0 : i32
    %c0_i32_0 = arith.constant 0 : i32
    %c0_i32_1 = arith.constant 0 : i32
    return %c0_i32, %c0_i32_0 : i32, i32
  }
  func.func @transform_4(%arg0: i32) -> (i32, i32) {
    %c0_i32 = arith.constant 0 : i32
    %c0_i32_0 = arith.constant 0 : i32
    %c0_i32_1 = arith.constant 0 : i32
    return %c0_i32, %c0_i32_0 : i32, i32
  }
  func.func @transform_5(%arg0: i32) -> i32 {
    %c0_i32 = arith.constant 0 : i32
    %c0_i32_0 = arith.constant 0 : i32
    return %c0_i32 : i32
  }
  func.func @transform_6(%arg0: i32) -> (i32, i32, i32) {
    %c0_i32 = arith.constant 0 : i32
    %c0_i32_0 = arith.constant 0 : i32
    %c0_i32_1 = arith.constant 0 : i32
    return %arg0, %c0_i32, %c0_i32_0 : i32, i32, i32
  }
}

</mosaic_0001>

<bundles_post_ra>
// kernel: tpu_custom_call.1
= control target key start
LH: loop header
LB: loop body
LE: loop exit
PB: predicated region body
PF: predicated region fallthrough
CT: control target
= control target key end

     0   :  { %s4859_s23 = smov 0   ;;  %s7831_s0 = inlined_call_operand.vmem [shape: f32[2,256,4], index: 0, kind: input, shape index: {}]   ;;  %s7832_s1 = inlined_call_operand.vmem [shape: f32[36,4], index: 1, kind: input, shape index: {}]   ;;  %s7833_s2 = inlined_call_operand.vmem [shape: f32[1,4], index: 2, kind: input, shape index: {}]   ;;  %s7834_s3 = inlined_call_operand.vmem [shape: f32[36,4], index: 3, kind: input, shape index: {}]   ;;  %s7835_s4 = inlined_call_operand.vmem [shape: f32[1,4], index: 4, kind: input, shape index: {}]   ;;  %s7836_s5 = inlined_call_operand.<no memory space> [shape: f32[1], index: 5, kind: input, shape index: {}]   ;;  %s7837_s6 = inlined_call_operand.vmem [shape: f32[2,256,4], index: 6, kind: output, shape index: {}]  }
   0x1   :  { %11 = sst [smem:[#allocation3]] %s7836_s5 }
   0x2 LB: > { %s4463_s24 = sadd.s32 4294967295, %s4810_s23   ;;  %p4467_p0 = scmp.ge.s32.totalorder %s4810_s23, 1  ;;  %s4810_s23 = sphi %s4859_s23, %s17_s23  }
   0x3   : > { %p213_p1 = scmp.lt.s32.totalorder %s4810_s23, 3 }
   0x5   : > { %p214_p2 = pnand %p4467_p0, %p213_p1 }
   0x7   : > { %217 = sbr.rel (%p214_p2) target bundleno = 1669 (0x685), region = 44 }
   0xe   : > { %vm253_vm0 = vcmask 31744   ;;  %vm256_vm1 = vcmask 25600   ;;  %p4869_p3 = scmp.lt.s32.totalorder %s4463_s24, 1  ;;  %vm262_vm2 = vcmask 24576   ;;  %v4812_v0 = vmov 0.0   ;;  %s4813_s29 = smov 4  }
   0xf   : > { %254 = vst.msk [vmem:[#allocation2] sm:$0xff] %vm253_vm0, %v4812_v0  ;;  %255 = vst.msk [vmem:[#allocation2 + $0x8] sm:$0xff] %vm253_vm0, %v4812_v0  ;;  %s4814_s30 = smov 8   ;;  %s4815_s7 = smov 12   ;;  %vm2049_vm3 = vcmask 1043456   ;;  %vm748_vm4 = vcmask 64512  }
  0x10   : > { %259 = vst.msk [vmem:[#allocation2 + $0x198] sm:$0xff] %vm253_vm0, %v4812_v0  ;;  %260 = vst.msk [vmem:[#allocation2 + $0x1a0] sm:$0xff] %vm253_vm0, %v4812_v0  ;;  %s8355_s24 = smov (!%p4869_p3, %s4463_s24), 1  ;;  %s4816_s8 = smov 16   ;;  %vm941_vm5 = vcmask 97280   ;;  %vm1134_vm6 = vcmask 130048  }
  0x11   : > { %257 = vst.msk [vmem:[#allocation2 + $0x10] sm:$0x3] %vm256_vm1, %v4812_v0  ;;  %261 = vst.msk [vmem:[#allocation2 + $0x1a8] sm:$0x3] %vm256_vm1, %v4812_v0  ;;  %s4542_s25 = sshll.u32 %s8355_s24, 8  ;;  %s4817_s9 = smov 20  }
  0x12   : > { %264 = vst.msk [vmem:[#allocation2 + $0x18] sm:$0x1] %vm262_vm2, %v4812_v0  ;;  %265 = vst.msk [vmem:[#allocation2 + $0x30] sm:$0x1] %vm262_vm2, %v4812_v0  ;;  %s4925_s28 = scalar_lea.vmem %s7831_s0, %s4542_s25  ;;  %s4818_s10 = smov 24   ;;  %vm1327_vm7 = vcmask 162816  }
  0x13   : > { %266 = vst.msk [vmem:[#allocation2 + $0x48] sm:$0x1] %vm262_vm2, %v4812_v0  ;;  %267 = vst.msk [vmem:[#allocation2 + $0x60] sm:$0x1] %vm262_vm2, %v4812_v0  ;;  %v299_v1 = vld [vmem:[%s4925_s28] sm:$0xff]  ;;  %v301_v2 = vld [vmem:[%s4925_s28 + $0x10] sm:$0xff] }
  0x14   : > { %268 = vst.msk [vmem:[#allocation2 + $0x78] sm:$0x1] %vm262_vm2, %v4812_v0  ;;  %269 = vst.msk [vmem:[#allocation2 + $0x90] sm:$0x1] %vm262_vm2, %v4812_v0  ;;  %v300_v3 = vld [vmem:[%s4925_s28 + $0x8] sm:$0xff]  ;;  %v303_v4 = vld [vmem:[%s4925_s28 + $0x20] sm:$0xff] }
  0x15   : > { %270 = vst.msk [vmem:[#allocation2 + $0xa8] sm:$0x1] %vm262_vm2, %v4812_v0  ;;  %271 = vst.msk [vmem:[#allocation2 + $0xc0] sm:$0x1] %vm262_vm2, %v4812_v0  ;;  %v302_v5 = vld [vmem:[%s4925_s28 + $0x18] sm:$0xff]  ;;  %v305_v6 = vld [vmem:[%s4925_s28 + $0x30] sm:$0xff] }
  0x16   : > { %272 = vst.msk [vmem:[#allocation2 + $0xd8] sm:$0x1] %vm262_vm2, %v4812_v0  ;;  %273 = vst.msk [vmem:[#allocation2 + $0xf0] sm:$0x1] %vm262_vm2, %v4812_v0  ;;  %v396_v7 = vld [vmem:[#allocation2 + $0x1] sm:$0xff]  ;;  %v306_v11 = vld [vmem:[%s4925_s28 + $0x38] sm:$0xff] }
  0x17   : > { %274 = vst.msk [vmem:[#allocation2 + $0x108] sm:$0x1] %vm262_vm2, %v4812_v0  ;;  %275 = vst.msk [vmem:[#allocation2 + $0x120] sm:$0x1] %vm262_vm2, %v4812_v0  ;;  %v304_v9 = vld [vmem:[%s4925_s28 + $0x28] sm:$0xff]  ;;  %460 = vrot.lane.b32.xlu0 %v396_v7, %s4813_s29  ;;  %v307_v10 = vld [vmem:[%s4925_s28 + $0x40] sm:$0xff] }
  0x18   : > { %276 = vst.msk [vmem:[#allocation2 + $0x138] sm:$0x1] %vm262_vm2, %v4812_v0  ;;  %277 = vst.msk [vmem:[#allocation2 + $0x150] sm:$0x1] %vm262_vm2, %v4812_v0  ;;  %v397_v8 = vld [vmem:[#allocation2 + $0x9] sm:$0xff]  ;;  %v311_v14 = vld [vmem:[%s4925_s28 + $0x60] sm:$0xff] }
  0x19   : > { %278 = vst.msk [vmem:[#allocation2 + $0x168] sm:$0x1] %vm262_vm2, %v4812_v0  ;;  %279 = vst.msk [vmem:[#allocation2 + $0x180] sm:$0x1] %vm262_vm2, %v4812_v0  ;;  %v309_v12 = vld [vmem:[%s4925_s28 + $0x50] sm:$0xff]  ;;  %v308_v13 = vld [vmem:[%s4925_s28 + $0x48] sm:$0xff] }
  0x1a   : > { %282 = vst.msk [vmem:[#allocation2 + $0x29] sm:$0x1] %vm262_vm2, %v4812_v0  ;;  %283 = vst.msk [vmem:[#allocation2 + $0x41] sm:$0x1] %vm262_vm2, %v4812_v0  ;;  %v310_v15 = vld [vmem:[%s4925_s28 + $0x58] sm:$0xff]  ;;  %v313_v16 = vld [vmem:[%s4925_s28 + $0x70] sm:$0xff] }
  0x1b   : > { %284 = vst.msk [vmem:[#allocation2 + $0x59] sm:$0x1] %vm262_vm2, %v4812_v0  ;;  %285 = vst.msk [vmem:[#allocation2 + $0x71] sm:$0x1] %vm262_vm2, %v4812_v0  ;;  %v312_v17 = vld [vmem:[%s4925_s28 + $0x68] sm:$0xff]  ;;  %v315_v18 = vld [vmem:[%s4925_s28 + $0x80] sm:$0xff]  ;;  %462 = vrot.lane.b32.xlu0 %v397_v8, %s4813_s29 }
  0x1c   : > { %286 = vst.msk [vmem:[#allocation2 + $0x89] sm:$0x1] %vm262_vm2, %v4812_v0  ;;  %287 = vst.msk [vmem:[#allocation2 + $0xa1] sm:$0x1] %vm262_vm2, %v4812_v0  ;;  %v314_v19 = vld [vmem:[%s4925_s28 + $0x78] sm:$0xff]  ;;  %v317_v20 = vld [vmem:[%s4925_s28 + $0x90] sm:$0xff] }
  0x1d   : > { %288 = vst.msk [vmem:[#allocation2 + $0xb9] sm:$0x1] %vm262_vm2, %v4812_v0  ;;  %289 = vst.msk [vmem:[#allocation2 + $0xd1] sm:$0x1] %vm262_vm2, %v4812_v0  ;;  %v316_v21 = vld [vmem:[%s4925_s28 + $0x88] sm:$0xff]  ;;  %v319_v22 = vld [vmem:[%s4925_s28 + $0xa0] sm:$0xff] }
  0x1e   : > { %290 = vst.msk [vmem:[#allocation2 + $0xe9] sm:$0x1] %vm262_vm2, %v4812_v0  ;;  %291 = vst.msk [vmem:[#allocation2 + $0x101] sm:$0x1] %vm262_vm2, %v4812_v0  ;;  %v318_v23 = vld [vmem:[%s4925_s28 + $0x98] sm:$0xff]  ;;  %v321_v24 = vld [vmem:[%s4925_s28 + $0xb0] sm:$0xff] }
  0x1f   : > { %292 = vst.msk [vmem:[#allocation2 + $0x119] sm:$0x1] %vm262_vm2, %v4812_v0  ;;  %293 = vst.msk [vmem:[#allocation2 + $0x131] sm:$0x1] %vm262_vm2, %v4812_v0  ;;  %v320_v28 = vld [vmem:[%s4925_s28 + $0xa8] sm:$0xff]  ;;  %v323_v29 = vld [vmem:[%s4925_s28 + $0xc0] sm:$0xff] }
  0x20   : > { %294 = vst.msk [vmem:[#allocation2 + $0x149] sm:$0x1] %vm262_vm2, %v4812_v0  ;;  %295 = vst.msk [vmem:[#allocation2 + $0x161] sm:$0x1] %vm262_vm2, %v4812_v0  ;;  %v322_v33 = vld [vmem:[%s4925_s28 + $0xb8] sm:$0xff]  ;;  %v325_v34 = vld [vmem:[%s4925_s28 + $0xd0] sm:$0xff] }
  0x21   : > { %296 = vst.msk [vmem:[#allocation2 + $0x179] sm:$0x1] %vm262_vm2, %v4812_v0  ;;  %297 = vst.msk [vmem:[#allocation2 + $0x191] sm:$0x1] %vm262_vm2, %v4812_v0  ;;  %v324_v35 = vld [vmem:[%s4925_s28 + $0xc8] sm:$0xff]  ;;  %v327_v36 = vld [vmem:[%s4925_s28 + $0xe0] sm:$0xff] }
  0x22   : > { %281 = vst.msk [vmem:[#allocation2 + $0x11] sm:$0x1] %vm262_vm2, %v4812_v0  ;;  %263 = vst.msk [vmem:[#allocation2] sm:$0x1] %vm262_vm2, %v4812_v0  ;;  %v326_v37 = vld [vmem:[%s4925_s28 + $0xd8] sm:$0xff]  ;;  %v328_v39 = vld [vmem:[%s4925_s28 + $0xe8] sm:$0xff] }
  0x23   : > { %280 = vst.msk [vmem:[#allocation2 + $0x198] sm:$0x1] %vm262_vm2, %v4812_v0  ;;  %298 = vst.msk [vmem:[#allocation2 + $0x1a9] sm:$0x1] %vm262_vm2, %v4812_v0  ;;  %v329_v58 = vld [vmem:[%s4925_s28 + $0xf0] sm:$0xff]  ;;  %v330_v62 = vld [vmem:[%s4925_s28 + $0xf8] sm:$0xff] }
  0x24   : > { %332 = vst.msk [vmem:[#allocation2 + $0x19] sm:$0xff] %vm253_vm0, %v299_v1  ;;  %334 = vst.msk [vmem:[#allocation2 + $0x31] sm:$0xff] %vm253_vm0, %v301_v2  ;;  %v588_v0 = vld [vmem:[#allocation2 + $0x2] sm:$0xff]  ;;  %s4819_s19 = smov 28   ;;  %s4820_s22 = smov 32   ;;  %vm1521_vm8 = vcmask 195584  }
  0x25   : > { %333 = vst.msk [vmem:[#allocation2 + $0x21] sm:$0xff] %vm253_vm0, %v300_v3  ;;  %336 = vst.msk [vmem:[#allocation2 + $0x49] sm:$0xff] %vm253_vm0, %v303_v4  ;;  %vm1714_vm9 = vcmask 228352   ;;  %vm1907_vm10 = vcmask 261120   ;;  %vm1952_vm11 = vcmask 293888   ;;  %s2278_s5 = sld [smem:[#allocation3]] }
  0x26   : > { %335 = vst.msk [vmem:[#allocation2 + $0x39] sm:$0xff] %vm253_vm0, %v302_v5  ;;  %338 = vst.msk [vmem:[#allocation2 + $0x61] sm:$0xff] %vm253_vm0, %v305_v6 }
  0x27   : > { %337 = vst.msk [vmem:[#allocation2 + $0x51] sm:$0xff] %vm253_vm0, %v304_v9  ;;  %340 = vst.msk [vmem:[#allocation2 + $0x79] sm:$0xff] %vm253_vm0, %v307_v10 }
  0x28   : > { %339 = vst.msk [vmem:[#allocation2 + $0x69] sm:$0xff] %vm253_vm0, %v306_v11  ;;  %342 = vst.msk [vmem:[#allocation2 + $0x91] sm:$0xff] %vm253_vm0, %v309_v12 }
  0x29   : > { %341 = vst.msk [vmem:[#allocation2 + $0x81] sm:$0xff] %vm253_vm0, %v308_v13  ;;  %344 = vst.msk [vmem:[#allocation2 + $0xa9] sm:$0xff] %vm253_vm0, %v311_v14  ;;  %v589_v3 = vld [vmem:[#allocation2 + $0xa] sm:$0xff] }
  0x2a   : > { %343 = vst.msk [vmem:[#allocation2 + $0x99] sm:$0xff] %vm253_vm0, %v310_v15  ;;  %346 = vst.msk [vmem:[#allocation2 + $0xc1] sm:$0xff] %vm253_vm0, %v313_v16 }
  0x2b   : > { %345 = vst.msk [vmem:[#allocation2 + $0xb1] sm:$0xff] %vm253_vm0, %v312_v17  ;;  %348 = vst.msk [vmem:[#allocation2 + $0xd9] sm:$0xff] %vm253_vm0, %v315_v18  ;;  %v4970_v25 = vld [vmem:[#allocation2 + $0x19] sm:$0xff]  ;;  %v4972_v26 = vld [vmem:[#allocation2 + $0x31] sm:$0xff] }
  0x2c   : > { %347 = vst.msk [vmem:[#allocation2 + $0xc9] sm:$0xff] %vm253_vm0, %v314_v19  ;;  %350 = vst.msk [vmem:[#allocation2 + $0xf1] sm:$0xff] %vm253_vm0, %v317_v20  ;;  %464 = vrot.lane.b32.xlu1 %v4970_v25, %s4813_s29  ;;  %v4979_v27 = vld [vmem:[#allocation2 + $0x21] sm:$0xff]  ;;  %468 = vrot.lane.b32.xlu0 %v4972_v26, %s4813_s29  ;;  %v4987_v30 = vld [vmem:[#allocation2 + $0x49] sm:$0xff] }
  0x2d   : > { %349 = vst.msk [vmem:[#allocation2 + $0xe1] sm:$0xff] %vm253_vm0, %v316_v21  ;;  %352 = vst.msk [vmem:[#allocation2 + $0x109] sm:$0xff] %vm253_vm0, %v319_v22  ;;  %v4991_v31 = vld [vmem:[#allocation2 + $0x39] sm:$0xff]  ;;  %v4995_v32 = vld [vmem:[#allocation2 + $0x61] sm:$0xff] }
  0x2e   : > { %351 = vst.msk [vmem:[#allocation2 + $0xf9] sm:$0xff] %vm253_vm0, %v318_v23  ;;  %354 = vst.msk [vmem:[#allocation2 + $0x121] sm:$0xff] %vm253_vm0, %v321_v24  ;;  %v5007_v38 = vld [vmem:[#allocation2 + $0x51] sm:$0xff]  ;;  %v5015_v40 = vld [vmem:[#allocation2 + $0x79] sm:$0xff] }
  0x2f   : > { %353 = vst.msk [vmem:[#allocation2 + $0x111] sm:$0xff] %vm253_vm0, %v320_v28  ;;  %356 = vst.msk [vmem:[#allocation2 + $0x139] sm:$0xff] %vm253_vm0, %v323_v29  ;;  %v5019_v41 = vld [vmem:[#allocation2 + $0x69] sm:$0xff]  ;;  %v5023_v42 = vld [vmem:[#allocation2 + $0x91] sm:$0xff] }
  0x30   : > { %466 = vrot.lane.b32.xlu1 %v4979_v27, %s4813_s29  ;;  %472 = vrot.lane.b32.xlu0 %v4987_v30, %s4813_s29  ;;  %355 = vst.msk [vmem:[#allocation2 + $0x129] sm:$0xff] %vm253_vm0, %v322_v33  ;;  %358 = vst.msk [vmem:[#allocation2 + $0x151] sm:$0xff] %vm253_vm0, %v325_v34  ;;  %v5027_v43 = vld [vmem:[#allocation2 + $0x81] sm:$0xff]  ;;  %v5031_v44 = vld [vmem:[#allocation2 + $0xa9] sm:$0xff] }
  0x31   : > { %357 = vst.msk [vmem:[#allocation2 + $0x141] sm:$0xff] %vm253_vm0, %v324_v35  ;;  %360 = vst.msk [vmem:[#allocation2 + $0x169] sm:$0xff] %vm253_vm0, %v327_v36  ;;  %v5035_v45 = vld [vmem:[#allocation2 + $0x99] sm:$0xff]  ;;  %v5039_v46 = vld [vmem:[#allocation2 + $0xc1] sm:$0xff] }
  0x32   : > { %359 = vst.msk [vmem:[#allocation2 + $0x159] sm:$0xff] %vm253_vm0, %v326_v37  ;;  %361 = vst.msk [vmem:[#allocation2 + $0x171] sm:$0xff] %vm253_vm0, %v328_v39  ;;  %v5043_v47 = vld [vmem:[#allocation2 + $0xb1] sm:$0xff]  ;;  %v5047_v48 = vld [vmem:[#allocation2 + $0xd9] sm:$0xff] }
  0x33   : > { %v5051_v49 = vld [vmem:[#allocation2 + $0xc9] sm:$0xff]  ;;  %v5055_v50 = vld [vmem:[#allocation2 + $0xf1] sm:$0xff]  ;;  %362 = vst.msk [vmem:[#allocation2 + $0x181] sm:$0xff] %vm253_vm0, %v329_v58  ;;  %363 = vst.msk [vmem:[#allocation2 + $0x189] sm:$0xff] %vm253_vm0, %v330_v62 }
  0x34   : > { %470 = vrot.lane.b32.xlu1 %v4991_v31, %s4813_s29  ;;  %476 = vrot.lane.b32.xlu0 %v4995_v32, %s4813_s29  ;;  %v5059_v51 = vld [vmem:[#allocation2 + $0xe1] sm:$0xff]  ;;  %v5063_v52 = vld [vmem:[#allocation2 + $0x109] sm:$0xff]  ;;  %v5118_v4 = vld [vmem:[#allocation2 + $0x32] sm:$0xff] }
  0x35   : > { %v5067_v53 = vld [vmem:[#allocation2 + $0xf9] sm:$0xff]  ;;  %v5071_v54 = vld [vmem:[#allocation2 + $0x121] sm:$0xff]  ;;  %v5125_v6 = vld [vmem:[#allocation2 + $0x4a] sm:$0xff] }
  0x36   : > { %v5075_v55 = vld [vmem:[#allocation2 + $0x111] sm:$0xff]  ;;  %v5079_v56 = vld [vmem:[#allocation2 + $0x139] sm:$0xff]  ;;  %v5121_v5 = vld [vmem:[#allocation2 + $0x22] sm:$0xff] }
  0x37   : > { %v5083_v57 = vld [vmem:[#allocation2 + $0x129] sm:$0xff]  ;;  %v5089_v59 = vld [vmem:[#allocation2 + $0x151] sm:$0xff]  ;;  %v5112_v2 = vld [vmem:[#allocation2 + $0x1a] sm:$0xff] }
  0x38   : > { %474 = vrot.lane.b32.xlu1 %v5007_v38, %s4813_s29  ;;  %480 = vrot.lane.b32.xlu0 %v5015_v40, %s4813_s29  ;;  %v5093_v60 = vld [vmem:[#allocation2 + $0x141] sm:$0xff]  ;;  %v5097_v61 = vld [vmem:[#allocation2 + $0x169] sm:$0xff]  ;;  %v5137_v9 = vld [vmem:[#allocation2 + $0x52] sm:$0xff] }
  0x39   : > { %v5103_v63 = vld [vmem:[#allocation2 + $0x159] sm:$0xff]  ;;  %v5109_v1 = vld [vmem:[#allocation2 + $0x171] sm:$0xff]  ;;  %v5133_v8 = vld [vmem:[#allocation2 + $0x62] sm:$0xff] }
  0x3a   : > { %v5129_v7 = vld [vmem:[#allocation2 + $0x3a] sm:$0xff]  ;;  %v5145_v11 = vld [vmem:[#allocation2 + $0x6a] sm:$0xff]  ;;  %v5149_v12 = vld [vmem:[#allocation2 + $0x92] sm:$0xff] }
  0x3b   : > { %v5141_v10 = vld [vmem:[#allocation2 + $0x7a] sm:$0xff]  ;;  %v5153_v13 = vld [vmem:[#allocation2 + $0x82] sm:$0xff]  ;;  %v5157_v14 = vld [vmem:[#allocation2 + $0xaa] sm:$0xff] }
  0x3c   : > { %478 = vrot.lane.b32.xlu1 %v5019_v41, %s4813_s29  ;;  %484 = vrot.lane.b32.xlu0 %v5023_v42, %s4813_s29  ;;  %v5161_v15 = vld [vmem:[#allocation2 + $0x9a] sm:$0xff]  ;;  %v5165_v16 = vld [vmem:[#allocation2 + $0xc2] sm:$0xff]  ;;  %v5169_v17 = vld [vmem:[#allocation2 + $0xb2] sm:$0xff] }
  0x3d   : > { %v5173_v18 = vld [vmem:[#allocation2 + $0xda] sm:$0xff]  ;;  %v5177_v19 = vld [vmem:[#allocation2 + $0xca] sm:$0xff]  ;;  %v5181_v20 = vld [vmem:[#allocation2 + $0xf2] sm:$0xff] }
  0x3e   : > { %v5185_v21 = vld [vmem:[#allocation2 + $0xe2] sm:$0xff]  ;;  %v5189_v22 = vld [vmem:[#allocation2 + $0x10a] sm:$0xff]  ;;  %v5193_v23 = vld [vmem:[#allocation2 + $0xfa] sm:$0xff] }
  0x3f   : > { %v5197_v24 = vld [vmem:[#allocation2 + $0x122] sm:$0xff]  ;;  %v5201_v28 = vld [vmem:[#allocation2 + $0x112] sm:$0xff]  ;;  %v5205_v29 = vld [vmem:[#allocation2 + $0x13a] sm:$0xff] }
  0x40   : > { %482 = vrot.lane.b32.xlu1 %v5027_v43, %s4813_s29  ;;  %488 = vrot.lane.b32.xlu0 %v5031_v44, %s4813_s29  ;;  %v5211_v34 = vld [vmem:[#allocation2 + $0x12a] sm:$0xff]  ;;  %v5215_v35 = vld [vmem:[#allocation2 + $0x152] sm:$0xff]  ;;  %v5221_v37 = vld [vmem:[#allocation2 + $0x142] sm:$0xff] }
  0x41   : > { %7876 = vst [vmem:[#allocation6_spill] sm:$0xff] %v5221_v37  ;;  %v5227_v58 = vld [vmem:[#allocation2 + $0x16a] sm:$0xff] }
  0x42   : > { %7878 = vst [vmem:[#allocation8_spill] sm:$0xff] %v5227_v58 }
  0x44   : > { %486 = vrot.lane.b32.xlu1 %v5035_v45, %s4813_s29  ;;  %492 = vrot.lane.b32.xlu0 %v5039_v46, %s4813_s29 }
  0x48   : > { %490 = vrot.lane.b32.xlu1 %v5043_v47, %s4813_s29  ;;  %496 = vrot.lane.b32.xlu0 %v5047_v48, %s4813_s29 }
  0x4c   : > { %494 = vrot.lane.b32.xlu1 %v5051_v49, %s4813_s29  ;;  %500 = vrot.lane.b32.xlu0 %v5055_v50, %s4813_s29 }
  0x50   : > { %498 = vrot.lane.b32.xlu1 %v5059_v51, %s4813_s29  ;;  %504 = vrot.lane.b32.xlu0 %v5063_v52, %s4813_s29 }
  0x54   : > { %502 = vrot.lane.b32.xlu1 %v5067_v53, %s4813_s29  ;;  %508 = vrot.lane.b32.xlu0 %v5071_v54, %s4813_s29 }
  0x58   : > { %506 = vrot.lane.b32.xlu1 %v5075_v55, %s4813_s29  ;;  %512 = vrot.lane.b32.xlu0 %v5079_v56, %s4813_s29 }
  0x5c   : > { %510 = vrot.lane.b32.xlu1 %v5083_v57, %s4813_s29  ;;  %516 = vrot.lane.b32.xlu0 %v5089_v59, %s4813_s29 }
  0x60   : > { %514 = vrot.lane.b32.xlu1 %v5093_v60, %s4813_s29  ;;  %520 = vrot.lane.b32.xlu0 %v5097_v61, %s4813_s29 }
  0x64   : > { %518 = vrot.lane.b32.xlu1 %v5103_v63, %s4813_s29  ;;  %652 = vrot.lane.b32.xlu0 %v588_v0, %s4814_s30  ;;  %v5233_v0 = vld [vmem:[#allocation2 + $0x15a] sm:$0xff] }
  0x65   : > { %7880 = vst [vmem:[#allocation10_spill] sm:$0xff] %v5233_v0 }
  0x68   : > { %522 = vrot.lane.b32.xlu1 %v5109_v1, %s4813_s29  ;;  %656 = vrot.lane.b32.xlu0 %v5112_v2, %s4814_s30 }
  0x6c   : > { %654 = vrot.lane.b32.xlu1 %v589_v3, %s4814_s30  ;;  %660 = vrot.lane.b32.xlu0 %v5118_v4, %s4814_s30 }
  0x70   : > { %658 = vrot.lane.b32.xlu1 %v5121_v5, %s4814_s30  ;;  %664 = vrot.lane.b32.xlu0 %v5125_v6, %s4814_s30 }
  0x74   : > { %662 = vrot.lane.b32.xlu1 %v5129_v7, %s4814_s30  ;;  %668 = vrot.lane.b32.xlu0 %v5133_v8, %s4814_s30 }
  0x78   : > { %666 = vrot.lane.b32.xlu1 %v5137_v9, %s4814_s30  ;;  %672 = vrot.lane.b32.xlu0 %v5141_v10, %s4814_s30 }
  0x7c   : > { %670 = vrot.lane.b32.xlu1 %v5145_v11, %s4814_s30  ;;  %676 = vrot.lane.b32.xlu0 %v5149_v12, %s4814_s30 }
  0x80   : > { %674 = vrot.lane.b32.xlu1 %v5153_v13, %s4814_s30  ;;  %680 = vrot.lane.b32.xlu0 %v5157_v14, %s4814_s30 }
  0x84   : > { %678 = vrot.lane.b32.xlu1 %v5161_v15, %s4814_s30  ;;  %684 = vrot.lane.b32.xlu0 %v5165_v16, %s4814_s30 }
  0x88   : > { %682 = vrot.lane.b32.xlu1 %v5169_v17, %s4814_s30  ;;  %688 = vrot.lane.b32.xlu0 %v5173_v18, %s4814_s30 }
  0x89   : > { %v5207_v33 = vpop.permute.xlu0 %460 }
  0x8a   : > { %7874 = vst [vmem:[#allocation4_spill] sm:$0xff] %v5207_v33  ;;  %v5243_v33 = vld [vmem:[#allocation2 + $0x172] sm:$0xff] }
  0x8b   : > { %7883 = vst [vmem:[#allocation13_spill] sm:$0xff] %v5243_v33 }
  0x8c   : > { %686 = vrot.lane.b32.xlu1 %v5177_v19, %s4814_s30  ;;  %692 = vrot.lane.b32.xlu0 %v5181_v20, %s4814_s30 }
  0x8d   : > { %v5217_v36 = vpop.permute.xlu0 %462 }
  0x8e   : > { %7875 = vst [vmem:[#allocation5_spill] sm:$0xff] %v5217_v36 }
  0x90   : > { %690 = vrot.lane.b32.xlu1 %v5185_v21, %s4814_s30  ;;  %696 = vrot.lane.b32.xlu0 %v5189_v22, %s4814_s30 }
  0x94   : > { %694 = vrot.lane.b32.xlu1 %v5193_v23, %s4814_s30  ;;  %700 = vrot.lane.b32.xlu0 %v5197_v24, %s4814_s30 }
  0x98   : > { %698 = vrot.lane.b32.xlu1 %v5201_v28, %s4814_s30  ;;  %704 = vrot.lane.b32.xlu0 %v5205_v29, %s4814_s30 }
  0x9c   : > { %702 = vrot.lane.b32.xlu1 %v5211_v34, %s4814_s30  ;;  %708 = vrot.lane.b32.xlu0 %v5215_v35, %s4814_s30 }
  0x9e   : > { %v5225_v39 = vpop.permute.xlu1 %464  ;;  %v5229_v62 = vpop.permute.xlu0 %468 }
  0x9f   : > { %7877 = vst [vmem:[#allocation7_spill] sm:$0xff] %v5225_v39  ;;  %7879 = vst [vmem:[#allocation9_spill] sm:$0xff] %v5229_v62  ;;  %v366_v39 = vld [vmem:[#allocation2 + $0x18] sm:$0xff] }
  0xa0   : > { %706 = vrot.lane.b32.xlu1 %v5221_v37, %s4814_s30  ;;  %712 = vrot.lane.b32.xlu0 %v5227_v58, %s4814_s30  ;;  %v5252_v58 = vld [vmem:[#allocation2 + $0x30] sm:$0xff] }
  0xa1   : > { %7886 = vst [vmem:[#allocation16_spill] sm:$0xff] %v5252_v58 }
  0xa2   : > { %v5237_v3 = vpop.permute.xlu1 %466  ;;  %v5239_v36 = vpop.permute.xlu0 %472 }
  0xa3   : > { %7881 = vst [vmem:[#allocation11_spill] sm:$0xff] %v5237_v3  ;;  %7882 = vst [vmem:[#allocation12_spill] sm:$0xff] %v5239_v36  ;;  %v367_v3 = vld [vmem:[#allocation2 + $0x20] sm:$0xff] }
  0xa4   : > { %710 = vrot.lane.b32.xlu1 %v5233_v0, %s4814_s30  ;;  %845 = vrot.lane.b32.xlu0 %v366_v39, %s4815_s7  ;;  %v5261_v39 = vld [vmem:[#allocation2 + $0x48] sm:$0xff] }
  0xa5   : > { %7889 = vst [vmem:[#allocation19_spill] sm:$0xff] %v5261_v39 }
  0xa6   : > { %v5246_v62 = vpop.permute.xlu1 %470  ;;  %v5248_v37 = vpop.permute.xlu0 %476 }
  0xa7   : > { %7884 = vst [vmem:[#allocation14_spill] sm:$0xff] %v5246_v62  ;;  %7885 = vst [vmem:[#allocation15_spill] sm:$0xff] %v5248_v37  ;;  %v5267_v62 = vld [vmem:[#allocation2 + $0x38] sm:$0xff] }
  0xa8   : > { %714 = vrot.lane.b32.xlu1 %v5243_v33, %s4814_s30  ;;  %849 = vrot.lane.b32.xlu0 %v5252_v58, %s4815_s7  ;;  %7891 = vst [vmem:[#allocation21_spill] sm:$0xff] %v5267_v62 }
  0xaa   : > { %v5256_v36 = vpop.permute.xlu1 %474  ;;  %v5258_v0 = vpop.permute.xlu0 %480 }
  0xab   : > { %7887 = vst [vmem:[#allocation17_spill] sm:$0xff] %v5256_v36  ;;  %7888 = vst [vmem:[#allocation18_spill] sm:$0xff] %v5258_v0  ;;  %v5273_v36 = vld [vmem:[#allocation2 + $0x60] sm:$0xff]  ;;  %v5279_v0 = vld [vmem:[#allocation2 + $0x50] sm:$0xff] }
  0xac   : > { %847 = vrot.lane.b32.xlu1 %v367_v3, %s4815_s7  ;;  %853 = vrot.lane.b32.xlu0 %v5261_v39, %s4815_s7  ;;  %7893 = vst [vmem:[#allocation23_spill] sm:$0xff] %v5273_v36  ;;  %7895 = vst [vmem:[#allocation25_spill] sm:$0xff] %v5279_v0 }
  0xae   : > { %v5265_v37 = vpop.permute.xlu1 %478  ;;  %v5269_v33 = vpop.permute.xlu0 %484 }
  0xaf   : > { %7890 = vst [vmem:[#allocation20_spill] sm:$0xff] %v5265_v37  ;;  %7892 = vst [vmem:[#allocation22_spill] sm:$0xff] %v5269_v33  ;;  %v5285_v37 = vld [vmem:[#allocation2 + $0x78] sm:$0xff] }
  0xb0   : > { %851 = vrot.lane.b32.xlu1 %v5267_v62, %s4815_s7  ;;  %857 = vrot.lane.b32.xlu0 %v5273_v36, %s4815_s7  ;;  %7897 = vst [vmem:[#allocation27_spill] sm:$0xff] %v5285_v37  ;;  %v5291_v62 = vld [vmem:[#allocation2 + $0x68] sm:$0xff] }
  0xb1   : > { %7899 = vst [vmem:[#allocation29_spill] sm:$0xff] %v5291_v62 }
  0xb2   : > { %v5277_v3 = vpop.permute.xlu1 %482  ;;  %v5281_v58 = vpop.permute.xlu0 %488 }
  0xb3   : > { %7894 = vst [vmem:[#allocation24_spill] sm:$0xff] %v5277_v3  ;;  %7896 = vst [vmem:[#allocation26_spill] sm:$0xff] %v5281_v58  ;;  %v5297_v3 = vld [vmem:[#allocation2 + $0x90] sm:$0xff] }
  0xb4   : > { %855 = vrot.lane.b32.xlu1 %v5279_v0, %s4815_s7  ;;  %861 = vrot.lane.b32.xlu0 %v5285_v37, %s4815_s7  ;;  %7901 = vst [vmem:[#allocation31_spill] sm:$0xff] %v5297_v3  ;;  %v5303_v0 = vld [vmem:[#allocation2 + $0x80] sm:$0xff] }
  0xb5   : > { %7903 = vst [vmem:[#allocation33_spill] sm:$0xff] %v5303_v0 }
  0xb6   : > { %v5289_v33 = vpop.permute.xlu1 %486  ;;  %v5293_v39 = vpop.permute.xlu0 %492 }
  0xb7   : > { %7898 = vst [vmem:[#allocation28_spill] sm:$0xff] %v5289_v33  ;;  %7900 = vst [vmem:[#allocation30_spill] sm:$0xff] %v5293_v39  ;;  %v5309_v33 = vld [vmem:[#allocation2 + $0xa8] sm:$0xff] }
  0xb8   : > { %859 = vrot.lane.b32.xlu1 %v5291_v62, %s4815_s7  ;;  %865 = vrot.lane.b32.xlu0 %v5297_v3, %s4815_s7  ;;  %7905 = vst [vmem:[#allocation35_spill] sm:$0xff] %v5309_v33  ;;  %v5315_v62 = vld [vmem:[#allocation2 + $0x98] sm:$0xff] }
  0xb9   : > { %7907 = vst [vmem:[#allocation37_spill] sm:$0xff] %v5315_v62 }
  0xba   : > { %v5301_v58 = vpop.permute.xlu1 %490  ;;  %v5305_v36 = vpop.permute.xlu0 %496 }
  0xbb   : > { %7902 = vst [vmem:[#allocation32_spill] sm:$0xff] %v5301_v58  ;;  %7904 = vst [vmem:[#allocation34_spill] sm:$0xff] %v5305_v36  ;;  %v5321_v58 = vld [vmem:[#allocation2 + $0xc0] sm:$0xff] }
  0xbc   : > { %863 = vrot.lane.b32.xlu1 %v5303_v0, %s4815_s7  ;;  %869 = vrot.lane.b32.xlu0 %v5309_v33, %s4815_s7  ;;  %7909 = vst [vmem:[#allocation39_spill] sm:$0xff] %v5321_v58  ;;  %v5327_v0 = vld [vmem:[#allocation2 + $0xb0] sm:$0xff] }
  0xbd   : > { %7911 = vst [vmem:[#allocation41_spill] sm:$0xff] %v5327_v0 }
  0xbe   : > { %v5313_v39 = vpop.permute.xlu1 %494  ;;  %v5317_v37 = vpop.permute.xlu0 %500 }
  0xbf   : > { %7906 = vst [vmem:[#allocation36_spill] sm:$0xff] %v5313_v39  ;;  %7908 = vst [vmem:[#allocation38_spill] sm:$0xff] %v5317_v37  ;;  %v5333_v39 = vld [vmem:[#allocation2 + $0xd8] sm:$0xff] }
  0xc0   : > { %867 = vrot.lane.b32.xlu1 %v5315_v62, %s4815_s7  ;;  %873 = vrot.lane.b32.xlu0 %v5321_v58, %s4815_s7  ;;  %7913 = vst [vmem:[#allocation43_spill] sm:$0xff] %v5333_v39  ;;  %v5339_v62 = vld [vmem:[#allocation2 + $0xc8] sm:$0xff] }
  0xc1   : > { %7915 = vst [vmem:[#allocation45_spill] sm:$0xff] %v5339_v62 }
  0xc2   : > { %v5325_v36 = vpop.permute.xlu1 %498  ;;  %v5329_v3 = vpop.permute.xlu0 %504 }
  0xc3   : > { %7910 = vst [vmem:[#allocation40_spill] sm:$0xff] %v5325_v36  ;;  %7912 = vst [vmem:[#allocation42_spill] sm:$0xff] %v5329_v3  ;;  %v5345_v36 = vld [vmem:[#allocation2 + $0xf0] sm:$0xff] }
  0xc4   : > { %871 = vrot.lane.b32.xlu1 %v5327_v0, %s4815_s7  ;;  %877 = vrot.lane.b32.xlu0 %v5333_v39, %s4815_s7  ;;  %7917 = vst [vmem:[#allocation47_spill] sm:$0xff] %v5345_v36  ;;  %v5351_v0 = vld [vmem:[#allocation2 + $0xe0] sm:$0xff] }
  0xc5   : > { %7919 = vst [vmem:[#allocation49_spill] sm:$0xff] %v5351_v0 }
  0xc6   : > { %v5337_v37 = vpop.permute.xlu1 %502  ;;  %v5341_v33 = vpop.permute.xlu0 %508 }
  0xc7   : > { %7914 = vst [vmem:[#allocation44_spill] sm:$0xff] %v5337_v37  ;;  %7916 = vst [vmem:[#allocation46_spill] sm:$0xff] %v5341_v33  ;;  %v5357_v37 = vld [vmem:[#allocation2 + $0x108] sm:$0xff] }
  0xc8   : > { %875 = vrot.lane.b32.xlu1 %v5339_v62, %s4815_s7  ;;  %881 = vrot.lane.b32.xlu0 %v5345_v36, %s4815_s7  ;;  %7921 = vst [vmem:[#allocation51_spill] sm:$0xff] %v5357_v37  ;;  %v5363_v62 = vld [vmem:[#allocation2 + $0xf8] sm:$0xff] }
  0xc9   : > { %7923 = vst [vmem:[#allocation53_spill] sm:$0xff] %v5363_v62 }
  0xca   : > { %v5349_v3 = vpop.permute.xlu1 %506  ;;  %v5353_v58 = vpop.permute.xlu0 %512 }
  0xcb   : > { %7918 = vst [vmem:[#allocation48_spill] sm:$0xff] %v5349_v3  ;;  %7920 = vst [vmem:[#allocation50_spill] sm:$0xff] %v5353_v58  ;;  %v5369_v3 = vld [vmem:[#allocation2 + $0x120] sm:$0xff] }
  0xcc   : > { %879 = vrot.lane.b32.xlu1 %v5351_v0, %s4815_s7  ;;  %885 = vrot.lane.b32.xlu0 %v5357_v37, %s4815_s7  ;;  %7925 = vst [vmem:[#allocation55_spill] sm:$0xff] %v5369_v3  ;;  %v5375_v0 = vld [vmem:[#allocation2 + $0x110] sm:$0xff] }
  0xcd   : > { %7927 = vst [vmem:[#allocation57_spill] sm:$0xff] %v5375_v0 }
  0xce   : > { %v5361_v33 = vpop.permute.xlu1 %510  ;;  %v5365_v39 = vpop.permute.xlu0 %516 }
  0xcf   : > { %7922 = vst [vmem:[#allocation52_spill] sm:$0xff] %v5361_v33  ;;  %7924 = vst [vmem:[#allocation54_spill] sm:$0xff] %v5365_v39  ;;  %v5381_v33 = vld [vmem:[#allocation2 + $0x138] sm:$0xff] }
  0xd0   : > { %883 = vrot.lane.b32.xlu1 %v5363_v62, %s4815_s7  ;;  %889 = vrot.lane.b32.xlu0 %v5369_v3, %s4815_s7  ;;  %7929 = vst [vmem:[#allocation59_spill] sm:$0xff] %v5381_v33  ;;  %v5387_v62 = vld [vmem:[#allocation2 + $0x128] sm:$0xff] }
  0xd1   : > { %7931 = vst [vmem:[#allocation61_spill] sm:$0xff] %v5387_v62 }
  0xd2   : > { %v5373_v58 = vpop.permute.xlu1 %514  ;;  %v5377_v36 = vpop.permute.xlu0 %520 }
  0xd3   : > { %7926 = vst [vmem:[#allocation56_spill] sm:$0xff] %v5373_v58  ;;  %7928 = vst [vmem:[#allocation58_spill] sm:$0xff] %v5377_v36  ;;  %v5393_v58 = vld [vmem:[#allocation2 + $0x150] sm:$0xff] }
  0xd4   : > { %887 = vrot.lane.b32.xlu1 %v5375_v0, %s4815_s7  ;;  %893 = vrot.lane.b32.xlu0 %v5381_v33, %s4815_s7  ;;  %7933 = vst [vmem:[#allocation63_spill] sm:$0xff] %v5393_v58  ;;  %v5399_v0 = vld [vmem:[#allocation2 + $0x140] sm:$0xff] }
  0xd5   : > { %7935 = vst [vmem:[#allocation65_spill] sm:$0xff] %v5399_v0  ;;  %v5413_v33 = vld [vmem:[#allocation2 + $0x180] sm:$0xff] }
  0xd6   : > { %v5385_v39 = vpop.permute.xlu1 %518  ;;  %v5389_v37 = vpop.permute.xlu0 %652 }
  0xd7   : > { %7930 = vst [vmem:[#allocation60_spill] sm:$0xff] %v5385_v39  ;;  %7932 = vst [vmem:[#allocation62_spill] sm:$0xff] %v5389_v37  ;;  %v5405_v39 = vld [vmem:[#allocation2 + $0x168] sm:$0xff] }
  0xd8   : > { %891 = vrot.lane.b32.xlu1 %v5387_v62, %s4815_s7  ;;  %897 = vrot.lane.b32.xlu0 %v5393_v58, %s4815_s7  ;;  %v5411_v62 = vld [vmem:[#allocation2 + $0x158] sm:$0xff] }
  0xd9   : > { %7938 = vst [vmem:[#allocation68_spill] sm:$0xff] %v5411_v62 }
  0xda   : > { %v5397_v36 = vpop.permute.xlu1 %522  ;;  %v5401_v3 = vpop.permute.xlu0 %656 }
  0xdb   : > { %7934 = vst [vmem:[#allocation64_spill] sm:$0xff] %v5397_v36  ;;  %7936 = vst [vmem:[#allocation66_spill] sm:$0xff] %v5401_v3  ;;  %v5423_v3 = vld [vmem:[#allocation2 + $0x170] sm:$0xff] }
  0xdc   : > { %895 = vrot.lane.b32.xlu1 %v5399_v0, %s4815_s7  ;;  %901 = vrot.lane.b32.xlu0 %v5405_v39, %s4815_s7 }
  0xde   : > { %v5409_v37 = vpop.permute.xlu1 %654  ;;  %v5415_v58 = vpop.permute.xlu0 %660 }
  0xdf   : > { %7937 = vst [vmem:[#allocation67_spill] sm:$0xff] %v5409_v37  ;;  %7939 = vst [vmem:[#allocation69_spill] sm:$0xff] %v5415_v58  ;;  %v5429_v37 = vld [vmem:[#allocation2 + $0x188] sm:$0xff] }
  0xe0   : > { %899 = vrot.lane.b32.xlu1 %v5411_v62, %s4815_s7  ;;  %905 = vrot.lane.b32.xlu0 %v5413_v33, %s4815_s7 }
  0xe2   : > { %v5421_v36 = vpop.permute.xlu1 %658  ;;  %v5425_v0 = vpop.permute.xlu0 %664 }
  0xe3   : > { %7940 = vst [vmem:[#allocation70_spill] sm:$0xff] %v5421_v36  ;;  %7941 = vst [vmem:[#allocation71_spill] sm:$0xff] %v5425_v0 }
  0xe4   : > { %903 = vrot.lane.b32.xlu1 %v5423_v3, %s4815_s7  ;;  %1038 = vrot.lane.b32.xlu0 %v4970_v25, %s4816_s8 }
  0xe6   : > { %v5433_v58 = vpop.permute.xlu1 %662  ;;  %v5435_v62 = vpop.permute.xlu0 %668 }
  0xe7   : > { %7942 = vst [vmem:[#allocation72_spill] sm:$0xff] %v5433_v58  ;;  %7943 = vst [vmem:[#allocation73_spill] sm:$0xff] %v5435_v62 }
  0xe8   : > { %907 = vrot.lane.b32.xlu1 %v5429_v37, %s4815_s7  ;;  %1042 = vrot.lane.b32.xlu0 %v4972_v26, %s4816_s8 }
  0xea   : > { %v5441_v0 = vpop.permute.xlu1 %666  ;;  %v5443_v36 = vpop.permute.xlu0 %672 }
  0xec   : > { %1040 = vrot.lane.b32.xlu1 %v4979_v27, %s4816_s8  ;;  %1046 = vrot.lane.b32.xlu0 %v4987_v30, %s4816_s8 }
  0xee   : > { %v5449_v25 = vpop.permute.xlu1 %670  ;;  %v5451_v58 = vpop.permute.xlu0 %676 }
  0xef   : > { %7944 = vst [vmem:[#allocation74_spill] sm:$0xff] %v5451_v58 }
  0xf0   : > { %1044 = vrot.lane.b32.xlu1 %v4991_v31, %s4816_s8  ;;  %1050 = vrot.lane.b32.xlu0 %v4995_v32, %s4816_s8 }
  0xf2   : > { %v5457_v26 = vpop.permute.xlu1 %674  ;;  %v5459_v62 = vpop.permute.xlu0 %680 }
  0xf3   : > { %7945 = vst [vmem:[#allocation75_spill] sm:$0xff] %v5457_v26  ;;  %7946 = vst [vmem:[#allocation76_spill] sm:$0xff] %v5459_v62  ;;  %v1778_v26 = vld [vmem:[#allocation2 + $0x1a2] sm:$0xff] }
  0xf4   : > { %1048 = vrot.lane.b32.xlu1 %v5007_v38, %s4816_s8  ;;  %1054 = vrot.lane.b32.xlu0 %v5015_v40, %s4816_s8 }
  0xf6   : > { %v5465_v27 = vpop.permute.xlu1 %678  ;;  %v5467_v30 = vpop.permute.xlu0 %684 }
  0xf7   : > { %7947 = vst [vmem:[#allocation77_spill] sm:$0xff] %v5465_v27  ;;  %7948 = vst [vmem:[#allocation78_spill] sm:$0xff] %v5467_v30  ;;  %v1751_v30 = vld [vmem:[#allocation2 + $0x62] sm:$0xff] }
  0xf8   : > { %1052 = vrot.lane.b32.xlu1 %v5019_v41, %s4816_s8  ;;  %1058 = vrot.lane.b32.xlu0 %v5023_v42, %s4816_s8 }
  0xfa   : > { %v5473_v31 = vpop.permute.xlu1 %682  ;;  %v5475_v32 = vpop.permute.xlu0 %688 }
  0xfb   : > { %7949 = vst [vmem:[#allocation79_spill] sm:$0xff] %v5473_v31  ;;  %7950 = vst [vmem:[#allocation80_spill] sm:$0xff] %v5475_v32  ;;  %v1560_v31 = vld [vmem:[#allocation2 + $0x79] sm:$0xff] }
  0xfc   : > { %1056 = vrot.lane.b32.xlu1 %v5027_v43, %s4816_s8  ;;  %1062 = vrot.lane.b32.xlu0 %v5031_v44, %s4816_s8 }
  0xfe   : > { %v5481_v38 = vpop.permute.xlu1 %686  ;;  %v5483_v40 = vpop.permute.xlu0 %692 }
  0xff   : > { %7951 = vst [vmem:[#allocation81_spill] sm:$0xff] %v5481_v38  ;;  %7952 = vst [vmem:[#allocation82_spill] sm:$0xff] %v5483_v40  ;;  %v1944_v38 = vld [vmem:[%s7832_s1 + $0x20] sm:$0xf] }
 0x100   : > { %1060 = vrot.lane.b32.xlu1 %v5035_v45, %s4816_s8  ;;  %1066 = vrot.lane.b32.xlu0 %v5039_v46, %s4816_s8 }
 0x102   : > { %v5489_v41 = vpop.permute.xlu1 %690  ;;  %v5491_v42 = vpop.permute.xlu0 %696 }
 0x103   : > { %7953 = vst [vmem:[#allocation83_spill] sm:$0xff] %v5489_v41  ;;  %7954 = vst [vmem:[#allocation84_spill] sm:$0xff] %v5491_v42 }
 0x104   : > { %1064 = vrot.lane.b32.xlu1 %v5043_v47, %s4816_s8  ;;  %1070 = vrot.lane.b32.xlu0 %v5047_v48, %s4816_s8 }
 0x106   : > { %v5497_v43 = vpop.permute.xlu1 %694  ;;  %v5499_v44 = vpop.permute.xlu0 %700 }
 0x107   : > { %7955 = vst [vmem:[#allocation85_spill] sm:$0xff] %v5497_v43  ;;  %7956 = vst [vmem:[#allocation86_spill] sm:$0xff] %v5499_v44  ;;  %v7995_v44 = vld [vmem:[#allocation25_spill] sm:$0xff] }
 0x108   : > { %1068 = vrot.lane.b32.xlu1 %v5051_v49, %s4816_s8  ;;  %1074 = vrot.lane.b32.xlu0 %v5055_v50, %s4816_s8 }
 0x10a   : > { %v5505_v45 = vpop.permute.xlu1 %698  ;;  %v5507_v46 = vpop.permute.xlu0 %704 }
 0x10b   : > { %7957 = vst [vmem:[#allocation87_spill] sm:$0xff] %v5505_v45  ;;  %7958 = vst [vmem:[#allocation88_spill] sm:$0xff] %v5507_v46 }
 0x10c   : > { %1072 = vrot.lane.b32.xlu1 %v5059_v51, %s4816_s8  ;;  %1078 = vrot.lane.b32.xlu0 %v5063_v52, %s4816_s8 }
 0x10e   : > { %v5513_v47 = vpop.permute.xlu1 %702  ;;  %v5515_v48 = vpop.permute.xlu0 %708 }
 0x10f   : > { %7959 = vst [vmem:[#allocation89_spill] sm:$0xff] %v5513_v47  ;;  %7960 = vst [vmem:[#allocation90_spill] sm:$0xff] %v5515_v48  ;;  %v7993_v47 = vld [vmem:[#allocation23_spill] sm:$0xff] }
 0x110   : > { %1076 = vrot.lane.b32.xlu1 %v5067_v53, %s4816_s8  ;;  %1082 = vrot.lane.b32.xlu0 %v5071_v54, %s4816_s8 }
 0x112   : > { %v5521_v49 = vpop.permute.xlu1 %706  ;;  %v5523_v50 = vpop.permute.xlu0 %712 }
 0x113   : > { %7961 = vst [vmem:[#allocation91_spill] sm:$0xff] %v5521_v49  ;;  %7962 = vst [vmem:[#allocation92_spill] sm:$0xff] %v5523_v50 }
 0x114   : > { %1080 = vrot.lane.b32.xlu1 %v5075_v55, %s4816_s8  ;;  %1086 = vrot.lane.b32.xlu0 %v5079_v56, %s4816_s8  ;;  %v5547_v56 = vld [vmem:[#allocation2 + $0x181] sm:$0xff] }
 0x116   : > { %v5529_v51 = vpop.permute.xlu1 %710  ;;  %v5531_v52 = vpop.permute.xlu0 %845 }
 0x117   : > { %7963 = vst [vmem:[#allocation93_spill] sm:$0xff] %v5529_v51 }
 0x118   : > { %1084 = vrot.lane.b32.xlu1 %v5083_v57, %s4816_s8  ;;  %1090 = vrot.lane.b32.xlu0 %v5089_v59, %s4816_s8 }
 0x11a   : > { %v5537_v53 = vpop.permute.xlu1 %714  ;;  %v5539_v54 = vpop.permute.xlu0 %849 }
 0x11b   : > { %7964 = vst [vmem:[#allocation94_spill] sm:$0xff] %v5537_v53 }
 0x11c   : > { %1088 = vrot.lane.b32.xlu1 %v5093_v60, %s4816_s8  ;;  %1094 = vrot.lane.b32.xlu0 %v5097_v61, %s4816_s8  ;;  %v5561_v60 = vld [vmem:[#allocation2 + $0x189] sm:$0xff] }
 0x11e   : > { %v5545_v55 = vpop.permute.xlu1 %847  ;;  %v5549_v50 = vpop.permute.xlu0 %853 }
 0x120   : > { %1092 = vrot.lane.b32.xlu1 %v5103_v63, %s4816_s8  ;;  %1098 = vrot.lane.b32.xlu0 %v5547_v56, %s4816_s8 }
 0x122   : > { %v5555_v57 = vpop.permute.xlu1 %851  ;;  %v5557_v59 = vpop.permute.xlu0 %857 }
 0x124   : > { %1096 = vrot.lane.b32.xlu1 %v5109_v1, %s4816_s8  ;;  %1231 = vrot.lane.b32.xlu0 %v5112_v2, %s4817_s9 }
 0x126   : > { %v5565_v61 = vpop.permute.xlu1 %855  ;;  %v5567_v53 = vpop.permute.xlu0 %861 }
 0x128   : > { %1100 = vrot.lane.b32.xlu1 %v5561_v60, %s4816_s8  ;;  %1235 = vrot.lane.b32.xlu0 %v5118_v4, %s4817_s9 }
 0x12a   : > { %v5573_v63 = vpop.permute.xlu1 %859  ;;  %v5575_v51 = vpop.permute.xlu0 %865 }
 0x12c   : > { %1233 = vrot.lane.b32.xlu1 %v5121_v5, %s4817_s9  ;;  %1239 = vrot.lane.b32.xlu0 %v5125_v6, %s4817_s9 }
 0x12e   : > { %v5581_v1 = vpop.permute.xlu1 %863  ;;  %v5583_v2 = vpop.permute.xlu0 %869 }
 0x12f   : > { %7965 = vst [vmem:[#allocation95_spill] sm:$0xff] %v5583_v2 }
 0x130   : > { %1237 = vrot.lane.b32.xlu1 %v5129_v7, %s4817_s9  ;;  %1243 = vrot.lane.b32.xlu0 %v5133_v8, %s4817_s9 }
 0x132   : > { %v5589_v4 = vpop.permute.xlu1 %867  ;;  %v5591_v48 = vpop.permute.xlu0 %873 }
 0x133   : > { %7966 = vst [vmem:[#allocation96_spill] sm:$0xff] %v5589_v4  ;;  %7967 = vst [vmem:[#allocation97_spill] sm:$0xff] %v5591_v48 }
 0x134   : > { %1241 = vrot.lane.b32.xlu1 %v5137_v9, %s4817_s9  ;;  %1247 = vrot.lane.b32.xlu0 %v5141_v10, %s4817_s9 }
 0x136   : > { %v5597_v5 = vpop.permute.xlu1 %871  ;;  %v5599_v6 = vpop.permute.xlu0 %877 }
 0x137   : > { %7968 = vst [vmem:[#allocation98_spill] sm:$0xff] %v5597_v5  ;;  %7969 = vst [vmem:[#allocation99_spill] sm:$0xff] %v5599_v6  ;;  %v1572_v5 = vld [vmem:[#allocation2 + $0x109] sm:$0xff] }
 0x138   : > { %1245 = vrot.lane.b32.xlu1 %v5145_v11, %s4817_s9  ;;  %1251 = vrot.lane.b32.xlu0 %v5149_v12, %s4817_s9 }
 0x13a   : > { %v5605_v7 = vpop.permute.xlu1 %875  ;;  %v5607_v8 = vpop.permute.xlu0 %881 }
 0x13b   : > { %7970 = vst [vmem:[#allocation100_spill] sm:$0xff] %v5605_v7  ;;  %7971 = vst [vmem:[#allocation101_spill] sm:$0xff] %v5607_v8 }
 0x13c   : > { %1249 = vrot.lane.b32.xlu1 %v5153_v13, %s4817_s9  ;;  %1255 = vrot.lane.b32.xlu0 %v5157_v14, %s4817_s9 }
 0x13e   : > { %v5613_v9 = vpop.permute.xlu1 %879  ;;  %v5615_v10 = vpop.permute.xlu0 %885 }
 0x13f   : > { %7972 = vst [vmem:[#allocation102_spill] sm:$0xff] %v5613_v9  ;;  %7973 = vst [vmem:[#allocation103_spill] sm:$0xff] %v5615_v10  ;;  %v8007_v10 = vld [vmem:[#allocation37_spill] sm:$0xff] }
 0x140   : > { %1253 = vrot.lane.b32.xlu1 %v5161_v15, %s4817_s9  ;;  %1259 = vrot.lane.b32.xlu0 %v5165_v16, %s4817_s9  ;;  %v1555_v9 = vld [vmem:[#allocation2 + $0x39] sm:$0xff] }
 0x142   : > { %v5621_v11 = vpop.permute.xlu1 %883  ;;  %v5623_v12 = vpop.permute.xlu0 %889 }
 0x143   : > { %7974 = vst [vmem:[#allocation104_spill] sm:$0xff] %v5621_v11  ;;  %7975 = vst [vmem:[#allocation105_spill] sm:$0xff] %v5623_v12  ;;  %v7999_v12 = vld [vmem:[#allocation29_spill] sm:$0xff] }
 0x144   : > { %1257 = vrot.lane.b32.xlu1 %v5169_v17, %s4817_s9  ;;  %1263 = vrot.lane.b32.xlu0 %v5173_v18, %s4817_s9  ;;  %v8011_v11 = vld [vmem:[#allocation41_spill] sm:$0xff] }
 0x146   : > { %v5629_v13 = vpop.permute.xlu1 %887  ;;  %v5631_v14 = vpop.permute.xlu0 %893 }
 0x147   : > { %7976 = vst [vmem:[#allocation106_spill] sm:$0xff] %v5629_v13  ;;  %7977 = vst [vmem:[#allocation107_spill] sm:$0xff] %v5631_v14  ;;  %v8003_v13 = vld [vmem:[#allocation33_spill] sm:$0xff] }
 0x148   : > { %1261 = vrot.lane.b32.xlu1 %v5177_v19, %s4817_s9  ;;  %1267 = vrot.lane.b32.xlu0 %v5181_v20, %s4817_s9 }
 0x14a   : > { %v5637_v15 = vpop.permute.xlu1 %891  ;;  %v5639_v16 = vpop.permute.xlu0 %897 }
 0x14b   : > { %7978 = vst [vmem:[#allocation108_spill] sm:$0xff] %v5637_v15  ;;  %7979 = vst [vmem:[#allocation109_spill] sm:$0xff] %v5639_v16  ;;  %v7996_v15 = vld [vmem:[#allocation27_spill] sm:$0xff] }
 0x14c   : > { %1265 = vrot.lane.b32.xlu1 %v5185_v21, %s4817_s9  ;;  %1271 = vrot.lane.b32.xlu0 %v5189_v22, %s4817_s9 }
 0x14e   : > { %v5645_v17 = vpop.permute.xlu1 %895  ;;  %v5647_v18 = vpop.permute.xlu0 %901 }
 0x14f   : > { %7980 = vst [vmem:[#allocation110_spill] sm:$0xff] %v5645_v17  ;;  %7981 = vst [vmem:[#allocation111_spill] sm:$0xff] %v5647_v18 }
 0x150   : > { %1269 = vrot.lane.b32.xlu1 %v5193_v23, %s4817_s9  ;;  %1275 = vrot.lane.b32.xlu0 %v5197_v24, %s4817_s9 }
 0x152   : > { %v5653_v19 = vpop.permute.xlu1 %899  ;;  %v5655_v20 = vpop.permute.xlu0 %905 }
 0x153   : > { %7982 = vst [vmem:[#allocation112_spill] sm:$0xff] %v5653_v19  ;;  %7983 = vst [vmem:[#allocation113_spill] sm:$0xff] %v5655_v20  ;;  %v7986_v20 = vld [vmem:[#allocation6_spill] sm:$0xff]  ;;  %v7990_v19 = vld [vmem:[#allocation16_spill] sm:$0xff] }
 0x154   : > { %1273 = vrot.lane.b32.xlu1 %v5201_v28, %s4817_s9  ;;  %1279 = vrot.lane.b32.xlu0 %v5205_v29, %s4817_s9  ;;  %v7987_v28 = vld [vmem:[#allocation8_spill] sm:$0xff] }
 0x156   : > { %v5661_v21 = vpop.permute.xlu1 %903  ;;  %v5663_v22 = vpop.permute.xlu0 %1038 }
 0x157   : > { %7984 = vst [vmem:[#allocation114_spill] sm:$0xff] %v5661_v21  ;;  %v5679_v21 = vld [vmem:[#allocation2 + $0x182] sm:$0xff] }
 0x158   : > { %1277 = vrot.lane.b32.xlu1 %v5211_v34, %s4817_s9  ;;  %1283 = vrot.lane.b32.xlu0 %v5215_v35, %s4817_s9  ;;  %v7988_v34 = vld [vmem:[#allocation10_spill] sm:$0xff] }
 0x15a   : > { %v5669_v23 = vpop.permute.xlu1 %907  ;;  %v5671_v24 = vpop.permute.xlu0 %1042 }
 0x15b   : > { %7985 = vst [vmem:[#allocation115_spill] sm:$0xff] %v5669_v23 }
 0x15c   : > { %1281 = vrot.lane.b32.xlu1 %v7986_v20, %s4817_s9  ;;  %1287 = vrot.lane.b32.xlu0 %v7987_v28, %s4817_s9  ;;  %v7989_v20 = vld [vmem:[#allocation13_spill] sm:$0xff]  ;;  %v5693_v28 = vld [vmem:[#allocation2 + $0x18a] sm:$0xff] }
 0x15e   : > { %v5677_v29 = vpop.permute.xlu1 %1040  ;;  %v5681_v18 = vpop.permute.xlu0 %1046 }
 0x160   : > { %1285 = vrot.lane.b32.xlu1 %v7988_v34, %s4817_s9  ;;  %1291 = vrot.lane.b32.xlu0 %v5679_v21, %s4817_s9  ;;  %v7991_v34 = vld [vmem:[#allocation19_spill] sm:$0xff] }
 0x162   : > { %v5687_v35 = vpop.permute.xlu1 %1044  ;;  %v5689_v23 = vpop.permute.xlu0 %1050 }
 0x164   : > { %1289 = vrot.lane.b32.xlu1 %v7989_v20, %s4817_s9  ;;  %1425 = vrot.lane.b32.xlu0 %v7990_v19, %s4818_s10  ;;  %v7992_v20 = vld [vmem:[#allocation21_spill] sm:$0xff] }
 0x166   : > { %v5697_v49 = vpop.permute.xlu1 %1048  ;;  %v5699_v16 = vpop.permute.xlu0 %1054 }
 0x168   : > { %1293 = vrot.lane.b32.xlu1 %v5693_v28, %s4817_s9  ;;  %1429 = vrot.lane.b32.xlu0 %v7991_v34, %s4818_s10 }
 0x16a   : > { %v5705_v46 = vpop.permute.xlu1 %1052  ;;  %v5707_v17 = vpop.permute.xlu0 %1058 }
 0x16c   : > { %1427 = vrot.lane.b32.xlu1 %v7992_v20, %s4818_s10  ;;  %1433 = vrot.lane.b32.xlu0 %v7993_v47, %s4818_s10  ;;  %v8000_v20 = vld [vmem:[#allocation31_spill] sm:$0xff] }
 0x16e   : > { %v5713_v19 = vpop.permute.xlu1 %1056  ;;  %v5715_v14 = vpop.permute.xlu0 %1062 }
 0x16f   : > { %7994 = vst [vmem:[#allocation6_spill] sm:$0xff] %v5715_v14 }
 0x170   : > { %1431 = vrot.lane.b32.xlu1 %v7995_v44, %s4818_s10  ;;  %1437 = vrot.lane.b32.xlu0 %v7996_v15, %s4818_s10  ;;  %v8004_v44 = vld [vmem:[#allocation35_spill] sm:$0xff] }
 0x172   : > { %v5721_v34 = vpop.permute.xlu1 %1060  ;;  %v5723_v45 = vpop.permute.xlu0 %1066 }
 0x173   : > { %7997 = vst [vmem:[#allocation8_spill] sm:$0xff] %v5721_v34  ;;  %7998 = vst [vmem:[#allocation10_spill] sm:$0xff] %v5723_v45  ;;  %v1767_v34 = vld [vmem:[#allocation2 + $0x122] sm:$0xff] }
 0x174   : > { %1435 = vrot.lane.b32.xlu1 %v7999_v12, %s4818_s10  ;;  %1441 = vrot.lane.b32.xlu0 %v8000_v20, %s4818_s10  ;;  %v8008_v12 = vld [vmem:[#allocation39_spill] sm:$0xff] }
 0x176   : > { %v5729_v47 = vpop.permute.xlu1 %1064  ;;  %v5731_v42 = vpop.permute.xlu0 %1070 }
 0x177   : > { %8001 = vst [vmem:[#allocation13_spill] sm:$0xff] %v5729_v47  ;;  %8002 = vst [vmem:[#allocation16_spill] sm:$0xff] %v5731_v42  ;;  %v1763_v47 = vld [vmem:[#allocation2 + $0xf2] sm:$0xff] }
 0x178   : > { %1439 = vrot.lane.b32.xlu1 %v8003_v13, %s4818_s10  ;;  %1445 = vrot.lane.b32.xlu0 %v8004_v44, %s4818_s10  ;;  %v8012_v13 = vld [vmem:[#allocation43_spill] sm:$0xff] }
 0x17a   : > { %v5737_v15 = vpop.permute.xlu1 %1068  ;;  %v5739_v43 = vpop.permute.xlu0 %1074 }
 0x17b   : > { %8005 = vst [vmem:[#allocation19_spill] sm:$0xff] %v5737_v15  ;;  %8006 = vst [vmem:[#allocation21_spill] sm:$0xff] %v5739_v43  ;;  %v8015_v43 = vld [vmem:[#allocation45_spill] sm:$0xff] }
 0x17c   : > { %1443 = vrot.lane.b32.xlu1 %v8007_v10, %s4818_s10  ;;  %1449 = vrot.lane.b32.xlu0 %v8008_v12, %s4818_s10  ;;  %v8016_v10 = vld [vmem:[#allocation47_spill] sm:$0xff] }
 0x17e   : > { %v5745_v20 = vpop.permute.xlu1 %1072  ;;  %v5747_v40 = vpop.permute.xlu0 %1078 }
 0x17f   : > { %8009 = vst [vmem:[#allocation23_spill] sm:$0xff] %v5745_v20  ;;  %8010 = vst [vmem:[#allocation25_spill] sm:$0xff] %v5747_v40  ;;  %v8019_v40 = vld [vmem:[#allocation49_spill] sm:$0xff] }
 0x180   : > { %1447 = vrot.lane.b32.xlu1 %v8011_v11, %s4818_s10  ;;  %1453 = vrot.lane.b32.xlu0 %v8012_v13, %s4818_s10  ;;  %v8020_v11 = vld [vmem:[#allocation51_spill] sm:$0xff]  ;;  %v1943_v20 = vld [vmem:[%s7832_s1 + $0x18] sm:$0xff] }
 0x182   : > { %v5753_v44 = vpop.permute.xlu1 %1076  ;;  %v5755_v41 = vpop.permute.xlu0 %1082 }
 0x183   : > { %8013 = vst [vmem:[#allocation27_spill] sm:$0xff] %v5753_v44  ;;  %8014 = vst [vmem:[#allocation29_spill] sm:$0xff] %v5755_v41  ;;  %v8023_v41 = vld [vmem:[#allocation53_spill] sm:$0xff] }
 0x184   : > { %1451 = vrot.lane.b32.xlu1 %v8015_v43, %s4818_s10  ;;  %1457 = vrot.lane.b32.xlu0 %v8016_v10, %s4818_s10  ;;  %v8024_v43 = vld [vmem:[#allocation55_spill] sm:$0xff] }
 0x186   : > { %v5761_v12 = vpop.permute.xlu1 %1080  ;;  %v5763_v8 = vpop.permute.xlu0 %1086 }
 0x187   : > { %8017 = vst [vmem:[#allocation31_spill] sm:$0xff] %v5761_v12  ;;  %8018 = vst [vmem:[#allocation33_spill] sm:$0xff] %v5763_v8  ;;  %v8027_v8 = vld [vmem:[#allocation57_spill] sm:$0xff] }
 0x188   : > { %1455 = vrot.lane.b32.xlu1 %v8019_v40, %s4818_s10  ;;  %1461 = vrot.lane.b32.xlu0 %v8020_v11, %s4818_s10  ;;  %v8028_v40 = vld [vmem:[#allocation59_spill] sm:$0xff] }
 0x18a   : > { %v5769_v13 = vpop.permute.xlu1 %1084  ;;  %v5771_v44 = vpop.permute.xlu0 %1090 }
 0x18b   : > { %8021 = vst [vmem:[#allocation35_spill] sm:$0xff] %v5769_v13  ;;  %8022 = vst [vmem:[#allocation37_spill] sm:$0xff] %v5771_v44  ;;  %v8031_v44 = vld [vmem:[#allocation61_spill] sm:$0xff] }
 0x18c   : > { %1459 = vrot.lane.b32.xlu1 %v8023_v41, %s4818_s10  ;;  %1465 = vrot.lane.b32.xlu0 %v8024_v43, %s4818_s10  ;;  %v8032_v41 = vld [vmem:[#allocation63_spill] sm:$0xff] }
 0x18e   : > { %v5777_v10 = vpop.permute.xlu1 %1088  ;;  %v5779_v12 = vpop.permute.xlu0 %1094 }
 0x18f   : > { %8025 = vst [vmem:[#allocation39_spill] sm:$0xff] %v5777_v10  ;;  %8026 = vst [vmem:[#allocation41_spill] sm:$0xff] %v5779_v12  ;;  %v8034_v12 = vld [vmem:[#allocation65_spill] sm:$0xff] }
 0x190   : > { %1463 = vrot.lane.b32.xlu1 %v8027_v8, %s4818_s10  ;;  %1469 = vrot.lane.b32.xlu0 %v8028_v40, %s4818_s10 }
 0x192   : > { %v5785_v11 = vpop.permute.xlu1 %1092  ;;  %v5787_v13 = vpop.permute.xlu0 %1098 }
 0x193   : > { %8029 = vst [vmem:[#allocation43_spill] sm:$0xff] %v5785_v11  ;;  %8030 = vst [vmem:[#allocation45_spill] sm:$0xff] %v5787_v13  ;;  %v8036_v13 = vld [vmem:[#allocation68_spill] sm:$0xff] }
 0x194   : > { %1467 = vrot.lane.b32.xlu1 %v8031_v44, %s4818_s10  ;;  %1473 = vrot.lane.b32.xlu0 %v8032_v41, %s4818_s10  ;;  %v1391_v41 = vld [vmem:[#allocation2 + $0x198] sm:$0xff]  ;;  %v1942_v11 = vld [vmem:[%s7832_s1 + $0x10] sm:$0xff] }
 0x196   : > { %v5793_v43 = vpop.permute.xlu1 %1096  ;;  %v5795_v10 = vpop.permute.xlu0 %1231 }
 0x197   : > { %8033 = vst [vmem:[#allocation47_spill] sm:$0xff] %v5793_v43  ;;  %v1554_v43 = vld [vmem:[#allocation2 + $0x31] sm:$0xff] }
 0x198   : > { %1471 = vrot.lane.b32.xlu1 %v8034_v12, %s4818_s10  ;;  %1477 = vrot.lane.b32.xlu0 %v5405_v39, %s4818_s10  ;;  %v1940_v12 = vld [vmem:[%s7832_s1] sm:$0xff]  ;;  %v1941_v39 = vld [vmem:[%s7832_s1 + $0x8] sm:$0xff] }
 0x19a   : > { %v5801_v8 = vpop.permute.xlu1 %1100  ;;  %v5803_v40 = vpop.permute.xlu0 %1235 }
 0x19b   : > { %8035 = vst [vmem:[#allocation49_spill] sm:$0xff] %v5801_v8 }
 0x19c   : > { %1475 = vrot.lane.b32.xlu1 %v8036_v13, %s4818_s10  ;;  %1481 = vrot.lane.b32.xlu0 %v5413_v33, %s4818_s10  ;;  %v4734_v13 = vpack.c.bf16 %v1941_v39, %v1940_v12  ;;  %v1556_v39 = vld [vmem:[#allocation2 + $0x49] sm:$0xff] }
 0x19e   : > { %v5809_v44 = vpop.permute.xlu1 %1233  ;;  %v5817_v8 = vpop.permute.xlu0 %1239  ;;  %4735 = vmatprep.subr.bf16.mxu0 %v4734_v13 }
 0x19f   : > { %4737 = vmatpush3.bf16.msra.mxu0 %v4734_v13 }
 0x1a0   : > { %1479 = vrot.lane.b32.xlu1 %v5423_v3, %s4818_s10  ;;  %1485 = vrot.lane.b32.xlu0 %v1391_v41, %s4818_s10  ;;  %v4738_v3 = vpack.c.bf16 %v1943_v20, %v1942_v11  ;;  %v1392_v41 = vld [vmem:[#allocation2 + $0x1a0] sm:$0xff] }
 0x1a1   : > { %v1558_v20 = vld [vmem:[#allocation2 + $0x61] sm:$0xff] }
 0x1a2   : > { %v5822_v33 = vpop.permute.xlu1 %1237  ;;  %v5830_v32 = vpop.permute.xlu0 %1243  ;;  %4739 = vmatprep.subr.bf16.mxu0 %v4738_v3 }
 0x1a3   : > { %4741 = vmatpush3.bf16.msra.mxu0 %v4738_v3 }
 0x1a4   : > { %1483 = vrot.lane.b32.xlu1 %v5429_v37, %s4818_s10  ;;  %1618 = vrot.lane.b32.xlu0 %v1554_v43, %s4819_s19  ;;  %v1557_v43 = vld [vmem:[#allocation2 + $0x51] sm:$0xff] }
 0x1a5   : > { %4626 = vmatprep.subr.msk.mxu0 %vm2049_vm3, %v1944_v38 }
 0x1a6   : > { %v5835_v12 = vpop.permute.xlu1 %1241  ;;  %v5837_v13 = vpop.permute.xlu0 %1247 }
 0x1a7   : > { %4627 = vmatpush3.msk.msra.mxu0 %vm2049_vm3, %v1944_v38  ;;  %v1749_v38 = vld [vmem:[#allocation2 + $0x4a] sm:$0xff] }
 0x1a8   : > { %1487 = vrot.lane.b32.xlu1 %v1392_v41, %s4818_s10  ;;  %1622 = vrot.lane.b32.xlu0 %v1556_v39, %s4819_s19  ;;  %v1747_v41 = vld [vmem:[#allocation2 + $0x32] sm:$0xff]  ;;  %v1559_v39 = vld [vmem:[#allocation2 + $0x69] sm:$0xff] }
 0x1aa   : > { %v5844_v37 = vpop.permute.xlu1 %1245  ;;  %v5848_v11 = vpop.permute.xlu0 %1251 }
 0x1ac   : > { %1620 = vrot.lane.b32.xlu1 %v1555_v9, %s4819_s19  ;;  %1626 = vrot.lane.b32.xlu0 %v1558_v20, %s4819_s19  ;;  %v1748_v9 = vld [vmem:[#allocation2 + $0x3a] sm:$0xff] }
 0x1ae   : > { %v5852_v3 = vpop.permute.xlu1 %1249  ;;  %v5854_v42 = vpop.permute.xlu0 %1255 }
 0x1af   : > { %8037 = vst [vmem:[#allocation51_spill] sm:$0xff] %v5854_v42  ;;  %v1765_v42 = vld [vmem:[#allocation2 + $0x10a] sm:$0xff] }
 0x1b0   : > { %1624 = vrot.lane.b32.xlu1 %v1557_v43, %s4819_s19  ;;  %1811 = vrot.lane.b32.xlu0 %v1747_v41, %s4820_s22  ;;  %v1750_v43 = vld [vmem:[#allocation2 + $0x52] sm:$0xff] }
 0x1b2   : > { %v5858_v6 = vpop.permute.xlu1 %1253  ;;  %v5860_v15 = vpop.permute.xlu0 %1259 }
 0x1b3   : > { %8038 = vst [vmem:[#allocation53_spill] sm:$0xff] %v5858_v6  ;;  %8039 = vst [vmem:[#allocation55_spill] sm:$0xff] %v5860_v15  ;;  %v1753_v15 = vld [vmem:[#allocation2 + $0x7a] sm:$0xff] }
 0x1b4   : > { %1628 = vrot.lane.b32.xlu1 %v1559_v39, %s4819_s19  ;;  %1815 = vrot.lane.b32.xlu0 %v1749_v38, %s4820_s22  ;;  %v1752_v39 = vld [vmem:[#allocation2 + $0x6a] sm:$0xff]  ;;  %v1574_v6 = vld [vmem:[#allocation2 + $0x121] sm:$0xff] }
 0x1b6   : > { %v5864_v20 = vpop.permute.xlu1 %1257  ;;  %v5866_v7 = vpop.permute.xlu0 %1263 }
 0x1b7   : > { %8040 = vst [vmem:[#allocation57_spill] sm:$0xff] %v5864_v20  ;;  %8041 = vst [vmem:[#allocation59_spill] sm:$0xff] %v5866_v7  ;;  %v1562_v7 = vld [vmem:[#allocation2 + $0x91] sm:$0xff] }
 0x1b8   : > { %1813 = vrot.lane.b32.xlu1 %v1748_v9, %s4820_s22  ;;  %1819 = vrot.lane.b32.xlu0 %v1751_v30, %s4820_s22  ;;  %v1561_v9 = vld [vmem:[#allocation2 + $0x81] sm:$0xff] }
 0x1ba   : > { %v5870_v41 = vpop.permute.xlu1 %1261  ;;  %v5872_v45 = vpop.permute.xlu0 %1267 }
 0x1bb   : > { %8042 = vst [vmem:[#allocation61_spill] sm:$0xff] %v5870_v41  ;;  %8043 = vst [vmem:[#allocation63_spill] sm:$0xff] %v5872_v45  ;;  %v1755_v45 = vld [vmem:[#allocation2 + $0x92] sm:$0xff] }
 0x1bc   : > { %1817 = vrot.lane.b32.xlu1 %v1750_v43, %s4820_s22  ;;  %1630 = vrot.lane.b32.xlu0 %v1560_v31, %s4819_s19  ;;  %v1754_v43 = vld [vmem:[#allocation2 + $0x82] sm:$0xff] }
 0x1be   : > { %v5876_v38 = vpop.permute.xlu1 %1265  ;;  %v5878_v20 = vpop.permute.xlu0 %1271 }
 0x1bf   : > { %8044 = vst [vmem:[#allocation65_spill] sm:$0xff] %v5876_v38  ;;  %8045 = vst [vmem:[#allocation68_spill] sm:$0xff] %v5878_v20  ;;  %v1564_v20 = vld [vmem:[#allocation2 + $0xa9] sm:$0xff] }
 0x1c0   : > { %1821 = vrot.lane.b32.xlu1 %v1752_v39, %s4820_s22  ;;  %1823 = vrot.lane.b32.xlu0 %v1753_v15, %s4820_s22  ;;  %v1563_v39 = vld [vmem:[#allocation2 + $0x99] sm:$0xff] }
 0x1c2   : > { %v5882_v30 = vpop.permute.xlu1 %1269  ;;  %v5884_v41 = vpop.permute.xlu0 %1275 }
 0x1c3   : > { %8046 = vst [vmem:[#allocation116_spill] sm:$0xff] %v5882_v30  ;;  %8047 = vst [vmem:[#allocation117_spill] sm:$0xff] %v5884_v41  ;;  %v1757_v41 = vld [vmem:[#allocation2 + $0xaa] sm:$0xff] }
 0x1c4   : > { %1632 = vrot.lane.b32.xlu1 %v1561_v9, %s4819_s19  ;;  %1634 = vrot.lane.b32.xlu0 %v1562_v7, %s4819_s19  ;;  %v1756_v9 = vld [vmem:[#allocation2 + $0x9a] sm:$0xff] }
 0x1c6   : > { %v5888_v31 = vpop.permute.xlu1 %1273  ;;  %v5890_v38 = vpop.permute.xlu0 %1279 }
 0x1c7   : > { %8048 = vst [vmem:[#allocation118_spill] sm:$0xff] %v5888_v31  ;;  %8049 = vst [vmem:[#allocation119_spill] sm:$0xff] %v5890_v38  ;;  %v1566_v38 = vld [vmem:[#allocation2 + $0xc1] sm:$0xff] }
 0x1c8   : > { %1825 = vrot.lane.b32.xlu1 %v1754_v43, %s4820_s22  ;;  %1827 = vrot.lane.b32.xlu0 %v1755_v45, %s4820_s22  ;;  %v1565_v43 = vld [vmem:[#allocation2 + $0xb1] sm:$0xff] }
 0x1ca   : > { %v5894_v15 = vpop.permute.xlu1 %1277  ;;  %v5896_v30 = vpop.permute.xlu0 %1283 }
 0x1cb   : > { %8050 = vst [vmem:[#allocation120_spill] sm:$0xff] %v5894_v15  ;;  %8051 = vst [vmem:[#allocation121_spill] sm:$0xff] %v5896_v30  ;;  %v1759_v30 = vld [vmem:[#allocation2 + $0xc2] sm:$0xff] }
 0x1cc   : > { %1636 = vrot.lane.b32.xlu1 %v1563_v39, %s4819_s19  ;;  %1638 = vrot.lane.b32.xlu0 %v1564_v20, %s4819_s19  ;;  %v1758_v39 = vld [vmem:[#allocation2 + $0xb2] sm:$0xff] }
 0x1ce   : > { %v5900_v7 = vpop.permute.xlu1 %1281  ;;  %v5902_v31 = vpop.permute.xlu0 %1287 }
 0x1cf   : > { %8052 = vst [vmem:[#allocation122_spill] sm:$0xff] %v5900_v7  ;;  %8053 = vst [vmem:[#allocation123_spill] sm:$0xff] %v5902_v31  ;;  %v1568_v31 = vld [vmem:[#allocation2 + $0xd9] sm:$0xff] }
 0x1d0   : > { %1829 = vrot.lane.b32.xlu1 %v1756_v9, %s4820_s22  ;;  %1831 = vrot.lane.b32.xlu0 %v1757_v41, %s4820_s22  ;;  %v1567_v9 = vld [vmem:[#allocation2 + $0xc9] sm:$0xff] }
 0x1d2   : > { %v5906_v45 = vpop.permute.xlu1 %1285  ;;  %v5908_v15 = vpop.permute.xlu0 %1291 }
 0x1d3   : > { %8054 = vst [vmem:[#allocation124_spill] sm:$0xff] %v5906_v45  ;;  %8055 = vst [vmem:[#allocation125_spill] sm:$0xff] %v5908_v15  ;;  %v1761_v15 = vld [vmem:[#allocation2 + $0xda] sm:$0xff] }
 0x1d4   : > { %1640 = vrot.lane.b32.xlu1 %v1565_v43, %s4819_s19  ;;  %1642 = vrot.lane.b32.xlu0 %v1566_v38, %s4819_s19  ;;  %v1760_v43 = vld [vmem:[#allocation2 + $0xca] sm:$0xff] }
 0x1d6   : > { %v5912_v20 = vpop.permute.xlu1 %1289  ;;  %v5914_v7 = vpop.permute.xlu0 %1425 }
 0x1d7   : > { %8056 = vst [vmem:[#allocation126_spill] sm:$0xff] %v5912_v20 }
 0x1d8   : > { %1833 = vrot.lane.b32.xlu1 %v1758_v39, %s4820_s22  ;;  %1835 = vrot.lane.b32.xlu0 %v1759_v30, %s4820_s22  ;;  %v1569_v39 = vld [vmem:[#allocation2 + $0xe1] sm:$0xff] }
 0x1da   : > { %v5918_v41 = vpop.permute.xlu1 %1293  ;;  %v5920_v45 = vpop.permute.xlu0 %1429 }
 0x1db   : > { %8057 = vst [vmem:[#allocation127_spill] sm:$0xff] %v5918_v41  ;;  %v1570_v41 = vld [vmem:[#allocation2 + $0xf1] sm:$0xff] }
 0x1dc   : > { %1644 = vrot.lane.b32.xlu1 %v1567_v9, %s4819_s19  ;;  %1646 = vrot.lane.b32.xlu0 %v1568_v31, %s4819_s19  ;;  %v1762_v9 = vld [vmem:[#allocation2 + $0xe2] sm:$0xff] }
 0x1de   : > { %v5924_v38 = vpop.permute.xlu1 %1427  ;;  %v5926_v20 = vpop.permute.xlu0 %1433 }
 0x1e0   : > { %1837 = vrot.lane.b32.xlu1 %v1760_v43, %s4820_s22  ;;  %1839 = vrot.lane.b32.xlu0 %v1761_v15, %s4820_s22  ;;  %v1571_v43 = vld [vmem:[#allocation2 + $0xf9] sm:$0xff] }
 0x1e2   : > { %v5930_v30 = vpop.permute.xlu1 %1431  ;;  %v5932_v48 = vpop.permute.xlu0 %1437 }
 0x1e4   : > { %1648 = vrot.lane.b32.xlu1 %v1569_v39, %s4819_s19  ;;  %1650 = vrot.lane.b32.xlu0 %v1570_v41, %s4819_s19  ;;  %v1764_v39 = vld [vmem:[#allocation2 + $0xfa] sm:$0xff] }
 0x1e6   : > { %v5936_v31 = vpop.permute.xlu1 %1435  ;;  %v5938_v62 = vpop.permute.xlu0 %1441 }
 0x1e8   : > { %1841 = vrot.lane.b32.xlu1 %v1762_v9, %s4820_s22  ;;  %1843 = vrot.lane.b32.xlu0 %v1763_v47, %s4820_s22  ;;  %v1573_v9 = vld [vmem:[#allocation2 + $0x111] sm:$0xff] }
 0x1ea   : > { %v5942_v15 = vpop.permute.xlu1 %1439  ;;  %v5944_v27 = vpop.permute.xlu0 %1445 }
 0x1ec   : > { %1652 = vrot.lane.b32.xlu1 %v1571_v43, %s4819_s19  ;;  %1654 = vrot.lane.b32.xlu0 %v1572_v5, %s4819_s19  ;;  %v1766_v43 = vld [vmem:[#allocation2 + $0x112] sm:$0xff] }
 0x1ee   : > { %v5948_v41 = vpop.permute.xlu1 %1443  ;;  %v5950_v14 = vpop.permute.xlu0 %1449 }
 0x1ef   : > { %8058 = vst [vmem:[#allocation128_spill] sm:$0xff] %v5950_v14  ;;  %v1576_v14 = vld [vmem:[#allocation2 + $0x139] sm:$0xff] }
 0x1f0   : > { %1845 = vrot.lane.b32.xlu1 %v1764_v39, %s4820_s22  ;;  %1847 = vrot.lane.b32.xlu0 %v1765_v42, %s4820_s22  ;;  %v1575_v39 = vld [vmem:[#allocation2 + $0x129] sm:$0xff] }
 0x1f2   : > { %v5954_v47 = vpop.permute.xlu1 %1447  ;;  %v5956_v2 = vpop.permute.xlu0 %1453 }
 0x1f3   : > { %8059 = vst [vmem:[#allocation129_spill] sm:$0xff] %v5954_v47  ;;  %8060 = vst [vmem:[#allocation130_spill] sm:$0xff] %v5956_v2  ;;  %v1769_v2 = vld [vmem:[#allocation2 + $0x13a] sm:$0xff] }
 0x1f4   : > { %1656 = vrot.lane.b32.xlu1 %v1573_v9, %s4819_s19  ;;  %1658 = vrot.lane.b32.xlu0 %v1574_v6, %s4819_s19  ;;  %v1768_v9 = vld [vmem:[#allocation2 + $0x12a] sm:$0xff] }
 0x1f6   : > { %v5960_v5 = vpop.permute.xlu1 %1451  ;;  %v5962_v58 = vpop.permute.xlu0 %1457 }
 0x1f7   : > { %8061 = vst [vmem:[#allocation131_spill] sm:$0xff] %v5960_v5  ;;  %8062 = vst [vmem:[#allocation132_spill] sm:$0xff] %v5962_v58  ;;  %v1578_v58 = vld [vmem:[#allocation2 + $0x151] sm:$0xff] }
 0x1f8   : > { %1849 = vrot.lane.b32.xlu1 %v1766_v43, %s4820_s22  ;;  %1851 = vrot.lane.b32.xlu0 %v1767_v34, %s4820_s22  ;;  %v1577_v43 = vld [vmem:[#allocation2 + $0x141] sm:$0xff] }
 0x1fa   : > { %v5966_v42 = vpop.permute.xlu1 %1455  ;;  %v5968_v47 = vpop.permute.xlu0 %1461 }
 0x1fb   : > { %8063 = vst [vmem:[#allocation133_spill] sm:$0xff] %v5966_v42  ;;  %8064 = vst [vmem:[#allocation134_spill] sm:$0xff] %v5968_v47  ;;  %v1771_v47 = vld [vmem:[#allocation2 + $0x152] sm:$0xff] }
 0x1fc   : > { %1660 = vrot.lane.b32.xlu1 %v1575_v39, %s4819_s19  ;;  %1662 = vrot.lane.b32.xlu0 %v1576_v14, %s4819_s19  ;;  %v1770_v39 = vld [vmem:[#allocation2 + $0x142] sm:$0xff] }
 0x1fe   : > { %v5972_v6 = vpop.permute.xlu1 %1459  ;;  %v5974_v5 = vpop.permute.xlu0 %1465 }
 0x1ff   : > { %8065 = vst [vmem:[#allocation135_spill] sm:$0xff] %v5972_v6  ;;  %8066 = vst [vmem:[#allocation136_spill] sm:$0xff] %v5974_v5  ;;  %v1580_v5 = vld [vmem:[#allocation2 + $0x169] sm:$0xff] }
 0x200   : > { %1853 = vrot.lane.b32.xlu1 %v1768_v9, %s4820_s22  ;;  %1855 = vrot.lane.b32.xlu0 %v1769_v2, %s4820_s22  ;;  %v1579_v9 = vld [vmem:[#allocation2 + $0x159] sm:$0xff] }
 0x202   : > { %v5978_v34 = vpop.permute.xlu1 %1463  ;;  %v5980_v42 = vpop.permute.xlu0 %1469 }
 0x203   : > { %8067 = vst [vmem:[#allocation137_spill] sm:$0xff] %v5978_v34  ;;  %8068 = vst [vmem:[#allocation138_spill] sm:$0xff] %v5980_v42  ;;  %v1773_v42 = vld [vmem:[#allocation2 + $0x16a] sm:$0xff] }
 0x204   : > { %1664 = vrot.lane.b32.xlu1 %v1577_v43, %s4819_s19  ;;  %1666 = vrot.lane.b32.xlu0 %v1578_v58, %s4819_s19  ;;  %v1772_v43 = vld [vmem:[#allocation2 + $0x15a] sm:$0xff] }
 0x206   : > { %v5984_v14 = vpop.permute.xlu1 %1467  ;;  %v5986_v6 = vpop.permute.xlu0 %1473 }
 0x207   : > { %8069 = vst [vmem:[#allocation139_spill] sm:$0xff] %v5984_v14  ;;  %8070 = vst [vmem:[#allocation140_spill] sm:$0xff] %v5986_v6 }
 0x208   : > { %1857 = vrot.lane.b32.xlu1 %v1770_v39, %s4820_s22  ;;  %1859 = vrot.lane.b32.xlu0 %v1771_v47, %s4820_s22  ;;  %v1581_v39 = vld [vmem:[#allocation2 + $0x171] sm:$0xff] }
 0x20a   : > { %v5990_v2 = vpop.permute.xlu1 %1471  ;;  %v5992_v34 = vpop.permute.xlu0 %1477 }
 0x20b   : > { %8071 = vst [vmem:[#allocation141_spill] sm:$0xff] %v5990_v2  ;;  %8072 = vst [vmem:[#allocation142_spill] sm:$0xff] %v5992_v34 }
 0x20c   : > { %1668 = vrot.lane.b32.xlu1 %v1579_v9, %s4819_s19  ;;  %1670 = vrot.lane.b32.xlu0 %v1580_v5, %s4819_s19  ;;  %v1774_v9 = vld [vmem:[#allocation2 + $0x172] sm:$0xff] }
 0x20e   : > { %v5996_v58 = vpop.permute.xlu1 %1475  ;;  %v5998_v14 = vpop.permute.xlu0 %1481 }
 0x20f   : > { %8073 = vst [vmem:[#allocation143_spill] sm:$0xff] %v5996_v58  ;;  %8074 = vst [vmem:[#allocation144_spill] sm:$0xff] %v5998_v14  ;;  %v1584_v14 = vld [vmem:[#allocation2 + $0x199] sm:$0xff] }
 0x210   : > { %1861 = vrot.lane.b32.xlu1 %v1772_v43, %s4820_s22  ;;  %1863 = vrot.lane.b32.xlu0 %v1773_v42, %s4820_s22  ;;  %v364_v42 = vld [vmem:[#allocation2] sm:$0xff] }
 0x212   : > { %v6002_v47 = vpop.permute.xlu1 %1479  ;;  %v6004_v6 = vpop.permute.xlu0 %1485 }
 0x213   : > { %8075 = vst [vmem:[#allocation145_spill] sm:$0xff] %v6002_v47  ;;  %8076 = vst [vmem:[#allocation146_spill] sm:$0xff] %v6004_v6 }
 0x214   : > { %1672 = vrot.lane.b32.xlu1 %v1581_v39, %s4819_s19  ;;  %1674 = vrot.lane.b32.xlu0 %v5547_v56, %s4819_s19  ;;  %v8079_v39 = vld [vmem:[#allocation4_spill] sm:$0xff] }
 0x215   : > { %v556_v56 = vsel %vm253_vm0, %v364_v42, %v8079_v39 }
 0x216   : > { %v6009_v5 = vpop.permute.xlu1 %1483  ;;  %v1619_v34 = vpop.permute.xlu0 %1618 }
 0x217   : > { %8077 = vst [vmem:[#allocation147_spill] sm:$0xff] %v6009_v5  ;;  %v8080_v5 = vld [vmem:[#allocation62_spill] sm:$0xff] }
 0x218   : > { %1865 = vrot.lane.b32.xlu1 %v1774_v9, %s4820_s22  ;;  %1867 = vrot.lane.b32.xlu0 %v5679_v21, %s4820_s22  ;;  %v749_v21 = vsel %vm748_vm4, %v556_v56, %v8080_v5  ;;  %v8081_v56 = vld [vmem:[#allocation5_spill] sm:$0xff] }
 0x219   : > { %v942_v47 = vsel %vm941_vm5, %v749_v21, %v5531_v52 }
 0x21a   : > { %v6014_v43 = vpop.permute.xlu1 %1487  ;;  %v1623_v6 = vpop.permute.xlu0 %1622  ;;  %v1135_v42 = vsel %vm1134_vm6, %v942_v47, %v5663_v22  ;;  %v4767_v22 = vld [vmem:[#allocation2 + $0x18] sm:$0xff]  ;;  %v8082_v47 = vld [vmem:[#allocation7_spill] sm:$0xff] }
 0x21b   : > { %8078 = vst [vmem:[#allocation148_spill] sm:$0xff] %v6014_v43  ;;  %v1777_v43 = vld [vmem:[#allocation2 + $0x19a] sm:$0xff]  ;;  %v1328_v5 = vsel %vm1327_vm7, %v1135_v42, %v5795_v10  ;;  %v558_v10 = vsel %vm253_vm0, %v4767_v22, %v8082_v47  ;;  %v8083_v42 = vld [vmem:[#allocation67_spill] sm:$0xff] }
 0x21c   : > { %1676 = vrot.lane.b32.xlu1 %v5561_v60, %s4819_s19  ;;  %1678 = vrot.lane.b32.xlu0 %v1584_v14, %s4819_s19  ;;  %v365_v60 = vld [vmem:[#allocation2 + $0x8] sm:$0xff]  ;;  %v1522_v52 = vsel %vm1521_vm8, %v1328_v5, %v5914_v7  ;;  %v8084_v7 = vld [vmem:[#allocation66_spill] sm:$0xff]  ;;  %v8086_v47 = vld [vmem:[#allocation9_spill] sm:$0xff] }
 0x21d   : > { %v1585_v14 = vld [vmem:[#allocation2 + $0x1a1] sm:$0xff]  ;;  %v1715_v21 = vsel %vm1714_vm9, %v1522_v52, %v1619_v34  ;;  %v751_v5 = vsel %vm748_vm4, %v558_v10, %v8084_v7 }
 0x21e   : > { %v1621_v9 = vpop.permute.xlu1 %1620  ;;  %v6025_v58 = vpop.permute.xlu0 %1626  ;;  %v8087_v10 = vld [vmem:[#allocation70_spill] sm:$0xff] }
 0x220   : > { %1869 = vrot.lane.b32.xlu1 %v5693_v28, %s4820_s22  ;;  %1871 = vrot.lane.b32.xlu0 %v1777_v43, %s4820_s22  ;;  %v557_v28 = vsel %vm253_vm0, %v365_v60, %v8081_v56  ;;  %v4768_v56 = vld [vmem:[#allocation2 + $0x20] sm:$0xff] }
 0x221   : > { %v750_v43 = vsel %vm748_vm4, %v557_v28, %v8083_v42  ;;  %v8085_v28 = vld [vmem:[#allocation11_spill] sm:$0xff] }
 0x222   : > { %v1625_v39 = vpop.permute.xlu1 %1624  ;;  %v1812_v2 = vpop.permute.xlu0 %1811  ;;  %v943_v60 = vsel %vm941_vm5, %v750_v43, %v5545_v55 }
 0x223   : > { %v1908_v4 = vsel %vm1907_vm10, %v1715_v21, %v1812_v2  ;;  %v1136_v52 = vsel %vm1134_vm6, %v943_v60, %v5677_v29  ;;  %v559_v2 = vsel %vm253_vm0, %v4768_v56, %v8085_v28  ;;  %v4770_v56 = vld [vmem:[#allocation2 + $0x38] sm:$0xff]  ;;  %v8089_v28 = vld [vmem:[#allocation14_spill] sm:$0xff] }
 0x224   : > { %1680 = vrot.lane.b32.xlu1 %v1585_v14, %s4819_s19  ;;  %4628 = vmatprep.mubr.msk.f32.mxu0 %vm1952_vm11, %v1908_v4  ;;  %v944_v14 = vsel %vm941_vm5, %v751_v5, %v5539_v54  ;;  %v1329_v22 = vsel %vm1327_vm7, %v1136_v52, %v5809_v44  ;;  %v4769_v4 = vld [vmem:[#allocation2 + $0x30] sm:$0xff]  ;;  %v752_v29 = vsel %vm748_vm4, %v559_v2, %v8087_v10 }
 0x225   : > { %v1137_v21 = vsel %vm1134_vm6, %v944_v14, %v5671_v24  ;;  %v560_v54 = vsel %vm253_vm0, %v4769_v4, %v8086_v47  ;;  %v1523_v43 = vsel %vm1521_vm8, %v1329_v22, %v5924_v38  ;;  %v8088_v24 = vld [vmem:[#allocation69_spill] sm:$0xff]  ;;  %v945_v44 = vsel %vm941_vm5, %v752_v29, %v5555_v57  ;;  %v8091_v4 = vld [vmem:[#allocation12_spill] sm:$0xff]  ;;  %v8092_v29 = vld [vmem:[#allocation71_spill] sm:$0xff] }
 0x226   : > { %v1629_v34 = vpop.permute.xlu1 %1628  ;;  %v1816_v55 = vpop.permute.xlu0 %1815  ;;  %v1330_v42 = vsel %vm1327_vm7, %v1137_v21, %v5803_v40  ;;  %v753_v7 = vsel %vm748_vm4, %v560_v54, %v8088_v24  ;;  %v1716_v5 = vsel %vm1714_vm9, %v1523_v43, %v1621_v9  ;;  %v1138_v40 = vsel %vm1134_vm6, %v945_v44, %v5687_v35  ;;  %v8090_v35 = vld [vmem:[#allocation72_spill] sm:$0xff] }
 0x227   : > { %v946_v14 = vsel %vm941_vm5, %v753_v7, %v5549_v50  ;;  %v561_v57 = vsel %vm253_vm0, %v4770_v56, %v8089_v28  ;;  %v1331_v9 = vsel %vm1327_vm7, %v1138_v40, %v5822_v33  ;;  %v4773_v40 = vld [vmem:[#allocation2 + $0x60] sm:$0xff]  ;;  %v8095_v28 = vld [vmem:[#allocation73_spill] sm:$0xff] }
 0x228   : > { %1873 = vrot.lane.b32.xlu1 %v1778_v26, %s4820_s22  ;;  %v1524_v26 = vsel %vm1521_vm8, %v1330_v42, %v5920_v45  ;;  %v1139_v45 = vsel %vm1134_vm6, %v946_v14, %v5681_v18  ;;  %v1525_v22 = vsel %vm1521_vm8, %v1331_v9, %v5930_v30  ;;  %v4771_v18 = vld [vmem:[#allocation2 + $0x48] sm:$0xff] }
 0x229   : > { %v1717_v38 = vsel %vm1714_vm9, %v1524_v26, %v1623_v6  ;;  %v754_v6 = vsel %vm748_vm4, %v561_v57, %v8090_v35  ;;  %v1332_v21 = vsel %vm1327_vm7, %v1139_v45, %v5817_v8  ;;  %v562_v33 = vsel %vm253_vm0, %v4771_v18, %v8091_v4 }
 0x22a   : > { %v1814_v60 = vpop.permute.xlu1 %1813  ;;  %v1910_v2 = vsel %vm1907_vm10, %v1717_v38, %v1816_v55  ;;  %v1820_v50 = vpop.permute.xlu0 %1819  ;;  %v947_v55 = vsel %vm941_vm5, %v754_v6, %v5565_v61  ;;  %v1526_v47 = vsel %vm1521_vm8, %v1332_v21, %v5926_v20  ;;  %v1718_v54 = vsel %vm1714_vm9, %v1525_v22, %v1625_v39  ;;  %v8094_v38 = vld [vmem:[#allocation15_spill] sm:$0xff] }
 0x22b   : > { %v1909_v52 = vsel %vm1907_vm10, %v1716_v5, %v1814_v60  ;;  %v755_v8 = vsel %vm748_vm4, %v562_v33, %v8092_v29  ;;  %v1140_v30 = vsel %vm1134_vm6, %v947_v55, %v5697_v49  ;;  %v1719_v42 = vsel %vm1714_vm9, %v1526_v47, %v6025_v58  ;;  %v4772_v5 = vld [vmem:[#allocation2 + $0x50] sm:$0xff]  ;;  %v8093_v60 = vld [vmem:[#allocation17_spill] sm:$0xff]  ;;  %v4774_v22 = vld [vmem:[#allocation2 + $0x68] sm:$0xff] }
 0x22c   : > { %4629 = vmatmul.mubr.msk.f32.vlgmr.msra.gmra.mrb[0].mxu0 %vm1952_vm11, %v1909_v52  ;;  %v948_v61 = vsel %vm941_vm5, %v755_v8, %v5557_v59  ;;  %v1333_v20 = vsel %vm1327_vm7, %v1140_v30, %v5835_v12  ;;  %v1912_v39 = vsel %vm1907_vm10, %v1719_v42, %v1820_v50  ;;  %v4775_v33 = vld [vmem:[#allocation2 + $0x78] sm:$0xff]  ;;  %v8097_v55 = vld [vmem:[#allocation18_spill] sm:$0xff] }
 0x22d   : > { %4631 = vmatprep.mubr.msk.f32.mxu0 %vm1952_vm11, %v1910_v2  ;;  %v1141_v7 = vsel %vm1134_vm6, %v948_v61, %v5689_v23  ;;  %v1527_v49 = vsel %vm1521_vm8, %v1333_v20, %v5936_v31  ;;  %v563_v23 = vsel %vm253_vm0, %v4772_v5, %v8093_v60  ;;  %v4776_v20 = vld [vmem:[#allocation2 + $0x80] sm:$0xff]  ;;  %v8103_v60 = vld [vmem:[#allocation8_spill] sm:$0xff] }
 0x22e   : > { %v1818_v10 = vpop.permute.xlu1 %1817  ;;  %v1631_v24 = vpop.permute.xlu0 %1630  ;;  %v1334_v58 = vsel %vm1327_vm7, %v1141_v7, %v5830_v32  ;;  %v1720_v59 = vsel %vm1714_vm9, %v1527_v49, %v1629_v34  ;;  %v756_v32 = vsel %vm748_vm4, %v563_v23, %v5441_v0  ;;  %v4777_v49 = vld [vmem:[#allocation2 + $0x90] sm:$0xff] }
 0x22f   : > { %v1911_v43 = vsel %vm1907_vm10, %v1718_v54, %v1818_v10  ;;  %v1528_v12 = vsel %vm1521_vm8, %v1334_v58, %v5932_v48  ;;  %v564_v48 = vsel %vm253_vm0, %v4773_v40, %v8094_v38  ;;  %v949_v52 = vsel %vm941_vm5, %v756_v32, %v5573_v63  ;;  %v8100_v58 = vld [vmem:[#allocation22_spill] sm:$0xff]  ;;  %v8105_v32 = vld [vmem:[#allocation53_spill] sm:$0xff] }
 0x230   : > { %4632 = vmatmul.mubr.msk.f32.gmra.mrb[2].mxu0 %vm1952_vm11, %v1911_v43  ;;  %v1721_v14 = vsel %vm1714_vm9, %v1528_v12, %v1631_v24  ;;  %v757_v57 = vsel %vm748_vm4, %v564_v48, %v8095_v28  ;;  %v1142_v45 = vsel %vm1134_vm6, %v949_v52, %v5705_v46  ;;  %v8106_v38 = vld [vmem:[#allocation6_spill] sm:$0xff]  ;;  %v8107_v52 = vld [vmem:[#allocation129_spill] sm:$0xff]  ;;  %v8108_v28 = vld [vmem:[#allocation51_spill] sm:$0xff] }
 0x231   : > { %4634 = vmatprep.mubr.msk.f32.mxu0 %vm1952_vm11, %v1912_v39  ;;  %v950_v0 = vsel %vm941_vm5, %v757_v57, %v5567_v53  ;;  %v1335_v9 = vsel %vm1327_vm7, %v1142_v45, %v5844_v37  ;;  %v8096_v37 = vld [vmem:[#allocation20_spill] sm:$0xff] }
 0x232   : > { %v1822_v44 = vpop.permute.xlu1 %1821  ;;  %v1824_v31 = vpop.permute.xlu0 %1823  ;;  %v1143_v50 = vsel %vm1134_vm6, %v950_v0, %v5699_v16  ;;  %v1529_v63 = vsel %vm1521_vm8, %v1335_v9, %v5942_v15  ;;  %v565_v18 = vsel %vm253_vm0, %v4774_v22, %v8096_v37  ;;  %v8109_v9 = vld [vmem:[#allocation128_spill] sm:$0xff] }
 0x233   : > { %v1913_v26 = vsel %vm1907_vm10, %v1720_v59, %v1822_v44  ;;  %v1914_v34 = vsel %vm1907_vm10, %v1721_v14, %v1824_v31  ;;  %v1336_v35 = vsel %vm1327_vm7, %v1143_v50, %v5837_v13  ;;  %v758_v13 = vsel %vm748_vm4, %v565_v18, %v5449_v25  ;;  %v8101_v59 = vld [vmem:[#allocation96_spill] sm:$0xff]  ;;  %v8104_v14 = vld [vmem:[#allocation95_spill] sm:$0xff] }
 0x234   : > { %4635 = vmatmul.mubr.msk.f32.gmra.mrb[4].mxu0 %vm1952_vm11, %v1913_v26  ;;  %v1530_v46 = vsel %vm1521_vm8, %v1336_v35, %v5938_v62  ;;  %v566_v62 = vsel %vm253_vm0, %v4775_v33, %v8097_v55  ;;  %v951_v47 = vsel %vm941_vm5, %v758_v13, %v5581_v1  ;;  %v8102_v26 = vld [vmem:[#allocation74_spill] sm:$0xff]  ;;  %v8110_v35 = vld [vmem:[#allocation28_spill] sm:$0xff]  ;;  %v4779_v18 = vld [vmem:[#allocation2 + $0xa8] sm:$0xff] }
 0x235   : > { %4637 = vmatprep.mubr.msk.f32.mxu0 %vm1952_vm11, %v1914_v34  ;;  %v759_v10 = vsel %vm748_vm4, %v566_v62, %v5443_v36  ;;  %v1144_v29 = vsel %vm1134_vm6, %v951_v47, %v5713_v19  ;;  %v8113_v13 = vld [vmem:[#allocation98_spill] sm:$0xff]  ;;  %v8114_v55 = vld [vmem:[#allocation76_spill] sm:$0xff]  ;;  %v8115_v47 = vld [vmem:[#allocation13_spill] sm:$0xff] }
 0x236   : > { %v1633_v56 = vpop.permute.xlu1 %1632  ;;  %v1635_v2 = vpop.permute.xlu0 %1634  ;;  %v952_v25 = vsel %vm941_vm5, %v759_v10, %v5575_v51  ;;  %v1337_v8 = vsel %vm1327_vm7, %v1144_v29, %v5852_v3  ;;  %v8098_v3 = vld [vmem:[#allocation24_spill] sm:$0xff]  ;;  %v8116_v10 = vld [vmem:[#allocation97_spill] sm:$0xff] }
 0x237   : > { %v1722_v6 = vsel %vm1714_vm9, %v1529_v63, %v1633_v56  ;;  %v1723_v16 = vsel %vm1714_vm9, %v1530_v46, %v1635_v2  ;;  %v1145_v42 = vsel %vm1134_vm6, %v952_v25, %v5707_v17  ;;  %v1531_v1 = vsel %vm1521_vm8, %v1337_v8, %v5948_v41  ;;  %v8099_v41 = vld [vmem:[#allocation75_spill] sm:$0xff]  ;;  %v4778_v63 = vld [vmem:[#allocation2 + $0x98] sm:$0xff] }
 0x238   : > { %v1338_v43 = vsel %vm1327_vm7, %v1145_v42, %v5848_v11  ;;  %v567_v39 = vsel %vm253_vm0, %v4776_v20, %v8098_v3  ;;  %v8117_v25 = vld [vmem:[#allocation57_spill] sm:$0xff]  ;;  %v8118_v42 = vld [vmem:[#allocation10_spill] sm:$0xff] }
 0x239   : > { %v1532_v19 = vsel %vm1521_vm8, %v1338_v43, %v5944_v27  ;;  %v760_v11 = vsel %vm748_vm4, %v567_v39, %v8099_v41  ;;  %v568_v27 = vsel %vm253_vm0, %v4777_v49, %v8100_v58  ;;  %v8119_v43 = vld [vmem:[#allocation131_spill] sm:$0xff]  ;;  %v8121_v3 = vld [vmem:[#allocation130_spill] sm:$0xff]  ;;  %v8122_v41 = vld [vmem:[#allocation32_spill] sm:$0xff] }
 0x23a   : > { %v1826_v21 = vpop.permute.xlu1 %1825  ;;  %v1828_v4 = vpop.permute.xlu0 %1827  ;;  %v953_v44 = vsel %vm941_vm5, %v760_v11, %v8101_v59  ;;  %v761_v5 = vsel %vm748_vm4, %v568_v27, %v8102_v26  ;;  %v8123_v58 = vld [vmem:[#allocation79_spill] sm:$0xff] }
 0x23b   : > { %v1915_v53 = vsel %vm1907_vm10, %v1722_v6, %v1826_v21  ;;  %v1916_v15 = vsel %vm1907_vm10, %v1723_v16, %v1828_v4  ;;  %v1146_v23 = vsel %vm1134_vm6, %v953_v44, %v8103_v60  ;;  %v954_v31 = vsel %vm941_vm5, %v761_v5, %v8104_v14  ;;  %v8112_v16 = vld [vmem:[#allocation26_spill] sm:$0xff]  ;;  %v8125_v5 = vld [vmem:[#allocation100_spill] sm:$0xff] }
 0x23c   : > { %4638 = vmatmul.mubr.msk.f32.gmra.mrb[6].mxu0 %vm1952_vm11, %v1915_v53  ;;  %v1339_v34 = vsel %vm1327_vm7, %v1146_v23, %v8105_v32  ;;  %v1147_v48 = vsel %vm1134_vm6, %v954_v31, %v8106_v38  ;;  %v569_v6 = vsel %vm253_vm0, %v4778_v63, %v8110_v35  ;;  %v8111_v53 = vld [vmem:[#allocation77_spill] sm:$0xff]  ;;  %v570_v4 = vsel %vm253_vm0, %v4779_v18, %v8112_v16  ;;  %v4781_v44 = vld [vmem:[#allocation2 + $0xc0] sm:$0xff]  ;;  %v8127_v32 = vld [vmem:[#allocation19_spill] sm:$0xff] }
 0x23d   : > { %4640 = vmatprep.mubr.msk.f32.mxu0 %vm1952_vm11, %v1916_v15  ;;  %v1533_v56 = vsel %vm1521_vm8, %v1339_v34, %v8107_v52  ;;  %v1340_v57 = vsel %vm1327_vm7, %v1147_v48, %v8108_v28  ;;  %v762_v22 = vsel %vm748_vm4, %v569_v6, %v8111_v53  ;;  %v763_v62 = vsel %vm748_vm4, %v570_v4, %v8114_v55  ;;  %v8126_v14 = vld [vmem:[#allocation78_spill] sm:$0xff]  ;;  %v8129_v48 = vld [vmem:[#allocation61_spill] sm:$0xff]  ;;  %v8130_v28 = vld [vmem:[#allocation16_spill] sm:$0xff] }
 0x23e   : > { %v1637_v54 = vpop.permute.xlu1 %1636  ;;  %v1639_v30 = vpop.permute.xlu0 %1638  ;;  %v1534_v2 = vsel %vm1521_vm8, %v1340_v57, %v8109_v9  ;;  %v955_v15 = vsel %vm941_vm5, %v762_v22, %v8113_v13  ;;  %v956_v29 = vsel %vm941_vm5, %v763_v62, %v8116_v10  ;;  %v8132_v9 = vld [vmem:[#allocation59_spill] sm:$0xff]  ;;  %v8133_v35 = vld [vmem:[#allocation132_spill] sm:$0xff]  ;;  %v8135_v16 = vld [vmem:[#allocation81_spill] sm:$0xff] }
 0x23f   : > { %v1724_v36 = vsel %vm1714_vm9, %v1531_v1, %v1637_v54  ;;  %v1725_v17 = vsel %vm1714_vm9, %v1532_v19, %v1639_v30  ;;  %v1148_v54 = vsel %vm1134_vm6, %v955_v15, %v8115_v47  ;;  %v1149_v1 = vsel %vm1134_vm6, %v956_v29, %v8118_v42  ;;  %v8134_v53 = vld [vmem:[#allocation36_spill] sm:$0xff]  ;;  %v4783_v15 = vld [vmem:[#allocation2 + $0xd8] sm:$0xff]  ;;  %v8137_v62 = vld [vmem:[#allocation102_spill] sm:$0xff] }
 0x240   : > { %v1341_v8 = vsel %vm1327_vm7, %v1148_v54, %v8117_v25  ;;  %v8138_v10 = vld [vmem:[#allocation80_spill] sm:$0xff]  ;;  %v8139_v25 = vld [vmem:[#allocation23_spill] sm:$0xff] }
 0x242   : > { %v1830_v61 = vpop.permute.xlu1 %1829  ;;  %v1832_v24 = vpop.permute.xlu0 %1831 }
 0x243   : > { %v1917_v51 = vsel %vm1907_vm10, %v1724_v36, %v1830_v61  ;;  %v1918_v7 = vsel %vm1907_vm10, %v1725_v17, %v1832_v24  ;;  %v1535_v36 = vsel %vm1521_vm8, %v1341_v8, %v8119_v43  ;;  %v8120_v61 = vld [vmem:[#allocation55_spill] sm:$0xff]  ;;  %v4780_v24 = vld [vmem:[#allocation2 + $0xb0] sm:$0xff] }
 0x244   : > { %4641 = vmatmul.mubr.msk.f32.gmra.mrb[8].mxu0 %vm1952_vm11, %v1917_v51  ;;  %v1342_v19 = vsel %vm1327_vm7, %v1149_v1, %v8120_v61  ;;  %v571_v11 = vsel %vm253_vm0, %v4780_v24, %v8122_v41  ;;  %v8141_v1 = vld [vmem:[#allocation65_spill] sm:$0xff]  ;;  %v8145_v41 = vld [vmem:[#allocation134_spill] sm:$0xff] }
 0x245   : > { %4643 = vmatprep.mubr.msk.f32.mxu0 %vm1952_vm11, %v1918_v7  ;;  %v1536_v39 = vsel %vm1521_vm8, %v1342_v19, %v8121_v3  ;;  %v764_v27 = vsel %vm748_vm4, %v571_v11, %v8123_v58  ;;  %v8142_v61 = vld [vmem:[#allocation21_spill] sm:$0xff]  ;;  %v8144_v3 = vld [vmem:[#allocation63_spill] sm:$0xff]  ;;  %v8146_v58 = vld [vmem:[#allocation40_spill] sm:$0xff] }
 0x246   : > { %v1641_v12 = vpop.permute.xlu1 %1640  ;;  %v1643_v40 = vpop.permute.xlu0 %1642  ;;  %v957_v60 = vsel %vm941_vm5, %v764_v27, %v8125_v5 }
 0x247   : > { %v1726_v45 = vsel %vm1714_vm9, %v1533_v56, %v1641_v12  ;;  %v1727_v21 = vsel %vm1714_vm9, %v1534_v2, %v1643_v40  ;;  %v8124_v12 = vld [vmem:[#allocation30_spill] sm:$0xff]  ;;  %v1150_v34 = vsel %vm1134_vm6, %v957_v60, %v8127_v32  ;;  %v8128_v40 = vld [vmem:[#allocation99_spill] sm:$0xff]  ;;  %v4785_v60 = vld [vmem:[#allocation2 + $0xf0] sm:$0xff] }
 0x248   : > { %v572_v26 = vsel %vm253_vm0, %v4781_v44, %v8124_v12  ;;  %v1343_v52 = vsel %vm1327_vm7, %v1150_v34, %v8129_v48  ;;  %v8147_v12 = vld [vmem:[#allocation83_spill] sm:$0xff] }
 0x249   : > { %v765_v31 = vsel %vm748_vm4, %v572_v26, %v8126_v14  ;;  %v8151_v48 = vld [vmem:[#allocation27_spill] sm:$0xff] }
 0x24a   : > { %v1834_v0 = vpop.permute.xlu1 %1833  ;;  %v1836_v46 = vpop.permute.xlu0 %1835  ;;  %v958_v38 = vsel %vm941_vm5, %v765_v31, %v8128_v40  ;;  %v8149_v31 = vld [vmem:[#allocation104_spill] sm:$0xff]  ;;  %v8150_v40 = vld [vmem:[#allocation82_spill] sm:$0xff] }
 0x24b   : > { %v1919_v50 = vsel %vm1907_vm10, %v1726_v45, %v1834_v0  ;;  %v1920_v37 = vsel %vm1907_vm10, %v1727_v21, %v1836_v46  ;;  %v1151_v57 = vsel %vm1134_vm6, %v958_v38, %v8130_v28  ;;  %v8131_v45 = vld [vmem:[#allocation133_spill] sm:$0xff]  ;;  %v4782_v46 = vld [vmem:[#allocation2 + $0xc8] sm:$0xff] }
 0x24c   : > { %4644 = vmatmul.mubr.msk.f32.gmra.mrb[10].mxu0 %vm1952_vm11, %v1919_v50  ;;  %v1537_v0 = vsel %vm1521_vm8, %v1343_v52, %v8131_v45  ;;  %v1344_v2 = vsel %vm1327_vm7, %v1151_v57, %v8132_v9  ;;  %v573_v22 = vsel %vm253_vm0, %v4782_v46, %v8134_v53  ;;  %v8153_v57 = vld [vmem:[#allocation116_spill] sm:$0xff]  ;;  %v8154_v9 = vld [vmem:[#allocation25_spill] sm:$0xff] }
 0x24d   : > { %4646 = vmatprep.mubr.msk.f32.mxu0 %vm1952_vm11, %v1920_v37  ;;  %v1538_v6 = vsel %vm1521_vm8, %v1344_v2, %v8133_v35  ;;  %v766_v4 = vsel %vm748_vm4, %v573_v22, %v8135_v16  ;;  %v8156_v35 = vld [vmem:[#allocation68_spill] sm:$0xff] }
 0x24e   : > { %v1645_v33 = vpop.permute.xlu1 %1644  ;;  %v1647_v30 = vpop.permute.xlu0 %1646  ;;  %v959_v47 = vsel %vm941_vm5, %v766_v4, %v8137_v62  ;;  %v8157_v53 = vld [vmem:[#allocation136_spill] sm:$0xff] }
 0x24f   : > { %v1728_v51 = vsel %vm1714_vm9, %v1535_v36, %v1645_v33  ;;  %v1729_v7 = vsel %vm1714_vm9, %v1536_v39, %v1647_v30  ;;  %v8136_v33 = vld [vmem:[#allocation34_spill] sm:$0xff]  ;;  %v1152_v8 = vsel %vm1134_vm6, %v959_v47, %v8139_v25  ;;  %v8140_v30 = vld [vmem:[#allocation101_spill] sm:$0xff]  ;;  %v8158_v16 = vld [vmem:[#allocation44_spill] sm:$0xff] }
 0x250   : > { %v574_v55 = vsel %vm253_vm0, %v4783_v15, %v8136_v33  ;;  %v1345_v43 = vsel %vm1327_vm7, %v1152_v8, %v8141_v1  ;;  %v8159_v33 = vld [vmem:[#allocation85_spill] sm:$0xff]  ;;  %v4787_v47 = vld [vmem:[#allocation2 + $0x108] sm:$0xff] }
 0x251   : > { %v767_v29 = vsel %vm748_vm4, %v574_v55, %v8138_v10  ;;  %v8163_v1 = vld [vmem:[#allocation31_spill] sm:$0xff] }
 0x252   : > { %v1838_v20 = vpop.permute.xlu1 %1837  ;;  %v1840_v49 = vpop.permute.xlu0 %1839  ;;  %v960_v42 = vsel %vm941_vm5, %v767_v29, %v8140_v30  ;;  %v8161_v29 = vld [vmem:[#allocation106_spill] sm:$0xff]  ;;  %v8162_v30 = vld [vmem:[#allocation84_spill] sm:$0xff] }
 0x253   : > { %v1921_v17 = vsel %vm1907_vm10, %v1728_v51, %v1838_v20  ;;  %v1922_v59 = vsel %vm1907_vm10, %v1729_v7, %v1840_v49  ;;  %v1153_v19 = vsel %vm1134_vm6, %v960_v42, %v8142_v61  ;;  %v8143_v51 = vld [vmem:[#allocation135_spill] sm:$0xff]  ;;  %v4784_v49 = vld [vmem:[#allocation2 + $0xe0] sm:$0xff] }
 0x254   : > { %4647 = vmatmul.mubr.msk.f32.gmra.mrb[12].mxu0 %vm1952_vm11, %v1921_v17  ;;  %v1539_v20 = vsel %vm1521_vm8, %v1345_v43, %v8143_v51  ;;  %v1346_v39 = vsel %vm1327_vm7, %v1153_v19, %v8144_v3  ;;  %v575_v27 = vsel %vm253_vm0, %v4784_v49, %v8146_v58  ;;  %v8165_v19 = vld [vmem:[#allocation118_spill] sm:$0xff]  ;;  %v8166_v3 = vld [vmem:[#allocation29_spill] sm:$0xff] }
 0x255   : > { %4649 = vmatprep.mubr.msk.f32.mxu0 %vm1952_vm11, %v1922_v59  ;;  %v1540_v11 = vsel %vm1521_vm8, %v1346_v39, %v8145_v41  ;;  %v768_v26 = vsel %vm748_vm4, %v575_v27, %v8147_v12  ;;  %v8168_v41 = vld [vmem:[#allocation117_spill] sm:$0xff]  ;;  %v8169_v58 = vld [vmem:[#allocation138_spill] sm:$0xff]  ;;  %v8170_v12 = vld [vmem:[#allocation48_spill] sm:$0xff] }
 0x256   : > { %v1649_v23 = vpop.permute.xlu1 %1648  ;;  %v1651_v56 = vpop.permute.xlu0 %1650  ;;  %v961_v32 = vsel %vm941_vm5, %v768_v26, %v8149_v31 }
 0x257   : > { %v1730_v50 = vsel %vm1714_vm9, %v1537_v0, %v1649_v23  ;;  %v1731_v37 = vsel %vm1714_vm9, %v1538_v6, %v1651_v56  ;;  %v8148_v23 = vld [vmem:[#allocation38_spill] sm:$0xff]  ;;  %v1154_v52 = vsel %vm1134_vm6, %v961_v32, %v8151_v48  ;;  %v8152_v56 = vld [vmem:[#allocation103_spill] sm:$0xff] }
 0x258   : > { %v576_v14 = vsel %vm253_vm0, %v4785_v60, %v8148_v23  ;;  %v1347_v45 = vsel %vm1327_vm7, %v1154_v52, %v8153_v57  ;;  %v8171_v23 = vld [vmem:[#allocation87_spill] sm:$0xff]  ;;  %v4789_v32 = vld [vmem:[#allocation2 + $0x120] sm:$0xff] }
 0x259   : > { %v769_v38 = vsel %vm748_vm4, %v576_v14, %v8150_v40  ;;  %v8175_v57 = vld [vmem:[#allocation35_spill] sm:$0xff] }
 0x25a   : > { %v1842_v63 = vpop.permute.xlu1 %1841  ;;  %v1844_v18 = vpop.permute.xlu0 %1843  ;;  %v962_v28 = vsel %vm941_vm5, %v769_v38, %v8152_v56  ;;  %v8173_v38 = vld [vmem:[#allocation108_spill] sm:$0xff]  ;;  %v8174_v56 = vld [vmem:[#allocation86_spill] sm:$0xff] }
 0x25b   : > { %v1923_v21 = vsel %vm1907_vm10, %v1730_v50, %v1842_v63  ;;  %v1924_v13 = vsel %vm1907_vm10, %v1731_v37, %v1844_v18  ;;  %v1155_v2 = vsel %vm1134_vm6, %v962_v28, %v8154_v9  ;;  %v8155_v50 = vld [vmem:[#allocation137_spill] sm:$0xff] }
 0x25c   : > { %4650 = vmatmul.mubr.msk.f32.gmra.mrb[14].mxu0 %vm1952_vm11, %v1923_v21  ;;  %v1541_v63 = vsel %vm1521_vm8, %v1347_v45, %v8155_v50  ;;  %v1348_v6 = vsel %vm1327_vm7, %v1155_v2, %v8156_v35  ;;  %v4786_v18 = vld [vmem:[#allocation2 + $0xf8] sm:$0xff]  ;;  %v8177_v2 = vld [vmem:[#allocation120_spill] sm:$0xff] }
 0x25d   : > { %4652 = vmatprep.mubr.msk.f32.mxu0 %vm1952_vm11, %v1924_v13  ;;  %v1542_v22 = vsel %vm1521_vm8, %v1348_v6, %v8157_v53  ;;  %v577_v4 = vsel %vm253_vm0, %v4786_v18, %v8158_v16  ;;  %v8178_v35 = vld [vmem:[#allocation33_spill] sm:$0xff]  ;;  %v8180_v53 = vld [vmem:[#allocation119_spill] sm:$0xff]  ;;  %v8181_v16 = vld [vmem:[#allocation140_spill] sm:$0xff] }
 0x25e   : > { %v1653_v54 = vpop.permute.xlu1 %1652  ;;  %v1655_v36 = vpop.permute.xlu0 %1654  ;;  %v770_v55 = vsel %vm748_vm4, %v577_v4, %v8159_v33  ;;  %v8182_v33 = vld [vmem:[#allocation52_spill] sm:$0xff] }
 0x25f   : > { %v1732_v17 = vsel %vm1714_vm9, %v1539_v20, %v1653_v54  ;;  %v1733_v59 = vsel %vm1714_vm9, %v1540_v11, %v1655_v36  ;;  %v8160_v54 = vld [vmem:[#allocation42_spill] sm:$0xff]  ;;  %v963_v25 = vsel %vm941_vm5, %v770_v55, %v8161_v29  ;;  %v8164_v36 = vld [vmem:[#allocation105_spill] sm:$0xff] }
 0x260   : > { %v578_v10 = vsel %vm253_vm0, %v4787_v47, %v8160_v54  ;;  %v1156_v43 = vsel %vm1134_vm6, %v963_v25, %v8163_v1  ;;  %v8183_v54 = vld [vmem:[#allocation89_spill] sm:$0xff] }
 0x261   : > { %v771_v42 = vsel %vm748_vm4, %v578_v10, %v8162_v30  ;;  %v1349_v51 = vsel %vm1327_vm7, %v1156_v43, %v8165_v19  ;;  %v4791_v25 = vld [vmem:[#allocation2 + $0x138] sm:$0xff]  ;;  %v8187_v19 = vld [vmem:[#allocation39_spill] sm:$0xff] }
 0x262   : > { %v1846_v24 = vpop.permute.xlu1 %1845  ;;  %v1848_v44 = vpop.permute.xlu0 %1847  ;;  %v964_v61 = vsel %vm941_vm5, %v771_v42, %v8164_v36  ;;  %v8185_v42 = vld [vmem:[#allocation110_spill] sm:$0xff]  ;;  %v8186_v36 = vld [vmem:[#allocation88_spill] sm:$0xff] }
 0x263   : > { %v1925_v7 = vsel %vm1907_vm10, %v1732_v17, %v1846_v24  ;;  %v1926_v5 = vsel %vm1907_vm10, %v1733_v59, %v1848_v44  ;;  %v1157_v39 = vsel %vm1134_vm6, %v964_v61, %v8166_v3  ;;  %v8167_v17 = vld [vmem:[#allocation139_spill] sm:$0xff]  ;;  %v4788_v44 = vld [vmem:[#allocation2 + $0x110] sm:$0xff] }
 0x264   : > { %4653 = vmatmul.mubr.msk.f32.gmra.mrb[16].mxu0 %vm1952_vm11, %v1925_v7  ;;  %v1543_v24 = vsel %vm1521_vm8, %v1349_v51, %v8167_v17  ;;  %v1350_v11 = vsel %vm1327_vm7, %v1157_v39, %v8168_v41  ;;  %v579_v26 = vsel %vm253_vm0, %v4788_v44, %v8170_v12  ;;  %v8189_v39 = vld [vmem:[#allocation122_spill] sm:$0xff]  ;;  %v8190_v41 = vld [vmem:[#allocation37_spill] sm:$0xff] }
 0x265   : > { %4655 = vmatprep.mubr.msk.f32.mxu0 %vm1952_vm11, %v1926_v5  ;;  %v1544_v27 = vsel %vm1521_vm8, %v1350_v11, %v8169_v58  ;;  %v772_v14 = vsel %vm748_vm4, %v579_v26, %v8171_v23  ;;  %v8192_v58 = vld [vmem:[#allocation121_spill] sm:$0xff]  ;;  %v8193_v12 = vld [vmem:[#allocation142_spill] sm:$0xff]  ;;  %v8194_v23 = vld [vmem:[#allocation56_spill] sm:$0xff] }
 0x266   : > { %v1657_v34 = vpop.permute.xlu1 %1656  ;;  %v1659_v0 = vpop.permute.xlu0 %1658  ;;  %v965_v48 = vsel %vm941_vm5, %v772_v14, %v8173_v38 }
 0x267   : > { %v1734_v21 = vsel %vm1714_vm9, %v1541_v63, %v1657_v34  ;;  %v1735_v13 = vsel %vm1714_vm9, %v1542_v22, %v1659_v0  ;;  %v8172_v34 = vld [vmem:[#allocation46_spill] sm:$0xff]  ;;  %v1158_v45 = vsel %vm1134_vm6, %v965_v48, %v8175_v57  ;;  %v8176_v0 = vld [vmem:[#allocation107_spill] sm:$0xff]  ;;  %v4793_v48 = vld [vmem:[#allocation2 + $0x150] sm:$0xff] }
 0x268   : > { %v580_v40 = vsel %vm253_vm0, %v4789_v32, %v8172_v34  ;;  %v1351_v50 = vsel %vm1327_vm7, %v1158_v45, %v8177_v2  ;;  %v8195_v34 = vld [vmem:[#allocation91_spill] sm:$0xff] }
 0x269   : > { %v773_v28 = vsel %vm748_vm4, %v580_v40, %v8174_v56  ;;  %v8199_v2 = vld [vmem:[#allocation43_spill] sm:$0xff] }
 0x26a   : > { %v1850_v46 = vpop.permute.xlu1 %1849  ;;  %v1852_v15 = vpop.permute.xlu0 %1851  ;;  %v966_v9 = vsel %vm941_vm5, %v773_v28, %v8176_v0  ;;  %v8197_v28 = vld [vmem:[#allocation112_spill] sm:$0xff]  ;;  %v8198_v0 = vld [vmem:[#allocation90_spill] sm:$0xff] }
 0x26b   : > { %v1927_v37 = vsel %vm1907_vm10, %v1734_v21, %v1850_v46  ;;  %v1928_v62 = vsel %vm1907_vm10, %v1735_v13, %v1852_v15  ;;  %v1159_v6 = vsel %vm1134_vm6, %v966_v9, %v8178_v35  ;;  %v8179_v21 = vld [vmem:[#allocation141_spill] sm:$0xff]  ;;  %v4790_v15 = vld [vmem:[#allocation2 + $0x128] sm:$0xff] }
 0x26c   : > { %4656 = vmatmul.mubr.msk.f32.gmra.mrb[18].mxu0 %vm1952_vm11, %v1927_v37  ;;  %v1545_v46 = vsel %vm1521_vm8, %v1351_v50, %v8179_v21  ;;  %v1352_v22 = vsel %vm1327_vm7, %v1159_v6, %v8180_v53  ;;  %v581_v55 = vsel %vm253_vm0, %v4790_v15, %v8182_v33  ;;  %v8201_v6 = vld [vmem:[#allocation124_spill] sm:$0xff] }
 0x26d   : > { %4658 = vmatprep.mubr.msk.f32.mxu0 %vm1952_vm11, %v1928_v62  ;;  %v1546_v4 = vsel %vm1521_vm8, %v1352_v22, %v8181_v16  ;;  %v774_v10 = vsel %vm748_vm4, %v581_v55, %v8183_v54  ;;  %v2441_v53 = vld [vmem:[#allocation2 + $0x9] sm:$0xff]  ;;  %v8202_v22 = vld [vmem:[#allocation41_spill] sm:$0xff] }
 0x26e   : > { %v1661_v8 = vpop.permute.xlu1 %1660  ;;  %v1663_v20 = vpop.permute.xlu0 %1662  ;;  %v967_v1 = vsel %vm941_vm5, %v774_v10, %v8185_v42  ;;  %2506 = vrot.lane.b32.xlu1 %v2441_v53, %s4813_s29  ;;  %v4794_v10 = vld [vmem:[#allocation2 + $0x158] sm:$0xff] }
 0x26f   : > { %v1736_v7 = vsel %vm1714_vm9, %v1543_v24, %v1661_v8  ;;  %v1737_v5 = vsel %vm1714_vm9, %v1544_v27, %v1663_v20  ;;  %v8184_v8 = vld [vmem:[#allocation50_spill] sm:$0xff]  ;;  %v1160_v51 = vsel %vm1134_vm6, %v967_v1, %v8187_v19  ;;  %v8188_v20 = vld [vmem:[#allocation109_spill] sm:$0xff] }
 0x270   : > { %v582_v30 = vsel %vm253_vm0, %v4791_v25, %v8184_v8  ;;  %v1353_v17 = vsel %vm1327_vm7, %v1160_v51, %v8189_v39  ;;  %v8207_v42 = vld [vmem:[#allocation93_spill] sm:$0xff]  ;;  %v8209_v51 = vld [vmem:[#allocation114_spill] sm:$0xff]  ;;  %v8210_v39 = vld [vmem:[#allocation92_spill] sm:$0xff] }
 0x271   : > { %v775_v61 = vsel %vm748_vm4, %v582_v30, %v8186_v36  ;;  %v4795_v36 = vld [vmem:[#allocation2 + $0x168] sm:$0xff] }
 0x272   : > { %v1854_v49 = vpop.permute.xlu1 %1853  ;;  %v1856_v60 = vpop.permute.xlu0 %1855  ;;  %v968_v3 = vsel %vm941_vm5, %v775_v61, %v8188_v20  ;;  %v8208_v61 = vld [vmem:[#allocation58_spill] sm:$0xff] }
 0x273   : > { %v1929_v59 = vsel %vm1907_vm10, %v1736_v7, %v1854_v49  ;;  %v1930_v31 = vsel %vm1907_vm10, %v1737_v5, %v1856_v60  ;;  %v1161_v11 = vsel %vm1134_vm6, %v968_v3, %v8190_v41  ;;  %v8191_v7 = vld [vmem:[#allocation143_spill] sm:$0xff]  ;;  %v4792_v60 = vld [vmem:[#allocation2 + $0x140] sm:$0xff]  ;;  %v586_v19 = vsel %vm253_vm0, %v4795_v36, %v8208_v61 }
 0x274   : > { %4659 = vmatmul.mubr.msk.f32.gmra.mrb[20].mxu0 %vm1952_vm11, %v1929_v59  ;;  %v1547_v49 = vsel %vm1521_vm8, %v1353_v17, %v8191_v7  ;;  %v1354_v27 = vsel %vm1327_vm7, %v1161_v11, %v8192_v58  ;;  %v583_v14 = vsel %vm253_vm0, %v4792_v60, %v8194_v23  ;;  %v779_v17 = vsel %vm748_vm4, %v586_v19, %v8210_v39  ;;  %v8212_v11 = vld [vmem:[#allocation113_spill] sm:$0xff] }
 0x275   : > { %4661 = vmatprep.mubr.msk.f32.mxu0 %vm1952_vm11, %v1930_v31  ;;  %v1548_v26 = vsel %vm1521_vm8, %v1354_v27, %v8193_v12  ;;  %v776_v40 = vsel %vm748_vm4, %v583_v14, %v8195_v34  ;;  %v972_v7 = vsel %vm941_vm5, %v779_v17, %v8212_v11  ;;  %v8215_v12 = vld [vmem:[#allocation147_spill] sm:$0xff] }
 0x276   : > { %v1665_v52 = vpop.permute.xlu1 %1664  ;;  %v1667_v63 = vpop.permute.xlu0 %1666  ;;  %v969_v57 = vsel %vm941_vm5, %v776_v40, %v8197_v28  ;;  %v4796_v40 = vld [vmem:[#allocation2 + $0x170] sm:$0xff]  ;;  %v8219_v28 = vld [vmem:[#allocation94_spill] sm:$0xff] }
 0x277   : > { %v1738_v37 = vsel %vm1714_vm9, %v1545_v46, %v1665_v52  ;;  %v1739_v62 = vsel %vm1714_vm9, %v1546_v4, %v1667_v63  ;;  %v8196_v52 = vld [vmem:[#allocation54_spill] sm:$0xff]  ;;  %v1162_v50 = vsel %vm1134_vm6, %v969_v57, %v8199_v2  ;;  %v8200_v63 = vld [vmem:[#allocation111_spill] sm:$0xff] }
 0x278   : > { %v584_v56 = vsel %vm253_vm0, %v4793_v48, %v8196_v52  ;;  %v1355_v21 = vsel %vm1327_vm7, %v1162_v50, %v8201_v6  ;;  %v2440_v4 = vld [vmem:[#allocation2 + $0x1] sm:$0xff]  ;;  %v8221_v50 = vld [vmem:[#allocation49_spill] sm:$0xff] }
 0x279   : > { %v777_v9 = vsel %vm748_vm4, %v584_v56, %v8198_v0  ;;  %2504 = vrot.lane.b32.xlu0 %v2440_v4, %s4813_s29  ;;  %v8220_v0 = vld [vmem:[#allocation115_spill] sm:$0xff]  ;;  %v6514_v4 = vstv %s2278_s5 }
 0x27a   : > { %v1858_v18 = vpop.permute.xlu1 %1857  ;;  %v1860_v47 = vpop.permute.xlu0 %1859  ;;  %v970_v35 = vsel %vm941_vm5, %v777_v9, %v8200_v63 }
 0x27b   : > { %v1931_v13 = vsel %vm1907_vm10, %v1738_v37, %v1858_v18  ;;  %v1932_v29 = vsel %vm1907_vm10, %v1739_v62, %v1860_v47  ;;  %v1163_v37 = vsel %vm1134_vm6, %v970_v35, %v8202_v22  ;;  %v8203_v18 = vld [vmem:[#allocation145_spill] sm:$0xff]  ;;  %v8205_v62 = vld [vmem:[#allocation144_spill] sm:$0xff]  ;;  %v8222_v35 = vld [vmem:[#allocation127_spill] sm:$0xff] }
 0x27c   : > { %4662 = vmatmul.mubr.msk.f32.gmra.mrb[22].mxu0 %vm1952_vm11, %v1931_v13  ;;  %v1549_v16 = vsel %vm1521_vm8, %v1355_v21, %v8203_v18  ;;  %v8204_v13 = vld [vmem:[#allocation123_spill] sm:$0xff]  ;;  %v8223_v21 = vld [vmem:[#allocation148_spill] sm:$0xff]  ;;  %v6512_v18 = vld [vmem:[%s7833_s2] ss:$0 sm:$0xff] }
 0x27d   : > { %4664 = vmatprep.mubr.msk.f32.mxu0 %vm1952_vm11, %v1932_v29  ;;  %v1356_v15 = vsel %vm1327_vm7, %v1163_v37, %v8204_v13  ;;  %v8206_v29 = vld [vmem:[#allocation60_spill] sm:$0xff] }
 0x27e   : > { %v1669_v43 = vpop.permute.xlu1 %1668  ;;  %v1671_v24 = vpop.permute.xlu0 %1670  ;;  %v1550_v47 = vsel %vm1521_vm8, %v1356_v15, %v8205_v62  ;;  %v585_v25 = vsel %vm253_vm0, %v4794_v10, %v8206_v29 }
 0x27f   : > { %v1740_v59 = vsel %vm1714_vm9, %v1547_v49, %v1669_v43  ;;  %v1741_v31 = vsel %vm1714_vm9, %v1548_v26, %v1671_v24  ;;  %v778_v1 = vsel %vm748_vm4, %v585_v25, %v8207_v42  ;;  %v8211_v24 = vld [vmem:[#allocation47_spill] sm:$0xff]  ;;  %v8213_v49 = vld [vmem:[#allocation126_spill] sm:$0xff] }
 0x280   : > { %v971_v20 = vsel %vm941_vm5, %v778_v1, %v8209_v51 }
 0x281   : > { %v1164_v41 = vsel %vm1134_vm6, %v971_v20, %v8211_v24 }
 0x282   : > { %v1862_v44 = vpop.permute.xlu1 %1861  ;;  %v1864_v32 = vpop.permute.xlu0 %1863  ;;  %v1357_v58 = vsel %vm1327_vm7, %v1164_v41, %v8213_v49 }
 0x283   : > { %v1933_v5 = vsel %vm1907_vm10, %v1740_v59, %v1862_v44  ;;  %v1934_v38 = vsel %vm1907_vm10, %v1741_v31, %v1864_v32  ;;  %v8214_v59 = vld [vmem:[#allocation45_spill] sm:$0xff]  ;;  %v1551_v26 = vsel %vm1521_vm8, %v1357_v58, %v8215_v12  ;;  %v8217_v31 = vld [vmem:[#allocation146_spill] sm:$0xff] }
 0x284   : > { %4665 = vmatmul.mubr.msk.f32.gmra.mrb[24].mxu0 %vm1952_vm11, %v1933_v5  ;;  %v1165_v44 = vsel %vm1134_vm6, %v972_v7, %v8214_v59  ;;  %v8216_v5 = vld [vmem:[#allocation125_spill] sm:$0xff] }
 0x285   : > { %4667 = vmatprep.mubr.msk.f32.mxu0 %vm1952_vm11, %v1934_v38  ;;  %v1358_v60 = vsel %vm1327_vm7, %v1165_v44, %v8216_v5  ;;  %v8218_v38 = vld [vmem:[#allocation64_spill] sm:$0xff] }
 0x286   : > { %v1673_v45 = vpop.permute.xlu1 %1672  ;;  %v1675_v46 = vpop.permute.xlu0 %1674  ;;  %v1552_v32 = vsel %vm1521_vm8, %v1358_v60, %v8217_v31  ;;  %v587_v48 = vsel %vm253_vm0, %v4796_v40, %v8218_v38 }
 0x287   : > { %v1742_v33 = vsel %vm1714_vm9, %v1549_v16, %v1673_v45  ;;  %v1743_v8 = vsel %vm1714_vm9, %v1550_v47, %v1675_v46  ;;  %v780_v57 = vsel %vm748_vm4, %v587_v48, %v8219_v28 }
 0x288   : > { %v973_v9 = vsel %vm941_vm5, %v780_v57, %v8220_v0 }
 0x289   : > { %v1166_v63 = vsel %vm1134_vm6, %v973_v9, %v8221_v50 }
 0x28a   : > { %v1866_v55 = vpop.permute.xlu1 %1865  ;;  %v1868_v30 = vpop.permute.xlu0 %1867  ;;  %v1359_v6 = vsel %vm1327_vm7, %v1166_v63, %v8222_v35 }
 0x28b   : > { %v1935_v54 = vsel %vm1907_vm10, %v1742_v33, %v1866_v55  ;;  %v1936_v43 = vsel %vm1907_vm10, %v1743_v8, %v1868_v30  ;;  %v1553_v46 = vsel %vm1521_vm8, %v1359_v6, %v8223_v21 }
 0x28c   : > { %4668 = vmatmul.mubr.msk.f32.gmra.mrb[26].mxu0 %vm1952_vm11, %v1935_v54 }
 0x28d   : > { %4670 = vmatprep.mubr.msk.f32.mxu0 %vm1952_vm11, %v1936_v43 }
 0x28e   : > { %v1677_v3 = vpop.permute.xlu1 %1676  ;;  %v1679_v27 = vpop.permute.xlu0 %1678 }
 0x28f   : > { %v1744_v23 = vsel %vm1714_vm9, %v1551_v26, %v1677_v3  ;;  %v1745_v52 = vsel %vm1714_vm9, %v1552_v32, %v1679_v27 }
 0x292   : > { %v1870_v14 = vpop.permute.xlu1 %1869  ;;  %v1872_v56 = vpop.permute.xlu0 %1871 }
 0x293   : > { %v1937_v34 = vsel %vm1907_vm10, %v1744_v23, %v1870_v14  ;;  %v1938_v45 = vsel %vm1907_vm10, %v1745_v52, %v1872_v56 }
 0x294   : > { %4671 = vmatmul.mubr.msk.f32.gmra.mrb[28].mxu0 %vm1952_vm11, %v1937_v34 }
 0x295   : > { %4673 = vmatprep.mubr.msk.f32.mxu0 %vm1952_vm11, %v1938_v45 }
 0x296   : > { %v1681_v2 = vpop.permute.xlu1 %1680 }
 0x297   : > { %v1746_v53 = vsel %vm1714_vm9, %v1553_v46, %v1681_v2 }
 0x29a   : > { %v1874_v22 = vpop.permute.xlu1 %1873 }
 0x29b   : > { %v1939_v37 = vsel %vm1907_vm10, %v1746_v53, %v1874_v22 }
 0x29c   : > { %4674 = vmatmul.mubr.msk.f32.gmra.mrb[30].mxu0 %vm1952_vm11, %v1939_v37 }
 0x2ff   : > { %v4630_v16 = vpop.f32.mrb[0].mxu0 }
 0x300   : > { %v2125_v13 = vadd.f32 %v4630_v16, %v6512_v18  ;;  %v2119_v15 = vpop.f32.mrb[1].mxu0 }
 0x301   : > { %v2120_v33 = vadd.f32 %v6512_v18, %v2119_v15 }
 0x302   : > { %vm2280_vm12 = vcmp.ge.f32.partialorder %v2125_v13, 0.0  ;;  %v2313_v55 = vmul.f32 %v6514_v4, %v2125_v13 }
 0x303   : > { %vm2279_vm13 = vcmp.ge.f32.partialorder %v2120_v33, 0.0  ;;  %v2312_v62 = vmul.f32 %v6514_v4, %v2120_v33  ;;  %v4633_v47 = vpop.f32.mrb[2].mxu0 }
 0x304   : > { %v2345_v54 = vsel %vm2280_vm12, %v2125_v13, %v2313_v55  ;;  %v2135_v10 = vadd.f32 %v4633_v47, %v6512_v18  ;;  %v2129_v29 = vpop.f32.mrb[3].mxu0 }
 0x305   : > { %2377 = vst.msk [vmem:[#allocation2 + $0x21] sm:$0xff] %vm253_vm0, %v2345_v54  ;;  %v2344_v25 = vsel %vm2279_vm13, %v2120_v33, %v2312_v62  ;;  %v2130_v8 = vadd.f32 %v6512_v18, %v2129_v29 }
 0x306   : > { %2376 = vst.msk [vmem:[#allocation2 + $0x19] sm:$0xff] %vm253_vm0, %v2344_v25  ;;  %vm2282_vm14 = vcmp.ge.f32.partialorder %v2135_v10, 0.0  ;;  %v2315_v30 = vmul.f32 %v6514_v4, %v2135_v10 }
 0x307   : > { %vm2281_vm15 = vcmp.ge.f32.partialorder %v2130_v8, 0.0  ;;  %v2314_v42 = vmul.f32 %v6514_v4, %v2130_v8  ;;  %v4636_v1 = vpop.f32.mrb[4].mxu0 }
 0x308   : > { %v2347_v43 = vsel %vm2282_vm14, %v2135_v10, %v2315_v30  ;;  %v2145_v36 = vadd.f32 %v4636_v1, %v6512_v18  ;;  %v2139_v61 = vpop.f32.mrb[5].mxu0 }
 0x309   : > { %2379 = vst.msk [vmem:[#allocation2 + $0x39] sm:$0xff] %vm253_vm0, %v2347_v43  ;;  %v2346_v19 = vsel %vm2281_vm15, %v2130_v8, %v2314_v42  ;;  %v2140_v51 = vadd.f32 %v6512_v18, %v2139_v61 }
 0x30a   : > { %2378 = vst.msk [vmem:[#allocation2 + $0x31] sm:$0xff] %vm253_vm0, %v2346_v19  ;;  %vm2284_vm1 = vcmp.ge.f32.partialorder %v2145_v36, 0.0  ;;  %v2317_v20 = vmul.f32 %v6514_v4, %v2145_v36 }
 0x30b   : > { %vm2283_vm2 = vcmp.ge.f32.partialorder %v2140_v51, 0.0  ;;  %v2316_v3 = vmul.f32 %v6514_v4, %v2140_v51 }
 0x30c   : > { %v2349_v39 = vsel %vm2284_vm1, %v2145_v36, %v2317_v20  ;;  %v6532_v17 = vld [vmem:[#allocation2 + $0x21] sm:$0xff] }
 0x30d   : > { %2381 = vst.msk [vmem:[#allocation2 + $0x51] sm:$0xff] %vm253_vm0, %v2349_v39  ;;  %v2348_v24 = vsel %vm2283_vm2, %v2140_v51, %v2316_v3  ;;  %2510 = vrot.lane.b32.xlu1 %v6532_v17, %s4813_s29  ;;  %v6537_v41 = vld [vmem:[#allocation2 + $0x19] sm:$0xff] }
 0x30e   : > { %2380 = vst.msk [vmem:[#allocation2 + $0x49] sm:$0xff] %vm253_vm0, %v2348_v24  ;;  %2508 = vrot.lane.b32.xlu0 %v6537_v41, %s4813_s29 }
 0x30f   : > { %v4639_v11 = vpop.f32.mrb[6].mxu0 }
 0x310   : > { %v2155_v7 = vadd.f32 %v4639_v11, %v6512_v18  ;;  %v2149_v49 = vpop.f32.mrb[7].mxu0  ;;  %v6543_v58 = vld [vmem:[#allocation2 + $0x39] sm:$0xff] }
 0x311   : > { %v2150_v27 = vadd.f32 %v6512_v18, %v2149_v49  ;;  %2514 = vrot.lane.b32.xlu1 %v6543_v58, %s4813_s29  ;;  %v6548_v59 = vld [vmem:[#allocation2 + $0x31] sm:$0xff] }
 0x312   : > { %vm2286_vm12 = vcmp.ge.f32.partialorder %v2155_v7, 0.0  ;;  %v2319_v44 = vmul.f32 %v6514_v4, %v2155_v7  ;;  %2512 = vrot.lane.b32.xlu0 %v6548_v59, %s4813_s29 }
 0x313   : > { %vm2285_vm13 = vcmp.ge.f32.partialorder %v2150_v27, 0.0  ;;  %v2318_v12 = vmul.f32 %v6514_v4, %v2150_v27 }
 0x314   : > { %v2351_v26 = vsel %vm2286_vm12, %v2155_v7, %v2319_v44  ;;  %v6554_v5 = vld [vmem:[#allocation2 + $0x51] sm:$0xff] }
 0x315   : > { %2383 = vst.msk [vmem:[#allocation2 + $0x69] sm:$0xff] %vm253_vm0, %v2351_v26  ;;  %v2350_v60 = vsel %vm2285_vm13, %v2150_v27, %v2318_v12  ;;  %2518 = vrot.lane.b32.xlu1 %v6554_v5, %s4813_s29  ;;  %v6559_v23 = vld [vmem:[#allocation2 + $0x49] sm:$0xff] }
 0x316   : > { %2382 = vst.msk [vmem:[#allocation2 + $0x61] sm:$0xff] %vm253_vm0, %v2350_v60  ;;  %2516 = vrot.lane.b32.xlu0 %v6559_v23, %s4813_s29 }
 0x317   : > { %v4642_v14 = vpop.f32.mrb[8].mxu0 }
 0x318   : > { %v2165_v31 = vadd.f32 %v4642_v14, %v6512_v18  ;;  %v2159_v32 = vpop.f32.mrb[9].mxu0 }
 0x319   : > { %v2160_v34 = vadd.f32 %v6512_v18, %v2159_v32 }
 0x31a   : > { %vm2288_vm14 = vcmp.ge.f32.partialorder %v2165_v31, 0.0  ;;  %v2321_v40 = vmul.f32 %v6514_v4, %v2165_v31 }
 0x31b   : > { %vm2287_vm15 = vcmp.ge.f32.partialorder %v2160_v34, 0.0  ;;  %v2320_v38 = vmul.f32 %v6514_v4, %v2160_v34 }
 0x31c   : > { %v2353_v48 = vsel %vm2288_vm14, %v2165_v31, %v2321_v40  ;;  %v6568_v52 = vld [vmem:[#allocation2 + $0x69] sm:$0xff] }
 0x31d   : > { %2385 = vst.msk [vmem:[#allocation2 + $0x81] sm:$0xff] %vm253_vm0, %v2353_v48  ;;  %v2352_v56 = vsel %vm2287_vm15, %v2160_v34, %v2320_v38  ;;  %2522 = vrot.lane.b32.xlu1 %v6568_v52, %s4813_s29  ;;  %v6573_v28 = vld [vmem:[#allocation2 + $0x61] sm:$0xff] }
 0x31e   : > { %2384 = vst.msk [vmem:[#allocation2 + $0x79] sm:$0xff] %vm253_vm0, %v2352_v56  ;;  %2520 = vrot.lane.b32.xlu0 %v6573_v28, %s4813_s29 }
 0x31f   : > { %v4645_v57 = vpop.f32.mrb[10].mxu0 }
 0x320   : > { %v2175_v45 = vadd.f32 %v4645_v57, %v6512_v18  ;;  %v2169_v0 = vpop.f32.mrb[11].mxu0 }
 0x321   : > { %v2170_v9 = vadd.f32 %v6512_v18, %v2169_v0 }
 0x322   : > { %vm2290_vm1 = vcmp.ge.f32.partialorder %v2175_v45, 0.0  ;;  %v2323_v2 = vmul.f32 %v6514_v4, %v2175_v45 }
 0x323   : > { %vm2289_vm2 = vcmp.ge.f32.partialorder %v2170_v9, 0.0  ;;  %v2322_v50 = vmul.f32 %v6514_v4, %v2170_v9 }
 0x324   : > { %v2355_v63 = vsel %vm2290_vm1, %v2175_v45, %v2323_v2  ;;  %v2451_v35 = vld [vmem:[#allocation2 + $0x81] sm:$0xff] }
 0x325   : > { %2387 = vst.msk [vmem:[#allocation2 + $0x99] sm:$0xff] %vm253_vm0, %v2355_v63  ;;  %v2354_v6 = vsel %vm2289_vm2, %v2170_v9, %v2322_v50  ;;  %2526 = vrot.lane.b32.xlu1 %v2451_v35, %s4813_s29  ;;  %v6584_v21 = vld [vmem:[#allocation2 + $0x79] sm:$0xff] }
 0x326   : > { %2386 = vst.msk [vmem:[#allocation2 + $0x91] sm:$0xff] %vm253_vm0, %v2354_v6  ;;  %2524 = vrot.lane.b32.xlu0 %v6584_v21, %s4813_s29 }
 0x327   : > { %v4648_v46 = vpop.f32.mrb[12].mxu0 }
 0x328   : > { %v2185_v53 = vadd.f32 %v4648_v46, %v6512_v18  ;;  %v2179_v22 = vpop.f32.mrb[13].mxu0 }
 0x329   : > { %v2180_v37 = vadd.f32 %v6512_v18, %v2179_v22 }
 0x32a   : > { %vm2292_vm12 = vcmp.ge.f32.partialorder %v2185_v53, 0.0  ;;  %v2325_v16 = vmul.f32 %v6514_v4, %v2185_v53 }
 0x32b   : > { %vm2291_vm13 = vcmp.ge.f32.partialorder %v2180_v37, 0.0  ;;  %v2324_v13 = vmul.f32 %v6514_v4, %v2180_v37 }
 0x32c   : > { %v2357_v15 = vsel %vm2292_vm12, %v2185_v53, %v2325_v16  ;;  %v2453_v33 = vld [vmem:[#allocation2 + $0x99] sm:$0xff] }
 0x32d   : > { %2389 = vst.msk [vmem:[#allocation2 + $0xb1] sm:$0xff] %vm253_vm0, %v2357_v15  ;;  %v2356_v55 = vsel %vm2291_vm13, %v2180_v37, %v2324_v13  ;;  %2530 = vrot.lane.b32.xlu1 %v2453_v33, %s4813_s29  ;;  %v2452_v62 = vld [vmem:[#allocation2 + $0x91] sm:$0xff] }
 0x32e   : > { %2388 = vst.msk [vmem:[#allocation2 + $0xa9] sm:$0xff] %vm253_vm0, %v2356_v55  ;;  %2528 = vrot.lane.b32.xlu0 %v2452_v62, %s4813_s29 }
 0x32f   : > { %v4651_v47 = vpop.f32.mrb[14].mxu0 }
 0x330   : > { %v2195_v54 = vadd.f32 %v4651_v47, %v6512_v18  ;;  %v2189_v10 = vpop.f32.mrb[15].mxu0 }
 0x331   : > { %v2190_v29 = vadd.f32 %v6512_v18, %v2189_v10 }
 0x332   : > { %vm2294_vm14 = vcmp.ge.f32.partialorder %v2195_v54, 0.0  ;;  %v2327_v25 = vmul.f32 %v6514_v4, %v2195_v54 }
 0x333   : > { %vm2293_vm15 = vcmp.ge.f32.partialorder %v2190_v29, 0.0  ;;  %v2326_v8 = vmul.f32 %v6514_v4, %v2190_v29 }
 0x334   : > { %v2359_v30 = vsel %vm2294_vm14, %v2195_v54, %v2327_v25  ;;  %v2455_v42 = vld [vmem:[#allocation2 + $0xb1] sm:$0xff] }
 0x335   : > { %2391 = vst.msk [vmem:[#allocation2 + $0xc9] sm:$0xff] %vm253_vm0, %v2359_v30  ;;  %v2358_v1 = vsel %vm2293_vm15, %v2190_v29, %v2326_v8  ;;  %2534 = vrot.lane.b32.xlu1 %v2455_v42, %s4813_s29  ;;  %v2454_v43 = vld [vmem:[#allocation2 + $0xa9] sm:$0xff] }
 0x336   : > { %2390 = vst.msk [vmem:[#allocation2 + $0xc1] sm:$0xff] %vm253_vm0, %v2358_v1  ;;  %2532 = vrot.lane.b32.xlu0 %v2454_v43, %s4813_s29 }
 0x337   : > { %v4654_v36 = vpop.f32.mrb[16].mxu0 }
 0x338   : > { %v2205_v61 = vadd.f32 %v4654_v36, %v6512_v18  ;;  %v2199_v19 = vpop.f32.mrb[17].mxu0 }
 0x339   : > { %v2200_v51 = vadd.f32 %v6512_v18, %v2199_v19 }
 0x33a   : > { %vm2296_vm1 = vcmp.ge.f32.partialorder %v2205_v61, 0.0  ;;  %v2329_v20 = vmul.f32 %v6514_v4, %v2205_v61 }
 0x33b   : > { %vm2295_vm2 = vcmp.ge.f32.partialorder %v2200_v51, 0.0  ;;  %v2328_v3 = vmul.f32 %v6514_v4, %v2200_v51 }
 0x33c   : > { %v2361_v39 = vsel %vm2296_vm1, %v2205_v61, %v2329_v20  ;;  %v2457_v24 = vld [vmem:[#allocation2 + $0xc9] sm:$0xff] }
 0x33d   : > { %2393 = vst.msk [vmem:[#allocation2 + $0xe1] sm:$0xff] %vm253_vm0, %v2361_v39  ;;  %v2360_v11 = vsel %vm2295_vm2, %v2200_v51, %v2328_v3  ;;  %2538 = vrot.lane.b32.xlu1 %v2457_v24, %s4813_s29  ;;  %v2456_v7 = vld [vmem:[#allocation2 + $0xc1] sm:$0xff] }
 0x33e   : > { %2392 = vst.msk [vmem:[#allocation2 + $0xd9] sm:$0xff] %vm253_vm0, %v2360_v11  ;;  %2536 = vrot.lane.b32.xlu0 %v2456_v7, %s4813_s29 }
 0x33f   : > { %v4657_v49 = vpop.f32.mrb[18].mxu0 }
 0x340   : > { %v2215_v27 = vadd.f32 %v4657_v49, %v6512_v18  ;;  %v2209_v44 = vpop.f32.mrb[19].mxu0 }
 0x341   : > { %v2210_v12 = vadd.f32 %v6512_v18, %v2209_v44 }
 0x342   : > { %vm2298_vm12 = vcmp.ge.f32.partialorder %v2215_v27, 0.0  ;;  %v2331_v26 = vmul.f32 %v6514_v4, %v2215_v27 }
 0x343   : > { %vm2297_vm13 = vcmp.ge.f32.partialorder %v2210_v12, 0.0  ;;  %v2330_v60 = vmul.f32 %v6514_v4, %v2210_v12 }
 0x344   : > { %v2363_v14 = vsel %vm2298_vm12, %v2215_v27, %v2331_v26  ;;  %v2459_v31 = vld [vmem:[#allocation2 + $0xe1] sm:$0xff] }
 0x345   : > { %2395 = vst.msk [vmem:[#allocation2 + $0xf9] sm:$0xff] %vm253_vm0, %v2363_v14  ;;  %v2362_v32 = vsel %vm2297_vm13, %v2210_v12, %v2330_v60  ;;  %2542 = vrot.lane.b32.xlu1 %v2459_v31, %s4813_s29  ;;  %v2458_v34 = vld [vmem:[#allocation2 + $0xd9] sm:$0xff] }
 0x346   : > { %2394 = vst.msk [vmem:[#allocation2 + $0xf1] sm:$0xff] %vm253_vm0, %v2362_v32  ;;  %2540 = vrot.lane.b32.xlu0 %v2458_v34, %s4813_s29 }
 0x347   : > { %v4660_v40 = vpop.f32.mrb[20].mxu0 }
 0x348   : > { %v2225_v38 = vadd.f32 %v4660_v40, %v6512_v18  ;;  %v2219_v48 = vpop.f32.mrb[21].mxu0 }
 0x349   : > { %v2220_v56 = vadd.f32 %v6512_v18, %v2219_v48 }
 0x34a   : > { %vm2300_vm14 = vcmp.ge.f32.partialorder %v2225_v38, 0.0  ;;  %v2333_v57 = vmul.f32 %v6514_v4, %v2225_v38 }
 0x34b   : > { %vm2299_vm15 = vcmp.ge.f32.partialorder %v2220_v56, 0.0  ;;  %v2332_v45 = vmul.f32 %v6514_v4, %v2220_v56 }
 0x34c   : > { %v2365_v0 = vsel %vm2300_vm14, %v2225_v38, %v2333_v57  ;;  %v2461_v9 = vld [vmem:[#allocation2 + $0xf9] sm:$0xff] }
 0x34d   : > { %2397 = vst.msk [vmem:[#allocation2 + $0x111] sm:$0xff] %vm253_vm0, %v2365_v0  ;;  %v2364_v2 = vsel %vm2299_vm15, %v2220_v56, %v2332_v45  ;;  %2546 = vrot.lane.b32.xlu1 %v2461_v9, %s4813_s29  ;;  %v2460_v50 = vld [vmem:[#allocation2 + $0xf1] sm:$0xff] }
 0x34e   : > { %2396 = vst.msk [vmem:[#allocation2 + $0x109] sm:$0xff] %vm253_vm0, %v2364_v2  ;;  %2544 = vrot.lane.b32.xlu0 %v2460_v50, %s4813_s29  ;;  %v2633_v9 = vld [vmem:[#allocation2 + $0xa] sm:$0xff]  ;;  %v6671_v2 = vld [vmem:[#allocation2 + $0x22] sm:$0xff]  ;;  %v6679_v50 = vld [vmem:[#allocation2 + $0x3a] sm:$0xff] }
 0x34f   : > { %v4663_v63 = vpop.f32.mrb[22].mxu0 }
 0x350   : > { %v2235_v35 = vadd.f32 %v4663_v63, %v6512_v18  ;;  %v2229_v6 = vpop.f32.mrb[23].mxu0  ;;  %v6683_v63 = vld [vmem:[#allocation2 + $0x32] sm:$0xff] }
 0x351   : > { %v2230_v46 = vadd.f32 %v6512_v18, %v2229_v6  ;;  %v6691_v6 = vld [vmem:[#allocation2 + $0x4a] sm:$0xff] }
 0x352   : > { %vm2302_vm1 = vcmp.ge.f32.partialorder %v2235_v35, 0.0  ;;  %v2335_v53 = vmul.f32 %v6514_v4, %v2235_v35 }
 0x353   : > { %vm2301_vm2 = vcmp.ge.f32.partialorder %v2230_v46, 0.0  ;;  %v2334_v22 = vmul.f32 %v6514_v4, %v2230_v46 }
 0x354   : > { %v2367_v37 = vsel %vm2302_vm1, %v2235_v35, %v2335_v53  ;;  %v2463_v16 = vld [vmem:[#allocation2 + $0x111] sm:$0xff]  ;;  %v6699_v53 = vld [vmem:[#allocation2 + $0x62] sm:$0xff] }
 0x355   : > { %2399 = vst.msk [vmem:[#allocation2 + $0x129] sm:$0xff] %vm253_vm0, %v2367_v37  ;;  %v2366_v13 = vsel %vm2301_vm2, %v2230_v46, %v2334_v22  ;;  %2550 = vrot.lane.b32.xlu1 %v2463_v16, %s4813_s29  ;;  %v2462_v15 = vld [vmem:[#allocation2 + $0x109] sm:$0xff]  ;;  %v6687_v35 = vld [vmem:[#allocation2 + $0x52] sm:$0xff]  ;;  %v6707_v37 = vld [vmem:[#allocation2 + $0x7a] sm:$0xff] }
 0x356   : > { %2398 = vst.msk [vmem:[#allocation2 + $0x121] sm:$0xff] %vm253_vm0, %v2366_v13  ;;  %2548 = vrot.lane.b32.xlu0 %v2462_v15, %s4813_s29  ;;  %v6695_v46 = vld [vmem:[#allocation2 + $0x6a] sm:$0xff]  ;;  %v6703_v22 = vld [vmem:[#allocation2 + $0x82] sm:$0xff]  ;;  %v6711_v16 = vld [vmem:[#allocation2 + $0x9a] sm:$0xff] }
 0x357   : > { %v4666_v33 = vpop.f32.mrb[24].mxu0  ;;  %v6715_v13 = vld [vmem:[#allocation2 + $0x92] sm:$0xff] }
 0x358   : > { %v2245_v55 = vadd.f32 %v4666_v33, %v6512_v18  ;;  %v2239_v62 = vpop.f32.mrb[25].mxu0  ;;  %v6719_v15 = vld [vmem:[#allocation2 + $0xb2] sm:$0xff]  ;;  %v6723_v33 = vld [vmem:[#allocation2 + $0xaa] sm:$0xff] }
 0x359   : > { %v2240_v47 = vadd.f32 %v6512_v18, %v2239_v62  ;;  %v6731_v62 = vld [vmem:[#allocation2 + $0xc2] sm:$0xff] }
 0x35a   : > { %vm2304_vm12 = vcmp.ge.f32.partialorder %v2245_v55, 0.0  ;;  %v2337_v54 = vmul.f32 %v6514_v4, %v2245_v55 }
 0x35b   : > { %vm2303_vm13 = vcmp.ge.f32.partialorder %v2240_v47, 0.0  ;;  %v2336_v10 = vmul.f32 %v6514_v4, %v2240_v47 }
 0x35c   : > { %v2369_v29 = vsel %vm2304_vm12, %v2245_v55, %v2337_v54  ;;  %v2465_v25 = vld [vmem:[#allocation2 + $0x129] sm:$0xff]  ;;  %v6739_v54 = vld [vmem:[#allocation2 + $0xda] sm:$0xff] }
 0x35d   : > { %2401 = vst.msk [vmem:[#allocation2 + $0x141] sm:$0xff] %vm253_vm0, %v2369_v29  ;;  %v2368_v8 = vsel %vm2303_vm13, %v2240_v47, %v2336_v10  ;;  %2554 = vrot.lane.b32.xlu1 %v2465_v25, %s4813_s29  ;;  %v2464_v30 = vld [vmem:[#allocation2 + $0x121] sm:$0xff]  ;;  %v6727_v55 = vld [vmem:[#allocation2 + $0xca] sm:$0xff]  ;;  %v6747_v29 = vld [vmem:[#allocation2 + $0xf2] sm:$0xff] }
 0x35e   : > { %2400 = vst.msk [vmem:[#allocation2 + $0x139] sm:$0xff] %vm253_vm0, %v2368_v8  ;;  %2552 = vrot.lane.b32.xlu0 %v2464_v30, %s4813_s29  ;;  %v6735_v47 = vld [vmem:[#allocation2 + $0xe2] sm:$0xff]  ;;  %v6743_v10 = vld [vmem:[#allocation2 + $0xfa] sm:$0xff]  ;;  %v2655_v25 = vld [vmem:[#allocation2 + $0x112] sm:$0xff]  ;;  %v6751_v8 = vpop.permute.xlu1 %2506 }
 0x35f   : > { %v4669_v42 = vpop.f32.mrb[26].mxu0  ;;  %v2654_v30 = vld [vmem:[#allocation2 + $0x10a] sm:$0xff] }
 0x360   : > { %v2255_v1 = vadd.f32 %v4669_v42, %v6512_v18  ;;  %v2249_v43 = vpop.f32.mrb[27].mxu0  ;;  %v6754_v42 = vpop.permute.xlu0 %2504 }
 0x361   : > { %v2250_v36 = vadd.f32 %v6512_v18, %v2249_v43  ;;  %v2656_v43 = vld [vmem:[#allocation2 + $0x122] sm:$0xff] }
 0x362   : > { %vm2306_vm14 = vcmp.ge.f32.partialorder %v2255_v1, 0.0  ;;  %v2339_v61 = vmul.f32 %v6514_v4, %v2255_v1 }
 0x363   : > { %vm2305_vm15 = vcmp.ge.f32.partialorder %v2250_v36, 0.0  ;;  %v2338_v19 = vmul.f32 %v6514_v4, %v2250_v36 }
 0x364   : > { %v2371_v51 = vsel %vm2306_vm14, %v2255_v1, %v2339_v61  ;;  %v2467_v20 = vld [vmem:[#allocation2 + $0x141] sm:$0xff]  ;;  %v2657_v1 = vld [vmem:[#allocation2 + $0x12a] sm:$0xff] }
 0x365   : > { %2403 = vst.msk [vmem:[#allocation2 + $0x159] sm:$0xff] %vm253_vm0, %v2371_v51  ;;  %v2370_v3 = vsel %vm2305_vm15, %v2250_v36, %v2338_v19  ;;  %2558 = vrot.lane.b32.xlu1 %v2467_v20, %s4813_s29  ;;  %v2466_v39 = vld [vmem:[#allocation2 + $0x139] sm:$0xff]  ;;  %v2659_v19 = vld [vmem:[#allocation2 + $0x142] sm:$0xff] }
 0x366   : > { %2402 = vst.msk [vmem:[#allocation2 + $0x151] sm:$0xff] %vm253_vm0, %v2370_v3  ;;  %2556 = vrot.lane.b32.xlu0 %v2466_v39, %s4813_s29  ;;  %v2658_v51 = vld [vmem:[#allocation2 + $0x13a] sm:$0xff] }
 0x367   : > { %v4672_v24 = vpop.f32.mrb[28].mxu0 }
 0x368   : > { %v2265_v11 = vadd.f32 %v4672_v24, %v6512_v18  ;;  %v2259_v7 = vpop.f32.mrb[29].mxu0 }
 0x369   : > { %v2260_v49 = vadd.f32 %v6512_v18, %v2259_v7 }
 0x36a   : > { %vm2308_vm1 = vcmp.ge.f32.partialorder %v2265_v11, 0.0  ;;  %v2341_v27 = vmul.f32 %v6514_v4, %v2265_v11 }
 0x36b   : > { %vm2307_vm2 = vcmp.ge.f32.partialorder %v2260_v49, 0.0  ;;  %v2340_v44 = vmul.f32 %v6514_v4, %v2260_v49 }
 0x36c   : > { %v2373_v12 = vsel %vm2308_vm1, %v2265_v11, %v2341_v27  ;;  %v2469_v26 = vld [vmem:[#allocation2 + $0x159] sm:$0xff] }
 0x36d   : > { %2405 = vst.msk [vmem:[#allocation2 + $0x171] sm:$0xff] %vm253_vm0, %v2373_v12  ;;  %v2372_v60 = vsel %vm2307_vm2, %v2260_v49, %v2340_v44  ;;  %2562 = vrot.lane.b32.xlu1 %v2469_v26, %s4813_s29  ;;  %v2468_v14 = vld [vmem:[#allocation2 + $0x151] sm:$0xff]  ;;  %v2661_v20 = vld [vmem:[#allocation2 + $0x15a] sm:$0xff] }
 0x36e   : > { %2404 = vst.msk [vmem:[#allocation2 + $0x169] sm:$0xff] %vm253_vm0, %v2372_v60  ;;  %2560 = vrot.lane.b32.xlu0 %v2468_v14, %s4813_s29  ;;  %v2660_v39 = vld [vmem:[#allocation2 + $0x152] sm:$0xff]  ;;  %v6775_v27 = vld [vmem:[#allocation2 + $0x20] sm:$0xff] }
 0x36f   : > { %v4675_v31 = vpop.f32.mrb[30].mxu0  ;;  %v6779_v12 = vld [vmem:[#allocation2 + $0x18] sm:$0xff] }
 0x370   : > { %v2275_v32 = vadd.f32 %v4675_v31, %v6512_v18  ;;  %v2269_v34 = vpop.f32.mrb[31].mxu0  ;;  %v6787_v60 = vld [vmem:[#allocation2 + $0x38] sm:$0xff]  ;;  %v6791_v31 = vld [vmem:[#allocation2 + $0x30] sm:$0xff] }
 0x371   : > { %v2270_v40 = vadd.f32 %v6512_v18, %v2269_v34  ;;  %v2632_v18 = vld [vmem:[#allocation2 + $0x2] sm:$0xff]  ;;  %v6799_v34 = vld [vmem:[#allocation2 + $0x50] sm:$0xff] }
 0x372   : > { %vm2310_vm12 = vcmp.ge.f32.partialorder %v2275_v32, 0.0  ;;  %v2343_v38 = vmul.f32 %v6514_v4, %v2275_v32 }
 0x373   : > { %vm2309_vm13 = vcmp.ge.f32.partialorder %v2270_v40, 0.0  ;;  %v2342_v48 = vmul.f32 %v6514_v4, %v2270_v40  ;;  %v6675_v4 = vld [vmem:[#allocation2 + $0x1a] sm:$0xff] }
 0x374   : > { %v2375_v56 = vsel %vm2310_vm12, %v2275_v32, %v2343_v38  ;;  %v2471_v57 = vld [vmem:[#allocation2 + $0x171] sm:$0xff]  ;;  %v6803_v38 = vld [vmem:[#allocation2 + $0x48] sm:$0xff] }
 0x375   : > { %2407 = vst.msk [vmem:[#allocation2 + $0x189] sm:$0xff] %vm253_vm0, %v2375_v56  ;;  %v2374_v45 = vsel %vm2309_vm13, %v2270_v40, %v2342_v48  ;;  %2566 = vrot.lane.b32.xlu1 %v2471_v57, %s4813_s29  ;;  %v2470_v0 = vld [vmem:[#allocation2 + $0x169] sm:$0xff]  ;;  %v2663_v11 = vld [vmem:[#allocation2 + $0x172] sm:$0xff] }
 0x376   : > { %2406 = vst.msk [vmem:[#allocation2 + $0x181] sm:$0xff] %vm253_vm0, %v2374_v45  ;;  %2564 = vrot.lane.b32.xlu0 %v2470_v0, %s4813_s29  ;;  %v2662_v7 = vld [vmem:[#allocation2 + $0x16a] sm:$0xff]  ;;  %v6815_v45 = vld [vmem:[#allocation2 + $0x60] sm:$0xff] }
 0x377   : > { %v6811_v56 = vld [vmem:[#allocation2 + $0x68] sm:$0xff] }
 0x379   : > { %2698 = vrot.lane.b32.xlu1 %v2633_v9, %s4814_s30  ;;  %v6823_v9 = vld [vmem:[#allocation2 + $0x80] sm:$0xff] }
 0x37a   : > { %2696 = vrot.lane.b32.xlu0 %v2632_v18, %s4814_s30  ;;  %8232 = vst [vmem:[#allocation70_spill] sm:$0xff] %v6823_v9 }
 0x37d   : > { %2702 = vrot.lane.b32.xlu1 %v6671_v2, %s4814_s30 }
 0x37e   : > { %2700 = vrot.lane.b32.xlu0 %v6675_v4, %s4814_s30 }
 0x37f   : > { %v6759_v36 = vpop.permute.xlu1 %2510 }
 0x380   : > { %v6761_v61 = vpop.permute.xlu0 %2508 }
 0x381   : > { %2706 = vrot.lane.b32.xlu1 %v6679_v50, %s4814_s30 }
 0x382   : > { %2704 = vrot.lane.b32.xlu0 %v6683_v63, %s4814_s30 }
 0x383   : > { %v6765_v3 = vpop.permute.xlu1 %2514 }
 0x384   : > { %v6768_v24 = vpop.permute.xlu0 %2512 }
 0x385   : > { %2710 = vrot.lane.b32.xlu1 %v6687_v35, %s4814_s30 }
 0x386   : > { %2708 = vrot.lane.b32.xlu0 %v6691_v6, %s4814_s30 }
 0x387   : > { %v6773_v49 = vpop.permute.xlu1 %2518 }
 0x388   : > { %8224 = vst [vmem:[#allocation4_spill] sm:$0xff] %v6773_v49  ;;  %v6777_v44 = vpop.permute.xlu0 %2516 }
 0x389   : > { %2714 = vrot.lane.b32.xlu1 %v6695_v46, %s4814_s30 }
 0x38a   : > { %2712 = vrot.lane.b32.xlu0 %v6699_v53, %s4814_s30 }
 0x38d   : > { %2718 = vrot.lane.b32.xlu1 %v6703_v22, %s4814_s30 }
 0x38e   : > { %2716 = vrot.lane.b32.xlu0 %v6707_v37, %s4814_s30 }
 0x38f   : > { %v6785_v26 = vpop.permute.xlu1 %2522 }
 0x390   : > { %8225 = vst [vmem:[#allocation62_spill] sm:$0xff] %v6785_v26  ;;  %v6789_v14 = vpop.permute.xlu0 %2520  ;;  %v6899_v26 = vld [vmem:[#allocation2 + $0x108] sm:$0xff] }
 0x391   : > { %2722 = vrot.lane.b32.xlu1 %v6711_v16, %s4814_s30  ;;  %8226 = vst [vmem:[#allocation5_spill] sm:$0xff] %v6789_v14 }
 0x392   : > { %2720 = vrot.lane.b32.xlu0 %v6715_v13, %s4814_s30 }
 0x395   : > { %2726 = vrot.lane.b32.xlu1 %v6719_v15, %s4814_s30 }
 0x396   : > { %2724 = vrot.lane.b32.xlu0 %v6723_v33, %s4814_s30 }
 0x397   : > { %v6797_v32 = vpop.permute.xlu1 %2526 }
 0x398   : > { %8227 = vst [vmem:[#allocation7_spill] sm:$0xff] %v6797_v32  ;;  %v6801_v40 = vpop.permute.xlu0 %2524  ;;  %v6887_v32 = vld [vmem:[#allocation2 + $0xf0] sm:$0xff] }
 0x399   : > { %2730 = vrot.lane.b32.xlu1 %v6727_v55, %s4814_s30  ;;  %8228 = vst [vmem:[#allocation67_spill] sm:$0xff] %v6801_v40 }
 0x39a   : > { %2728 = vrot.lane.b32.xlu0 %v6731_v62, %s4814_s30 }
 0x39d   : > { %2734 = vrot.lane.b32.xlu1 %v6735_v47, %s4814_s30 }
 0x39e   : > { %2732 = vrot.lane.b32.xlu0 %v6739_v54, %s4814_s30 }
 0x39f   : > { %v6809_v48 = vpop.permute.xlu1 %2530 }
 0x3a0   : > { %8229 = vst [vmem:[#allocation66_spill] sm:$0xff] %v6809_v48  ;;  %v6813_v57 = vpop.permute.xlu0 %2528  ;;  %v6875_v48 = vld [vmem:[#allocation2 + $0xd8] sm:$0xff] }
 0x3a1   : > { %2738 = vrot.lane.b32.xlu1 %v6743_v10, %s4814_s30  ;;  %8230 = vst [vmem:[#allocation11_spill] sm:$0xff] %v6813_v57 }
 0x3a2   : > { %2736 = vrot.lane.b32.xlu0 %v6747_v29, %s4814_s30 }
 0x3a5   : > { %2742 = vrot.lane.b32.xlu1 %v2655_v25, %s4814_s30  ;;  %v6827_v25 = vld [vmem:[#allocation2 + $0x78] sm:$0xff] }
 0x3a6   : > { %2740 = vrot.lane.b32.xlu0 %v2654_v30, %s4814_s30 }
 0x3a7   : > { %v6821_v0 = vpop.permute.xlu1 %2534 }
 0x3a8   : > { %8231 = vst [vmem:[#allocation9_spill] sm:$0xff] %v6821_v0  ;;  %v6825_v18 = vpop.permute.xlu0 %2532  ;;  %v6863_v0 = vld [vmem:[#allocation2 + $0xc0] sm:$0xff] }
 0x3a9   : > { %2746 = vrot.lane.b32.xlu1 %v2657_v1, %s4814_s30  ;;  %8233 = vst [vmem:[#allocation69_spill] sm:$0xff] %v6825_v18  ;;  %v6835_v1 = vld [vmem:[#allocation2 + $0x98] sm:$0xff] }
 0x3aa   : > { %2744 = vrot.lane.b32.xlu0 %v2656_v43, %s4814_s30  ;;  %8235 = vst [vmem:[#allocation72_spill] sm:$0xff] %v6835_v1 }
 0x3ad   : > { %2750 = vrot.lane.b32.xlu1 %v2659_v19, %s4814_s30  ;;  %v6839_v19 = vld [vmem:[#allocation2 + $0x90] sm:$0xff] }
 0x3ae   : > { %2748 = vrot.lane.b32.xlu0 %v2658_v51, %s4814_s30  ;;  %8237 = vst [vmem:[#allocation71_spill] sm:$0xff] %v6839_v19 }
 0x3af   : > { %v6833_v30 = vpop.permute.xlu1 %2538 }
 0x3b0   : > { %8234 = vst [vmem:[#allocation14_spill] sm:$0xff] %v6833_v30  ;;  %v6837_v43 = vpop.permute.xlu0 %2536  ;;  %v6859_v30 = vld [vmem:[#allocation2 + $0xc8] sm:$0xff] }
 0x3b1   : > { %2754 = vrot.lane.b32.xlu1 %v2661_v20, %s4814_s30  ;;  %8236 = vst [vmem:[#allocation12_spill] sm:$0xff] %v6837_v43  ;;  %v6847_v20 = vld [vmem:[#allocation2 + $0xb0] sm:$0xff] }
 0x3b2   : > { %2752 = vrot.lane.b32.xlu0 %v2660_v39, %s4814_s30  ;;  %8239 = vst [vmem:[#allocation15_spill] sm:$0xff] %v6847_v20 }
 0x3b5   : > { %2758 = vrot.lane.b32.xlu1 %v2663_v11, %s4814_s30  ;;  %v6851_v11 = vld [vmem:[#allocation2 + $0xa8] sm:$0xff] }
 0x3b6   : > { %2756 = vrot.lane.b32.xlu0 %v2662_v7, %s4814_s30  ;;  %8241 = vst [vmem:[#allocation20_spill] sm:$0xff] %v6851_v11 }
 0x3b7   : > { %v6845_v51 = vpop.permute.xlu1 %2542 }
 0x3b8   : > { %8238 = vst [vmem:[#allocation17_spill] sm:$0xff] %v6845_v51  ;;  %v6849_v39 = vpop.permute.xlu0 %2540 }
 0x3b9   : > { %2890 = vrot.lane.b32.xlu1 %v6775_v27, %s4815_s7  ;;  %8240 = vst [vmem:[#allocation73_spill] sm:$0xff] %v6849_v39  ;;  %v6871_v39 = vld [vmem:[#allocation2 + $0xe0] sm:$0xff] }
 0x3ba   : > { %2888 = vrot.lane.b32.xlu0 %v6779_v12, %s4815_s7 }
 0x3bd   : > { %2894 = vrot.lane.b32.xlu1 %v6787_v60, %s4815_s7 }
 0x3be   : > { %2892 = vrot.lane.b32.xlu0 %v6791_v31, %s4815_s7 }
 0x3bf   : > { %v6857_v7 = vpop.permute.xlu1 %2546 }
 0x3c0   : > { %8242 = vst [vmem:[#allocation18_spill] sm:$0xff] %v6857_v7  ;;  %v6861_v43 = vpop.permute.xlu0 %2544 }
 0x3c1   : > { %2898 = vrot.lane.b32.xlu1 %v6799_v34, %s4815_s7  ;;  %8243 = vst [vmem:[#allocation24_spill] sm:$0xff] %v6861_v43  ;;  %v6883_v43 = vld [vmem:[#allocation2 + $0xf8] sm:$0xff] }
 0x3c2   : > { %2896 = vrot.lane.b32.xlu0 %v6803_v38, %s4815_s7 }
 0x3c5   : > { %2902 = vrot.lane.b32.xlu1 %v6811_v56, %s4815_s7 }
 0x3c6   : > { %2900 = vrot.lane.b32.xlu0 %v6815_v45, %s4815_s7 }
 0x3c7   : > { %v6869_v51 = vpop.permute.xlu1 %2550 }
 0x3c8   : > { %8244 = vst [vmem:[#allocation75_spill] sm:$0xff] %v6869_v51  ;;  %v6873_v18 = vpop.permute.xlu0 %2548 }
 0x3c9   : > { %2906 = vrot.lane.b32.xlu1 %v6823_v9, %s4815_s7  ;;  %8245 = vst [vmem:[#allocation22_spill] sm:$0xff] %v6873_v18  ;;  %v6895_v18 = vld [vmem:[#allocation2 + $0x110] sm:$0xff] }
 0x3ca   : > { %2904 = vrot.lane.b32.xlu0 %v6827_v25, %s4815_s7 }
 0x3cd   : > { %2910 = vrot.lane.b32.xlu1 %v6835_v1, %s4815_s7 }
 0x3ce   : > { %2908 = vrot.lane.b32.xlu0 %v6839_v19, %s4815_s7 }
 0x3cf   : > { %v6881_v7 = vpop.permute.xlu1 %2554 }
 0x3d0   : > { %8246 = vst [vmem:[#allocation96_spill] sm:$0xff] %v6881_v7  ;;  %v6885_v57 = vpop.permute.xlu0 %2552 }
 0x3d1   : > { %2914 = vrot.lane.b32.xlu1 %v6847_v20, %s4815_s7  ;;  %8247 = vst [vmem:[#allocation74_spill] sm:$0xff] %v6885_v57 }
 0x3d2   : > { %2912 = vrot.lane.b32.xlu0 %v6851_v11, %s4815_s7 }
 0x3d5   : > { %2918 = vrot.lane.b32.xlu1 %v6859_v30, %s4815_s7 }
 0x3d6   : > { %2916 = vrot.lane.b32.xlu0 %v6863_v0, %s4815_s7 }
 0x3d7   : > { %v6893_v51 = vpop.permute.xlu1 %2558 }
 0x3d8   : > { %8248 = vst [vmem:[#allocation8_spill] sm:$0xff] %v6893_v51  ;;  %v6897_v40 = vpop.permute.xlu0 %2556  ;;  %v3976_v51 = vld [vmem:[%s7834_s3] sm:$0xff] }
 0x3d9   : > { %2922 = vrot.lane.b32.xlu1 %v6871_v39, %s4815_s7  ;;  %8249 = vst [vmem:[#allocation95_spill] sm:$0xff] %v6897_v40  ;;  %v3977_v40 = vld [vmem:[%s7834_s3 + $0x8] sm:$0xff] }
 0x3da   : > { %2920 = vrot.lane.b32.xlu0 %v6875_v48, %s4815_s7  ;;  %v4742_v49 = vpack.c.bf16 %v3977_v40, %v3976_v51 }
 0x3dc   : > { %4743 = vmatprep.subr.bf16.mxu1 %v4742_v49 }
 0x3dd   : > { %2926 = vrot.lane.b32.xlu1 %v6883_v43, %s4815_s7  ;;  %4745 = vmatpush3.bf16.msra.mxu1 %v4742_v49  ;;  %v3980_v49 = vld [vmem:[%s7834_s3 + $0x20] sm:$0xf] }
 0x3de   : > { %2924 = vrot.lane.b32.xlu0 %v6887_v32, %s4815_s7 }
 0x3df   : > { %v6905_v7 = vpop.permute.xlu1 %2562 }
 0x3e0   : > { %8250 = vst [vmem:[#allocation53_spill] sm:$0xff] %v6905_v7  ;;  %v6907_v57 = vpop.permute.xlu0 %2560 }
 0x3e1   : > { %2930 = vrot.lane.b32.xlu1 %v6895_v18, %s4815_s7  ;;  %8251 = vst [vmem:[#allocation6_spill] sm:$0xff] %v6907_v57 }
 0x3e2   : > { %2928 = vrot.lane.b32.xlu0 %v6899_v26, %s4815_s7 }
 0x3e5   : > { %3082 = vrot.lane.b32.xlu1 %v6532_v17, %s4816_s8  ;;  %v3978_v17 = vld [vmem:[%s7834_s3 + $0x10] sm:$0xff] }
 0x3e6   : > { %3080 = vrot.lane.b32.xlu0 %v6537_v41, %s4816_s8  ;;  %v3979_v41 = vld [vmem:[%s7834_s3 + $0x18] sm:$0xff] }
 0x3e7   : > { %v6919_v14 = vpop.permute.xlu1 %2566  ;;  %v4746_v40 = vpack.c.bf16 %v3979_v41, %v3978_v17 }
 0x3e8   : > { %8252 = vst [vmem:[#allocation129_spill] sm:$0xff] %v6919_v14  ;;  %v6921_v7 = vpop.permute.xlu0 %2564 }
 0x3e9   : > { %8253 = vst [vmem:[#allocation51_spill] sm:$0xff] %v6921_v7  ;;  %3274 = vrot.lane.b32.xlu1 %v6671_v2, %s4817_s9  ;;  %4747 = vmatprep.subr.bf16.mxu1 %v4746_v40 }
 0x3ea   : > { %3272 = vrot.lane.b32.xlu0 %v6675_v4, %s4817_s9  ;;  %4749 = vmatpush3.bf16.msra.mxu1 %v4746_v40 }
 0x3eb   : > { %v6933_v14 = vpop.permute.xlu1 %2698  ;;  %4684 = vmatprep.subr.msk.mxu1 %vm2049_vm3, %v3980_v49 }
 0x3ec   : > { %v6935_v51 = vpop.permute.xlu0 %2696 }
 0x3ed   : > { %3466 = vrot.lane.b32.xlu1 %v6787_v60, %s4818_s10 }
 0x3ee   : > { %3464 = vrot.lane.b32.xlu0 %v6791_v31, %s4818_s10  ;;  %4685 = vmatpush3.msk.msra.mxu1 %vm2049_vm3, %v3980_v49 }
 0x3ef   : > { %v6941_v2 = vpop.permute.xlu1 %2702 }
 0x3f0   : > { %v6943_v4 = vpop.permute.xlu0 %2700 }
 0x3f1   : > { %3084 = vrot.lane.b32.xlu1 %v6548_v59, %s4816_s8 }
 0x3f2   : > { %3656 = vrot.lane.b32.xlu0 %v6548_v59, %s4819_s19 }
 0x3f3   : > { %v6954_v17 = vpop.permute.xlu1 %2706 }
 0x3f4   : > { %v6956_v41 = vpop.permute.xlu0 %2704 }
 0x3f5   : > { %3848 = vrot.lane.b32.xlu1 %v6683_v63, %s4820_s22 }
 0x3f6   : > { %3658 = vrot.lane.b32.xlu0 %v6543_v58, %s4819_s19 }
 0x3f7   : > { %v6962_v40 = vpop.permute.xlu1 %2710 }
 0x3f8   : > { %8254 = vst [vmem:[#allocation128_spill] sm:$0xff] %v6962_v40  ;;  %v6964_v7 = vpop.permute.xlu0 %2708 }
 0x3f9   : > { %3276 = vrot.lane.b32.xlu1 %v6683_v63, %s4817_s9 }
 0x3fa   : > { %3086 = vrot.lane.b32.xlu0 %v6543_v58, %s4816_s8 }
 0x3fb   : > { %v6970_v59 = vpop.permute.xlu1 %2714 }
 0x3fc   : > { %v6972_v49 = vpop.permute.xlu0 %2712 }
 0x3fd   : > { %3278 = vrot.lane.b32.xlu1 %v6679_v50, %s4817_s9 }
 0x3fe   : > { %3850 = vrot.lane.b32.xlu0 %v6679_v50, %s4820_s22 }
 0x3ff   : > { %v6978_v57 = vpop.permute.xlu1 %2718 }
 0x400   : > { %8255 = vst [vmem:[#allocation28_spill] sm:$0xff] %v6978_v57  ;;  %v6980_v40 = vpop.permute.xlu0 %2716 }
 0x401   : > { %8256 = vst [vmem:[#allocation77_spill] sm:$0xff] %v6980_v40  ;;  %3470 = vrot.lane.b32.xlu1 %v6799_v34, %s4818_s10 }
 0x402   : > { %3468 = vrot.lane.b32.xlu0 %v6803_v38, %s4818_s10 }
 0x403   : > { %v6986_v58 = vpop.permute.xlu1 %2722 }
 0x404   : > { %8257 = vst [vmem:[#allocation26_spill] sm:$0xff] %v6986_v58  ;;  %v6988_v63 = vpop.permute.xlu0 %2720 }
 0x405   : > { %8258 = vst [vmem:[#allocation98_spill] sm:$0xff] %v6988_v63  ;;  %3088 = vrot.lane.b32.xlu1 %v6559_v23, %s4816_s8 }
 0x406   : > { %3660 = vrot.lane.b32.xlu0 %v6559_v23, %s4819_s19 }
 0x407   : > { %v6994_v50 = vpop.permute.xlu1 %2726 }
 0x408   : > { %8259 = vst [vmem:[#allocation76_spill] sm:$0xff] %v6994_v50  ;;  %v6996_v57 = vpop.permute.xlu0 %2724 }
 0x409   : > { %8260 = vst [vmem:[#allocation13_spill] sm:$0xff] %v6996_v57  ;;  %3852 = vrot.lane.b32.xlu1 %v6691_v6, %s4820_s22 }
 0x40a   : > { %3662 = vrot.lane.b32.xlu0 %v6554_v5, %s4819_s19 }
 0x40b   : > { %v7002_v40 = vpop.permute.xlu1 %2730 }
 0x40c   : > { %8261 = vst [vmem:[#allocation97_spill] sm:$0xff] %v7002_v40  ;;  %v7004_v58 = vpop.permute.xlu0 %2728 }
 0x40d   : > { %8262 = vst [vmem:[#allocation57_spill] sm:$0xff] %v7004_v58  ;;  %3280 = vrot.lane.b32.xlu1 %v6691_v6, %s4817_s9 }
 0x40e   : > { %3090 = vrot.lane.b32.xlu0 %v6554_v5, %s4816_s8 }
 0x40f   : > { %v7010_v23 = vpop.permute.xlu1 %2734 }
 0x410   : > { %8263 = vst [vmem:[#allocation10_spill] sm:$0xff] %v7010_v23  ;;  %v7012_v50 = vpop.permute.xlu0 %2732 }
 0x411   : > { %8264 = vst [vmem:[#allocation131_spill] sm:$0xff] %v7012_v50  ;;  %3282 = vrot.lane.b32.xlu1 %v6687_v35, %s4817_s9  ;;  %v3026_v50 = vld [vmem:[#allocation2 + $0x91] sm:$0xff] }
 0x412   : > { %3854 = vrot.lane.b32.xlu0 %v6687_v35, %s4820_s22 }
 0x413   : > { %v7018_v57 = vpop.permute.xlu1 %2738 }
 0x414   : > { %8265 = vst [vmem:[#allocation55_spill] sm:$0xff] %v7018_v57  ;;  %v7020_v40 = vpop.permute.xlu0 %2736 }
 0x415   : > { %8266 = vst [vmem:[#allocation130_spill] sm:$0xff] %v7020_v40  ;;  %3474 = vrot.lane.b32.xlu1 %v6811_v56, %s4818_s10 }
 0x416   : > { %3472 = vrot.lane.b32.xlu0 %v6815_v45, %s4818_s10 }
 0x417   : > { %v7026_v5 = vpop.permute.xlu1 %2742 }
 0x418   : > { %8267 = vst [vmem:[#allocation32_spill] sm:$0xff] %v7026_v5  ;;  %v7028_v6 = vpop.permute.xlu0 %2740 }
 0x419   : > { %8268 = vst [vmem:[#allocation79_spill] sm:$0xff] %v7028_v6  ;;  %3092 = vrot.lane.b32.xlu1 %v6573_v28, %s4816_s8 }
 0x41a   : > { %3664 = vrot.lane.b32.xlu0 %v6573_v28, %s4819_s19 }
 0x41b   : > { %v7034_v35 = vpop.permute.xlu1 %2746 }
 0x41c   : > { %8269 = vst [vmem:[#allocation30_spill] sm:$0xff] %v7034_v35  ;;  %v7036_v57 = vpop.permute.xlu0 %2744 }
 0x41d   : > { %8270 = vst [vmem:[#allocation100_spill] sm:$0xff] %v7036_v57  ;;  %3856 = vrot.lane.b32.xlu1 %v6699_v53, %s4820_s22 }
 0x41e   : > { %3666 = vrot.lane.b32.xlu0 %v6568_v52, %s4819_s19 }
 0x41f   : > { %v7042_v40 = vpop.permute.xlu1 %2750 }
 0x420   : > { %8271 = vst [vmem:[#allocation78_spill] sm:$0xff] %v7042_v40  ;;  %v7044_v5 = vpop.permute.xlu0 %2748 }
 0x421   : > { %8272 = vst [vmem:[#allocation19_spill] sm:$0xff] %v7044_v5  ;;  %3284 = vrot.lane.b32.xlu1 %v6699_v53, %s4817_s9 }
 0x422   : > { %3094 = vrot.lane.b32.xlu0 %v6568_v52, %s4816_s8 }
 0x423   : > { %v7050_v28 = vpop.permute.xlu1 %2754 }
 0x424   : > { %8273 = vst [vmem:[#allocation99_spill] sm:$0xff] %v7050_v28  ;;  %v7052_v35 = vpop.permute.xlu0 %2752 }
 0x425   : > { %8274 = vst [vmem:[#allocation61_spill] sm:$0xff] %v7052_v35  ;;  %3286 = vrot.lane.b32.xlu1 %v6695_v46, %s4817_s9 }
 0x426   : > { %3858 = vrot.lane.b32.xlu0 %v6695_v46, %s4820_s22 }
 0x427   : > { %v7058_v57 = vpop.permute.xlu1 %2758 }
 0x428   : > { %8275 = vst [vmem:[#allocation16_spill] sm:$0xff] %v7058_v57  ;;  %v7060_v40 = vpop.permute.xlu0 %2756 }
 0x429   : > { %8276 = vst [vmem:[#allocation133_spill] sm:$0xff] %v7060_v40  ;;  %3478 = vrot.lane.b32.xlu1 %v6823_v9, %s4818_s10  ;;  %v3599_v40 = vld [vmem:[#allocation2 + $0x81] sm:$0xff] }
 0x42a   : > { %3476 = vrot.lane.b32.xlu0 %v6827_v25, %s4818_s10 }
 0x42b   : > { %v7066_v52 = vpop.permute.xlu1 %2890 }
 0x42c   : > { %v7068_v53 = vpop.permute.xlu0 %2888 }
 0x42d   : > { %3096 = vrot.lane.b32.xlu1 %v6584_v21, %s4816_s8 }
 0x42e   : > { %3668 = vrot.lane.b32.xlu0 %v6584_v21, %s4819_s19 }
 0x42f   : > { %v7074_v46 = vpop.permute.xlu1 %2894 }
 0x430   : > { %v7076_v57 = vpop.permute.xlu0 %2892 }
 0x431   : > { %3860 = vrot.lane.b32.xlu1 %v6707_v37, %s4820_s22 }
 0x432   : > { %3670 = vrot.lane.b32.xlu0 %v3599_v40, %s4819_s19 }
 0x433   : > { %v7081_v28 = vpop.permute.xlu1 %2898 }
 0x434   : > { %v7083_v35 = vpop.permute.xlu0 %2896 }
 0x435   : > { %3288 = vrot.lane.b32.xlu1 %v6707_v37, %s4817_s9 }
 0x436   : > { %3098 = vrot.lane.b32.xlu0 %v3599_v40, %s4816_s8 }
 0x437   : > { %v7088_v21 = vpop.permute.xlu1 %2902 }
 0x438   : > { %v7090_v5 = vpop.permute.xlu0 %2900 }
 0x439   : > { %3290 = vrot.lane.b32.xlu1 %v6703_v22, %s4817_s9 }
 0x43a   : > { %3862 = vrot.lane.b32.xlu0 %v6703_v22, %s4820_s22 }
 0x43b   : > { %v7096_v6 = vpop.permute.xlu1 %2906 }
 0x43c   : > { %v7098_v23 = vpop.permute.xlu0 %2904 }
 0x43d   : > { %3482 = vrot.lane.b32.xlu1 %v6835_v1, %s4818_s10  ;;  %v3601_v1 = vld [vmem:[#allocation2 + $0x99] sm:$0xff] }
 0x43e   : > { %3480 = vrot.lane.b32.xlu0 %v6839_v19, %s4818_s10 }
 0x43f   : > { %v7104_v37 = vpop.permute.xlu1 %2910 }
 0x440   : > { %8277 = vst [vmem:[#allocation59_spill] sm:$0xff] %v7104_v37  ;;  %v7106_v40 = vpop.permute.xlu0 %2908 }
 0x441   : > { %8278 = vst [vmem:[#allocation132_spill] sm:$0xff] %v7106_v40  ;;  %3100 = vrot.lane.b32.xlu1 %v3026_v50, %s4816_s8 }
 0x442   : > { %3672 = vrot.lane.b32.xlu0 %v3026_v50, %s4819_s19 }
 0x443   : > { %v7110_v22 = vpop.permute.xlu1 %2914 }
 0x444   : > { %8279 = vst [vmem:[#allocation36_spill] sm:$0xff] %v7110_v22  ;;  %v7112_v58 = vpop.permute.xlu0 %2912 }
 0x445   : > { %8280 = vst [vmem:[#allocation81_spill] sm:$0xff] %v7112_v58  ;;  %3864 = vrot.lane.b32.xlu1 %v6715_v13, %s4820_s22 }
 0x446   : > { %3674 = vrot.lane.b32.xlu0 %v3601_v1, %s4819_s19 }
 0x447   : > { %v7117_v63 = vpop.permute.xlu1 %2918 }
 0x448   : > { %8281 = vst [vmem:[#allocation34_spill] sm:$0xff] %v7117_v63  ;;  %v7119_v19 = vpop.permute.xlu0 %2916 }
 0x449   : > { %8282 = vst [vmem:[#allocation102_spill] sm:$0xff] %v7119_v19  ;;  %3292 = vrot.lane.b32.xlu1 %v6715_v13, %s4817_s9 }
 0x44a   : > { %3102 = vrot.lane.b32.xlu0 %v3601_v1, %s4816_s8 }
 0x44b   : > { %v7124_v50 = vpop.permute.xlu1 %2922 }
 0x44c   : > { %8283 = vst [vmem:[#allocation80_spill] sm:$0xff] %v7124_v50  ;;  %v7126_v22 = vpop.permute.xlu0 %2920  ;;  %v3028_v50 = vld [vmem:[#allocation2 + $0xa9] sm:$0xff] }
 0x44d   : > { %8284 = vst [vmem:[#allocation23_spill] sm:$0xff] %v7126_v22  ;;  %3294 = vrot.lane.b32.xlu1 %v6711_v16, %s4817_s9 }
 0x44e   : > { %3866 = vrot.lane.b32.xlu0 %v6711_v16, %s4820_s22 }
 0x44f   : > { %v7132_v58 = vpop.permute.xlu1 %2926 }
 0x450   : > { %8285 = vst [vmem:[#allocation101_spill] sm:$0xff] %v7132_v58  ;;  %v7134_v63 = vpop.permute.xlu0 %2924  ;;  %v3603_v58 = vld [vmem:[#allocation2 + $0xb1] sm:$0xff] }
 0x451   : > { %8286 = vst [vmem:[#allocation65_spill] sm:$0xff] %v7134_v63  ;;  %3486 = vrot.lane.b32.xlu1 %v6847_v20, %s4818_s10 }
 0x452   : > { %3484 = vrot.lane.b32.xlu0 %v6851_v11, %s4818_s10 }
 0x453   : > { %v7140_v13 = vpop.permute.xlu1 %2930 }
 0x454   : > { %8287 = vst [vmem:[#allocation21_spill] sm:$0xff] %v7140_v13  ;;  %v7142_v1 = vpop.permute.xlu0 %2928  ;;  %v2408_v13 = vld [vmem:[#allocation2] sm:$0xff] }
 0x455   : > { %8288 = vst [vmem:[#allocation135_spill] sm:$0xff] %v7142_v1  ;;  %3104 = vrot.lane.b32.xlu1 %v3028_v50, %s4816_s8 }
 0x456   : > { %3676 = vrot.lane.b32.xlu0 %v3028_v50, %s4819_s19  ;;  %v2600_v50 = vsel %vm253_vm0, %v2408_v13, %v6754_v42 }
 0x457   : > { %v3083_v16 = vpop.permute.xlu1 %3082  ;;  %v2792_v11 = vsel %vm748_vm4, %v2600_v50, %v6935_v51  ;;  %v2409_v51 = vld [vmem:[#allocation2 + $0x8] sm:$0xff] }
 0x458   : > { %v3081_v22 = vpop.permute.xlu0 %3080 }
 0x459   : > { %3868 = vrot.lane.b32.xlu1 %v6723_v33, %s4820_s22 }
 0x45a   : > { %3678 = vrot.lane.b32.xlu0 %v3603_v58, %s4819_s19 }
 0x45b   : > { %v3275_v63 = vpop.permute.xlu1 %3274 }
 0x45c   : > { %v3273_v20 = vpop.permute.xlu0 %3272 }
 0x45d   : > { %3296 = vrot.lane.b32.xlu1 %v6723_v33, %s4817_s9  ;;  %v2984_v33 = vsel %vm941_vm5, %v2792_v11, %v7068_v53  ;;  %v3030_v11 = vld [vmem:[#allocation2 + $0xc1] sm:$0xff] }
 0x45e   : > { %3106 = vrot.lane.b32.xlu0 %v3603_v58, %s4816_s8  ;;  %v3176_v58 = vsel %vm1134_vm6, %v2984_v33, %v3081_v22  ;;  %v3605_v33 = vld [vmem:[#allocation2 + $0xc9] sm:$0xff] }
 0x45f   : > { %v3467_v1 = vpop.permute.xlu1 %3466  ;;  %v3368_v40 = vsel %vm1327_vm7, %v3176_v58, %v3273_v20 }
 0x460   : > { %v3465_v19 = vpop.permute.xlu0 %3464 }
 0x461   : > { %3298 = vrot.lane.b32.xlu1 %v6719_v15, %s4817_s9  ;;  %v3560_v42 = vsel %vm1521_vm8, %v3368_v40, %v3465_v19 }
 0x462   : > { %3870 = vrot.lane.b32.xlu0 %v6719_v15, %s4820_s22 }
 0x463   : > { %v3085_v37 = vpop.permute.xlu1 %3084 }
 0x464   : > { %v3657_v9 = vpop.permute.xlu0 %3656 }
 0x465   : > { %3490 = vrot.lane.b32.xlu1 %v6859_v30, %s4818_s10  ;;  %v3752_v15 = vsel %vm1714_vm9, %v3560_v42, %v3657_v9  ;;  %v2601_v30 = vsel %vm253_vm0, %v2409_v51, %v6751_v8 }
 0x466   : > { %3488 = vrot.lane.b32.xlu0 %v6863_v0, %s4818_s10  ;;  %v2793_v19 = vsel %vm748_vm4, %v2601_v30, %v6933_v14  ;;  %v3032_v30 = vld [vmem:[#allocation2 + $0xd9] sm:$0xff] }
 0x467   : > { %v3849_v13 = vpop.permute.xlu1 %3848  ;;  %v2985_v9 = vsel %vm941_vm5, %v2793_v19, %v7066_v52 }
 0x468   : > { %v3659_v50 = vpop.permute.xlu0 %3658  ;;  %v3944_v53 = vsel %vm1907_vm10, %v3752_v15, %v3849_v13  ;;  %v3177_v22 = vsel %vm1134_vm6, %v2985_v9, %v3083_v16 }
 0x469   : > { %3108 = vrot.lane.b32.xlu1 %v3030_v11, %s4816_s8  ;;  %4686 = vmatprep.mubr.msk.f32.mxu1 %vm1952_vm11, %v3944_v53  ;;  %v3369_v58 = vsel %vm1327_vm7, %v3177_v22, %v3275_v63  ;;  %v2602_v63 = vsel %vm253_vm0, %v6779_v12, %v6761_v61  ;;  %v3607_v22 = vld [vmem:[#allocation2 + $0xe1] sm:$0xff] }
 0x46a   : > { %3680 = vrot.lane.b32.xlu0 %v3030_v11, %s4819_s19  ;;  %v3561_v8 = vsel %vm1521_vm8, %v3369_v58, %v3467_v1  ;;  %v2794_v1 = vsel %vm748_vm4, %v2602_v63, %v6943_v4  ;;  %v3034_v63 = vld [vmem:[#allocation2 + $0xf1] sm:$0xff] }
 0x46b   : > { %v3277_v20 = vpop.permute.xlu1 %3276  ;;  %v3753_v14 = vsel %vm1714_vm9, %v3561_v8, %v3659_v50 }
 0x46c   : > { %v3087_v40 = vpop.permute.xlu0 %3086 }
 0x46d   : > { %3872 = vrot.lane.b32.xlu1 %v6731_v62, %s4820_s22 }
 0x46e   : > { %3682 = vrot.lane.b32.xlu0 %v3605_v33, %s4819_s19 }
 0x46f   : > { %v3279_v42 = vpop.permute.xlu1 %3278 }
 0x470   : > { %v3851_v51 = vpop.permute.xlu0 %3850 }
 0x471   : > { %v3945_v15 = vsel %vm1907_vm10, %v3753_v14, %v3851_v51  ;;  %3300 = vrot.lane.b32.xlu1 %v6731_v62, %s4817_s9  ;;  %v2986_v62 = vsel %vm941_vm5, %v2794_v1, %v7076_v57 }
 0x472   : > { %3110 = vrot.lane.b32.xlu0 %v3605_v33, %s4816_s8  ;;  %4687 = vmatmul.mubr.msk.f32.vlgmr.msra.gmra.mrb[0].mxu1 %vm1952_vm11, %v3945_v15  ;;  %v3178_v50 = vsel %vm1134_vm6, %v2986_v62, %v3085_v37 }
 0x473   : > { %v3471_v52 = vpop.permute.xlu1 %3470  ;;  %v3370_v53 = vsel %vm1327_vm7, %v3178_v50, %v3277_v20 }
 0x474   : > { %v3469_v16 = vpop.permute.xlu0 %3468 }
 0x475   : > { %3302 = vrot.lane.b32.xlu1 %v6727_v55, %s4817_s9  ;;  %v3562_v61 = vsel %vm1521_vm8, %v3370_v53, %v3469_v16 }
 0x476   : > { %3874 = vrot.lane.b32.xlu0 %v6727_v55, %s4820_s22 }
 0x477   : > { %v3089_v13 = vpop.permute.xlu1 %3088 }
 0x478   : > { %v3661_v11 = vpop.permute.xlu0 %3660 }
 0x479   : > { %3494 = vrot.lane.b32.xlu1 %v6871_v39, %s4818_s10  ;;  %v3754_v12 = vsel %vm1714_vm9, %v3562_v61, %v3661_v11  ;;  %v2603_v39 = vsel %vm253_vm0, %v6775_v27, %v6759_v36  ;;  %v3609_v11 = vld [vmem:[#allocation2 + $0xf9] sm:$0xff] }
 0x47a   : > { %3492 = vrot.lane.b32.xlu0 %v6875_v48, %s4818_s10  ;;  %v2795_v48 = vsel %vm748_vm4, %v2603_v39, %v6941_v2 }
 0x47b   : > { %v3853_v55 = vpop.permute.xlu1 %3852  ;;  %v2987_v19 = vsel %vm941_vm5, %v2795_v48, %v7074_v46 }
 0x47c   : > { %v3946_v4 = vsel %vm1907_vm10, %v3754_v12, %v3853_v55  ;;  %v3663_v57 = vpop.permute.xlu0 %3662  ;;  %v3179_v9 = vsel %vm1134_vm6, %v2987_v19, %v3087_v40  ;;  %v3036_v19 = vld [vmem:[#allocation2 + $0x109] sm:$0xff] }
 0x47d   : > { %3112 = vrot.lane.b32.xlu1 %v3032_v30, %s4816_s8  ;;  %4689 = vmatprep.mubr.msk.f32.mxu1 %vm1952_vm11, %v3946_v4  ;;  %v3371_v33 = vsel %vm1327_vm7, %v3179_v9, %v3279_v42  ;;  %v2604_v42 = vsel %vm253_vm0, %v6791_v31, %v6768_v24  ;;  %v2606_v4 = vsel %vm253_vm0, %v6803_v38, %v6777_v44  ;;  %v8290_v9 = vld [vmem:[#allocation128_spill] sm:$0xff] }
 0x47e   : > { %3684 = vrot.lane.b32.xlu0 %v3032_v30, %s4819_s19  ;;  %v3563_v36 = vsel %vm1521_vm8, %v3371_v33, %v3471_v52  ;;  %v2796_v14 = vsel %vm748_vm4, %v2604_v42, %v6956_v41 }
 0x47f   : > { %v3281_v37 = vpop.permute.xlu1 %3280  ;;  %v3755_v2 = vsel %vm1714_vm9, %v3563_v36, %v3663_v57  ;;  %v2798_v57 = vsel %vm748_vm4, %v2606_v4, %v6964_v7 }
 0x480   : > { %v3091_v20 = vpop.permute.xlu0 %3090 }
 0x481   : > { %3876 = vrot.lane.b32.xlu1 %v6739_v54, %s4820_s22 }
 0x482   : > { %3686 = vrot.lane.b32.xlu0 %v3607_v22, %s4819_s19 }
 0x483   : > { %v3283_v27 = vpop.permute.xlu1 %3282 }
 0x484   : > { %v3855_v58 = vpop.permute.xlu0 %3854 }
 0x485   : > { %v3947_v8 = vsel %vm1907_vm10, %v3755_v2, %v3855_v58  ;;  %3304 = vrot.lane.b32.xlu1 %v6739_v54, %s4817_s9  ;;  %v2988_v54 = vsel %vm941_vm5, %v2796_v14, %v7083_v35  ;;  %v3611_v58 = vld [vmem:[#allocation2 + $0x111] sm:$0xff] }
 0x486   : > { %3114 = vrot.lane.b32.xlu0 %v3607_v22, %s4816_s8  ;;  %4690 = vmatmul.mubr.msk.f32.gmra.mrb[2].mxu1 %vm1952_vm11, %v3947_v8  ;;  %v3180_v15 = vsel %vm1134_vm6, %v2988_v54, %v3089_v13 }
 0x487   : > { %v3475_v46 = vpop.permute.xlu1 %3474  ;;  %v3372_v16 = vsel %vm1327_vm7, %v3180_v15, %v3281_v37  ;;  %v8291_v15 = vld [vmem:[#allocation5_spill] sm:$0xff] }
 0x488   : > { %v3473_v40 = vpop.permute.xlu0 %3472 }
 0x489   : > { %3306 = vrot.lane.b32.xlu1 %v6735_v47, %s4817_s9  ;;  %v3564_v24 = vsel %vm1521_vm8, %v3372_v16, %v3473_v40 }
 0x48a   : > { %3878 = vrot.lane.b32.xlu0 %v6735_v47, %s4820_s22 }
 0x48b   : > { %v3093_v51 = vpop.permute.xlu1 %3092 }
 0x48c   : > { %v3665_v52 = vpop.permute.xlu0 %3664 }
 0x48d   : > { %3498 = vrot.lane.b32.xlu1 %v6883_v43, %s4818_s10  ;;  %v3756_v31 = vsel %vm1714_vm9, %v3564_v24, %v3665_v52  ;;  %v2605_v43 = vsel %vm253_vm0, %v6787_v60, %v6765_v3  ;;  %v2608_v52 = vsel %vm253_vm0, %v6815_v45, %v8291_v15 }
 0x48e   : > { %3496 = vrot.lane.b32.xlu0 %v6887_v32, %s4818_s10  ;;  %v2797_v32 = vsel %vm748_vm4, %v2605_v43, %v6954_v17  ;;  %v2800_v16 = vsel %vm748_vm4, %v2608_v52, %v6972_v49 }
 0x48f   : > { %v3857_v47 = vpop.permute.xlu1 %3856  ;;  %v2989_v62 = vsel %vm941_vm5, %v2797_v32, %v7081_v28  ;;  %v2992_v24 = vsel %vm941_vm5, %v2800_v16, %v7098_v23 }
 0x490   : > { %v3948_v41 = vsel %vm1907_vm10, %v3756_v31, %v3857_v47  ;;  %v3667_v35 = vpop.permute.xlu0 %3666  ;;  %v3181_v50 = vsel %vm1134_vm6, %v2989_v62, %v3091_v20  ;;  %v8289_v20 = vld [vmem:[#allocation4_spill] sm:$0xff]  ;;  %v7325_v47 = vld [vmem:[#allocation2 + $0x120] sm:$0xff]  ;;  %v7336_v62 = vld [vmem:[#allocation2 + $0x128] sm:$0xff] }
 0x491   : > { %3116 = vrot.lane.b32.xlu1 %v3034_v63, %s4816_s8  ;;  %4692 = vmatprep.mubr.msk.f32.mxu1 %vm1952_vm11, %v3948_v41  ;;  %v3373_v53 = vsel %vm1327_vm7, %v3181_v50, %v3283_v27  ;;  %v3802_v27 = vld [vmem:[#allocation2 + $0x10a] sm:$0xff] }
 0x492   : > { %3688 = vrot.lane.b32.xlu0 %v3034_v63, %s4819_s19  ;;  %v3565_v3 = vsel %vm1521_vm8, %v3373_v53, %v3475_v46 }
 0x493   : > { %v3285_v1 = vpop.permute.xlu1 %3284  ;;  %v3757_v17 = vsel %vm1714_vm9, %v3565_v3, %v3667_v35 }
 0x494   : > { %v3095_v13 = vpop.permute.xlu0 %3094 }
 0x495   : > { %3880 = vrot.lane.b32.xlu1 %v6747_v29, %s4820_s22 }
 0x496   : > { %3690 = vrot.lane.b32.xlu0 %v3609_v11, %s4819_s19 }
 0x497   : > { %v3287_v60 = vpop.permute.xlu1 %3286 }
 0x498   : > { %v3859_v61 = vpop.permute.xlu0 %3858 }
 0x499   : > { %v3949_v12 = vsel %vm1907_vm10, %v3757_v17, %v3859_v61  ;;  %3308 = vrot.lane.b32.xlu1 %v6747_v29, %s4817_s9  ;;  %v2990_v29 = vsel %vm941_vm5, %v2798_v57, %v7090_v5 }
 0x49a   : > { %3118 = vrot.lane.b32.xlu0 %v3609_v11, %s4816_s8  ;;  %4693 = vmatmul.mubr.msk.f32.gmra.mrb[4].mxu1 %vm1952_vm11, %v3949_v12  ;;  %v3182_v39 = vsel %vm1134_vm6, %v2990_v29, %v3093_v51  ;;  %v3229_v51 = vld [vmem:[#allocation2 + $0x112] sm:$0xff] }
 0x49b   : > { %v3479_v28 = vpop.permute.xlu1 %3478  ;;  %v3374_v37 = vsel %vm1327_vm7, %v3182_v39, %v3285_v1  ;;  %v3612_v1 = vld [vmem:[#allocation2 + $0x121] sm:$0xff] }
 0x49c   : > { %v3477_v55 = vpop.permute.xlu0 %3476 }
 0x49d   : > { %3310 = vrot.lane.b32.xlu1 %v6743_v10, %s4817_s9  ;;  %v3566_v44 = vsel %vm1521_vm8, %v3374_v37, %v3477_v55  ;;  %v3804_v55 = vld [vmem:[#allocation2 + $0x122] sm:$0xff] }
 0x49e   : > { %3882 = vrot.lane.b32.xlu0 %v6743_v10, %s4820_s22 }
 0x49f   : > { %v3097_v30 = vpop.permute.xlu1 %3096 }
 0x4a0   : > { %v3669_v48 = vpop.permute.xlu0 %3668  ;;  %v3184_v41 = vsel %vm1134_vm6, %v2992_v24, %v3097_v30  ;;  %v8293_v30 = vld [vmem:[#allocation67_spill] sm:$0xff] }
 0x4a1   : > { %3502 = vrot.lane.b32.xlu1 %v6895_v18, %s4818_s10  ;;  %v3758_v38 = vsel %vm1714_vm9, %v3566_v44, %v3669_v48  ;;  %v2607_v18 = vsel %vm253_vm0, %v6799_v34, %v8289_v20  ;;  %v2610_v39 = vsel %vm253_vm0, %v6827_v25, %v8293_v30  ;;  %v8294_v48 = vld [vmem:[#allocation77_spill] sm:$0xff]  ;;  %v8295_v44 = vld [vmem:[#allocation132_spill] sm:$0xff] }
 0x4a2   : > { %3500 = vrot.lane.b32.xlu0 %v6899_v26, %s4818_s10  ;;  %v2799_v26 = vsel %vm748_vm4, %v2607_v18, %v8290_v9  ;;  %v2802_v37 = vsel %vm748_vm4, %v2610_v39, %v8294_v48  ;;  %v8307_v48 = vld [vmem:[#allocation36_spill] sm:$0xff] }
 0x4a3   : > { %v3861_v10 = vpop.permute.xlu1 %3860  ;;  %v2991_v33 = vsel %vm941_vm5, %v2799_v26, %v7088_v21  ;;  %v7375_v26 = vld [vmem:[#allocation2 + $0x138] sm:$0xff] }
 0x4a4   : > { %v3950_v7 = vsel %vm1907_vm10, %v3758_v38, %v3861_v10  ;;  %v3671_v5 = vpop.permute.xlu0 %3670  ;;  %v3183_v2 = vsel %vm1134_vm6, %v2991_v33, %v3095_v13  ;;  %v8292_v13 = vld [vmem:[#allocation62_spill] sm:$0xff]  ;;  %v2994_v38 = vsel %vm941_vm5, %v2802_v37, %v8295_v44 }
 0x4a5   : > { %3120 = vrot.lane.b32.xlu1 %v3036_v19, %s4816_s8  ;;  %4695 = vmatprep.mubr.msk.f32.mxu1 %vm1952_vm11, %v3950_v7  ;;  %v3375_v8 = vsel %vm1327_vm7, %v3183_v2, %v3287_v60  ;;  %v2609_v50 = vsel %vm253_vm0, %v6811_v56, %v8292_v13  ;;  %v8297_v2 = vld [vmem:[#allocation70_spill] sm:$0xff] }
 0x4a6   : > { %3692 = vrot.lane.b32.xlu0 %v3036_v19, %s4819_s19  ;;  %v3567_v34 = vsel %vm1521_vm8, %v3375_v8, %v3479_v28  ;;  %v2801_v11 = vsel %vm748_vm4, %v2609_v50, %v6970_v59  ;;  %v3231_v19 = vld [vmem:[#allocation2 + $0x12a] sm:$0xff]  ;;  %v8303_v50 = vld [vmem:[#allocation81_spill] sm:$0xff] }
 0x4a7   : > { %v3289_v22 = vpop.permute.xlu1 %3288  ;;  %v3759_v40 = vsel %vm1714_vm9, %v3567_v34, %v3671_v5  ;;  %v2993_v3 = vsel %vm941_vm5, %v2801_v11, %v7096_v6  ;;  %v3613_v6 = vld [vmem:[#allocation2 + $0x129] sm:$0xff] }
 0x4a8   : > { %v3099_v36 = vpop.permute.xlu0 %3098  ;;  %v3376_v63 = vsel %vm1327_vm7, %v3184_v41, %v3289_v22  ;;  %v8298_v8 = vld [vmem:[#allocation28_spill] sm:$0xff] }
 0x4a9   : > { %3884 = vrot.lane.b32.xlu1 %v3802_v27, %s4820_s22  ;;  %v3185_v17 = vsel %vm1134_vm6, %v2993_v3, %v3099_v36  ;;  %v3422_v36 = vld [vmem:[#allocation2 + $0x138] sm:$0xff] }
 0x4aa   : > { %3694 = vrot.lane.b32.xlu0 %v3611_v58, %s4819_s19 }
 0x4ab   : > { %v3291_v46 = vpop.permute.xlu1 %3290 }
 0x4ac   : > { %v3863_v42 = vpop.permute.xlu0 %3862  ;;  %v3377_v61 = vsel %vm1327_vm7, %v3185_v17, %v3291_v46 }
 0x4ad   : > { %v3951_v14 = vsel %vm1907_vm10, %v3759_v40, %v3863_v42  ;;  %3312 = vrot.lane.b32.xlu1 %v3802_v27, %s4817_s9  ;;  %v8296_v27 = vld [vmem:[#allocation7_spill] sm:$0xff] }
 0x4ae   : > { %3122 = vrot.lane.b32.xlu0 %v3611_v58, %s4816_s8  ;;  %4696 = vmatmul.mubr.msk.f32.gmra.mrb[6].mxu1 %vm1952_vm11, %v3951_v14  ;;  %v2611_v58 = vsel %vm253_vm0, %v8297_v2, %v8296_v27  ;;  %v8299_v40 = vld [vmem:[#allocation59_spill] sm:$0xff]  ;;  %v8308_v27 = vld [vmem:[#allocation69_spill] sm:$0xff]  ;;  %v8309_v2 = vld [vmem:[#allocation20_spill] sm:$0xff] }
 0x4af   : > { %v3483_v21 = vpop.permute.xlu1 %3482  ;;  %v2803_v34 = vsel %vm748_vm4, %v2611_v58, %v8298_v8  ;;  %v2614_v58 = vsel %vm253_vm0, %v8309_v2, %v8308_v27  ;;  %v8310_v8 = vld [vmem:[#allocation13_spill] sm:$0xff] }
 0x4b0   : > { %v3481_v54 = vpop.permute.xlu0 %3480  ;;  %v3569_v56 = vsel %vm1521_vm8, %v3377_v61, %v3483_v21  ;;  %v2995_v42 = vsel %vm941_vm5, %v2803_v34, %v8299_v40  ;;  %v3614_v21 = vld [vmem:[#allocation2 + $0x139] sm:$0xff]  ;;  %v2806_v34 = vsel %vm748_vm4, %v2614_v58, %v8310_v8  ;;  %v8321_v58 = vld [vmem:[#allocation80_spill] sm:$0xff] }
 0x4b1   : > { %3314 = vrot.lane.b32.xlu1 %v3229_v51, %s4817_s9  ;;  %v3568_v45 = vsel %vm1521_vm8, %v3376_v63, %v3481_v54 }
 0x4b2   : > { %3886 = vrot.lane.b32.xlu0 %v3229_v51, %s4820_s22  ;;  %v3423_v51 = vld [vmem:[#allocation2 + $0x140] sm:$0xff] }
 0x4b3   : > { %v3101_v31 = vpop.permute.xlu1 %3100 }
 0x4b4   : > { %v3673_v35 = vpop.permute.xlu0 %3672  ;;  %v3186_v7 = vsel %vm1134_vm6, %v2994_v38, %v3101_v31  ;;  %v2850_v38 = vld [vmem:[#allocation2 + $0x150] sm:$0xff] }
 0x4b5   : > { %2932 = vrot.lane.b32.xlu1 %v7325_v47, %s4815_s7  ;;  %v3760_v49 = vsel %vm1714_vm9, %v3568_v45, %v3673_v35  ;;  %v3806_v45 = vld [vmem:[#allocation2 + $0x13a] sm:$0xff] }
 0x4b6   : > { %3504 = vrot.lane.b32.xlu0 %v7325_v47, %s4818_s10 }
 0x4b7   : > { %v3865_v43 = vpop.permute.xlu1 %3864 }
 0x4b8   : > { %v3952_v23 = vsel %vm1907_vm10, %v3760_v49, %v3865_v43  ;;  %v3675_v32 = vpop.permute.xlu0 %3674  ;;  %v8300_v49 = vld [vmem:[#allocation11_spill] sm:$0xff] }
 0x4b9   : > { %3696 = vrot.lane.b32.xlu1 %v3612_v1, %s4819_s19  ;;  %4698 = vmatprep.mubr.msk.f32.mxu1 %vm1952_vm11, %v3952_v23  ;;  %v3761_v28 = vsel %vm1714_vm9, %v3569_v56, %v3675_v32  ;;  %v8301_v43 = vld [vmem:[#allocation71_spill] sm:$0xff] }
 0x4ba   : > { %3506 = vrot.lane.b32.xlu0 %v7336_v62, %s4818_s10  ;;  %v2612_v23 = vsel %vm253_vm0, %v8301_v43, %v8300_v49  ;;  %v3615_v32 = vld [vmem:[#allocation2 + $0x141] sm:$0xff]  ;;  %v8314_v49 = vld [vmem:[#allocation76_spill] sm:$0xff] }
 0x4bb   : > { %v3293_v53 = vpop.permute.xlu1 %3292 }
 0x4bc   : > { %v3103_v60 = vpop.permute.xlu0 %3102  ;;  %v3378_v20 = vsel %vm1327_vm7, %v3186_v7, %v3293_v53 }
 0x4bd   : > { %3124 = vrot.lane.b32.xlu1 %v3612_v1, %s4816_s8  ;;  %v3187_v54 = vsel %vm1134_vm6, %v2995_v42, %v3103_v60  ;;  %v8302_v1 = vld [vmem:[#allocation98_spill] sm:$0xff] }
 0x4be   : > { %2934 = vrot.lane.b32.xlu0 %v7336_v62, %s4815_s7  ;;  %v2804_v13 = vsel %vm748_vm4, %v2612_v23, %v8302_v1 }
 0x4bf   : > { %v3295_v12 = vpop.permute.xlu1 %3294  ;;  %v2996_v11 = vsel %vm941_vm5, %v2804_v13, %v8303_v50  ;;  %v3235_v50 = vld [vmem:[#allocation2 + $0x15a] sm:$0xff] }
 0x4c0   : > { %v3867_v59 = vpop.permute.xlu0 %3866  ;;  %v3379_v15 = vsel %vm1327_vm7, %v3187_v54, %v3295_v12  ;;  %v3808_v54 = vld [vmem:[#allocation2 + $0x152] sm:$0xff] }
 0x4c1   : > { %v3953_v4 = vsel %vm1907_vm10, %v3761_v28, %v3867_v59  ;;  %3888 = vrot.lane.b32.xlu1 %v3804_v55, %s4820_s22 }
 0x4c2   : > { %3698 = vrot.lane.b32.xlu0 %v3613_v6, %s4819_s19  ;;  %4699 = vmatmul.mubr.msk.f32.gmra.mrb[8].mxu1 %vm1952_vm11, %v3953_v4  ;;  %v8304_v4 = vld [vmem:[#allocation66_spill] sm:$0xff] }
 0x4c3   : > { %v3487_v57 = vpop.permute.xlu1 %3486 }
 0x4c4   : > { %v3485_v29 = vpop.permute.xlu0 %3484  ;;  %v3571_v52 = vsel %vm1521_vm8, %v3379_v15, %v3487_v57  ;;  %v3617_v15 = vld [vmem:[#allocation2 + $0x159] sm:$0xff] }
 0x4c5   : > { %3316 = vrot.lane.b32.xlu1 %v3804_v55, %s4817_s9  ;;  %v3570_v25 = vsel %vm1521_vm8, %v3378_v20, %v3485_v29  ;;  %v3233_v55 = vld [vmem:[#allocation2 + $0x142] sm:$0xff] }
 0x4c6   : > { %3126 = vrot.lane.b32.xlu0 %v3613_v6, %s4816_s8  ;;  %v8305_v6 = vld [vmem:[#allocation72_spill] sm:$0xff]  ;;  %v8306_v29 = vld [vmem:[#allocation26_spill] sm:$0xff] }
 0x4c7   : > { %v3105_v10 = vpop.permute.xlu1 %3104  ;;  %v2613_v57 = vsel %vm253_vm0, %v8305_v6, %v8304_v4  ;;  %v8316_v4 = vld [vmem:[#allocation12_spill] sm:$0xff] }
 0x4c8   : > { %v3677_v5 = vpop.permute.xlu0 %3676  ;;  %v3188_v3 = vsel %vm1134_vm6, %v2996_v11, %v3105_v10  ;;  %v2805_v30 = vsel %vm748_vm4, %v2613_v57, %v8306_v29  ;;  %v2616_v6 = vsel %vm253_vm0, %v6863_v0, %v8316_v4  ;;  %v3427_v57 = vld [vmem:[#allocation2 + $0x170] sm:$0xff]  ;;  %v8317_v29 = vld [vmem:[#allocation57_spill] sm:$0xff] }
 0x4c9   : > { %3318 = vrot.lane.b32.xlu1 %v3231_v19, %s4817_s9  ;;  %v3762_v18 = vsel %vm1714_vm9, %v3570_v25, %v3677_v5  ;;  %v2997_v37 = vsel %vm941_vm5, %v2805_v30, %v8307_v48  ;;  %v2808_v30 = vsel %vm748_vm4, %v2616_v6, %v8317_v29  ;;  %v8327_v6 = vld [vmem:[#allocation101_spill] sm:$0xff] }
 0x4ca   : > { %3890 = vrot.lane.b32.xlu0 %v3231_v19, %s4820_s22 }
 0x4cb   : > { %v3869_v9 = vpop.permute.xlu1 %3868 }
 0x4cc   : > { %v3954_v22 = vsel %vm1907_vm10, %v3762_v18, %v3869_v9  ;;  %v3679_v33 = vpop.permute.xlu0 %3678  ;;  %v3616_v18 = vld [vmem:[#allocation2 + $0x151] sm:$0xff] }
 0x4cd   : > { %2936 = vrot.lane.b32.xlu1 %v7375_v26, %s4815_s7  ;;  %4701 = vmatprep.mubr.msk.f32.mxu1 %vm1952_vm11, %v3954_v22  ;;  %v3763_v24 = vsel %vm1714_vm9, %v3571_v52, %v3679_v33  ;;  %v3425_v22 = vld [vmem:[#allocation2 + $0x158] sm:$0xff] }
 0x4ce   : > { %3508 = vrot.lane.b32.xlu0 %v3422_v36, %s4818_s10 }
 0x4cf   : > { %v3297_v46 = vpop.permute.xlu1 %3296 }
 0x4d0   : > { %v3107_v14 = vpop.permute.xlu0 %3106  ;;  %v3380_v17 = vsel %vm1327_vm7, %v3188_v3, %v3297_v46  ;;  %v8311_v46 = vld [vmem:[#allocation102_spill] sm:$0xff] }
 0x4d1   : > { %3700 = vrot.lane.b32.xlu1 %v3614_v21, %s4819_s19  ;;  %v3189_v10 = vsel %vm1134_vm6, %v2997_v37, %v3107_v14  ;;  %v2998_v40 = vsel %vm941_vm5, %v2806_v34, %v8311_v46 }
 0x4d2   : > { %3510 = vrot.lane.b32.xlu0 %v3423_v51, %s4818_s10 }
 0x4d3   : > { %v3299_v16 = vpop.permute.xlu1 %3298 }
 0x4d4   : > { %v3871_v31 = vpop.permute.xlu0 %3870  ;;  %v3381_v7 = vsel %vm1327_vm7, %v3189_v10, %v3299_v16 }
 0x4d5   : > { %v3955_v41 = vsel %vm1907_vm10, %v3763_v24, %v3871_v31  ;;  %3128 = vrot.lane.b32.xlu1 %v3614_v21, %s4816_s8 }
 0x4d6   : > { %2938 = vrot.lane.b32.xlu0 %v3423_v51, %s4815_s7  ;;  %4702 = vmatmul.mubr.msk.f32.gmra.mrb[10].mxu1 %vm1952_vm11, %v3955_v41 }
 0x4d7   : > { %v3491_v35 = vpop.permute.xlu1 %3490 }
 0x4d8   : > { %v3489_v63 = vpop.permute.xlu0 %3488  ;;  %v3573_v5 = vsel %vm1521_vm8, %v3381_v7, %v3491_v35  ;;  %v8312_v35 = vld [vmem:[#allocation9_spill] sm:$0xff] }
 0x4d9   : > { %3892 = vrot.lane.b32.xlu1 %v3806_v45, %s4820_s22  ;;  %v3572_v61 = vsel %vm1521_vm8, %v3380_v17, %v3489_v63  ;;  %v8313_v63 = vld [vmem:[#allocation15_spill] sm:$0xff] }
 0x4da   : > { %3702 = vrot.lane.b32.xlu0 %v3615_v32, %s4819_s19 }
 0x4db   : > { %v3109_v53 = vpop.permute.xlu1 %3108 }
 0x4dc   : > { %v3681_v60 = vpop.permute.xlu0 %3680  ;;  %v3190_v14 = vsel %vm1134_vm6, %v2998_v40, %v3109_v53 }
 0x4dd   : > { %3320 = vrot.lane.b32.xlu1 %v3806_v45, %s4817_s9  ;;  %v3764_v56 = vsel %vm1714_vm9, %v3572_v61, %v3681_v60  ;;  %v2615_v45 = vsel %vm253_vm0, %v8313_v63, %v8312_v35  ;;  %v8323_v63 = vld [vmem:[#allocation131_spill] sm:$0xff] }
 0x4de   : > { %3130 = vrot.lane.b32.xlu0 %v3615_v32, %s4816_s8  ;;  %v2807_v43 = vsel %vm748_vm4, %v2615_v45, %v8314_v49  ;;  %v8315_v32 = vld [vmem:[#allocation34_spill] sm:$0xff]  ;;  %v8324_v49 = vld [vmem:[#allocation65_spill] sm:$0xff] }
 0x4df   : > { %v3873_v12 = vpop.permute.xlu1 %3872  ;;  %v2999_v1 = vsel %vm941_vm5, %v2807_v43, %v8315_v32 }
 0x4e0   : > { %v3956_v28 = vsel %vm1907_vm10, %v3764_v56, %v3873_v12  ;;  %v3683_v59 = vpop.permute.xlu0 %3682  ;;  %v2852_v56 = vld [vmem:[#allocation2 + $0x168] sm:$0xff] }
 0x4e1   : > { %3322 = vrot.lane.b32.xlu1 %v3233_v55, %s4817_s9  ;;  %4704 = vmatprep.mubr.msk.f32.mxu1 %vm1952_vm11, %v3956_v28  ;;  %v3765_v20 = vsel %vm1714_vm9, %v3573_v5, %v3683_v59 }
 0x4e2   : > { %3894 = vrot.lane.b32.xlu0 %v3233_v55, %s4820_s22  ;;  %v3618_v55 = vld [vmem:[#allocation2 + $0x169] sm:$0xff] }
 0x4e3   : > { %v3301_v39 = vpop.permute.xlu1 %3300 }
 0x4e4   : > { %v3111_v44 = vpop.permute.xlu0 %3110  ;;  %v3382_v51 = vsel %vm1327_vm7, %v3190_v14, %v3301_v39  ;;  %v8318_v39 = vld [vmem:[#allocation23_spill] sm:$0xff] }
 0x4e5   : > { %2940 = vrot.lane.b32.xlu1 %v2850_v38, %s4815_s7  ;;  %v3191_v11 = vsel %vm1134_vm6, %v2999_v1, %v3111_v44  ;;  %v3000_v48 = vsel %vm941_vm5, %v2808_v30, %v8318_v39  ;;  %v3812_v30 = vld [vmem:[#allocation2 + $0x182] sm:$0xff] }
 0x4e6   : > { %3512 = vrot.lane.b32.xlu0 %v2850_v38, %s4818_s10 }
 0x4e7   : > { %v3303_v19 = vpop.permute.xlu1 %3302 }
 0x4e8   : > { %v3875_v25 = vpop.permute.xlu0 %3874  ;;  %v3383_v53 = vsel %vm1327_vm7, %v3191_v11, %v3303_v19  ;;  %v3429_v11 = vld [vmem:[#allocation2 + $0x188] sm:$0xff] }
 0x4e9   : > { %v3957_v9 = vsel %vm1907_vm10, %v3765_v20, %v3875_v25  ;;  %3704 = vrot.lane.b32.xlu1 %v3616_v18, %s4819_s19  ;;  %v3810_v25 = vld [vmem:[#allocation2 + $0x16a] sm:$0xff] }
 0x4ea   : > { %3514 = vrot.lane.b32.xlu0 %v3425_v22, %s4818_s10  ;;  %4705 = vmatmul.mubr.msk.f32.gmra.mrb[12].mxu1 %vm1952_vm11, %v3957_v9  ;;  %v4797_v9 = vld [vmem:[#allocation2 + $0xc8] sm:$0xff] }
 0x4eb   : > { %v3495_v33 = vpop.permute.xlu1 %3494 }
 0x4ec   : > { %v3493_v36 = vpop.permute.xlu0 %3492  ;;  %v3575_v3 = vsel %vm1521_vm8, %v3383_v53, %v3495_v33 }
 0x4ed   : > { %3132 = vrot.lane.b32.xlu1 %v3616_v18, %s4816_s8  ;;  %v3574_v52 = vsel %vm1521_vm8, %v3382_v51, %v3493_v36  ;;  %v3619_v18 = vld [vmem:[#allocation2 + $0x171] sm:$0xff] }
 0x4ee   : > { %2942 = vrot.lane.b32.xlu0 %v3425_v22, %s4815_s7  ;;  %v8319_v22 = vld [vmem:[#allocation14_spill] sm:$0xff]  ;;  %v8320_v36 = vld [vmem:[#allocation97_spill] sm:$0xff] }
 0x4ef   : > { %v3113_v42 = vpop.permute.xlu1 %3112  ;;  %v2617_v33 = vsel %vm253_vm0, %v4797_v9, %v8319_v22  ;;  %v3237_v51 = vld [vmem:[#allocation2 + $0x172] sm:$0xff] }
 0x4f0   : > { %v3685_v21 = vpop.permute.xlu0 %3684  ;;  %v3192_v44 = vsel %vm1134_vm6, %v3000_v48, %v3113_v42  ;;  %v2809_v27 = vsel %vm748_vm4, %v2617_v33, %v8320_v36  ;;  %v3621_v48 = vld [vmem:[#allocation2 + $0x189] sm:$0xff]  ;;  %v3430_v9 = vld [vmem:[#allocation2 + $0x198] sm:$0xff] }
 0x4f1   : > { %3896 = vrot.lane.b32.xlu1 %v3808_v54, %s4820_s22  ;;  %v3766_v16 = vsel %vm1714_vm9, %v3574_v52, %v3685_v21  ;;  %v3001_v8 = vsel %vm941_vm5, %v2809_v27, %v8321_v58  ;;  %v4800_v33 = vld [vmem:[#allocation2 + $0xf0] sm:$0xff] }
 0x4f2   : > { %3706 = vrot.lane.b32.xlu0 %v3617_v15, %s4819_s19  ;;  %v8328_v36 = vld [vmem:[#allocation24_spill] sm:$0xff] }
 0x4f3   : > { %v3877_v24 = vpop.permute.xlu1 %3876  ;;  %v2620_v27 = vsel %vm253_vm0, %v4800_v33, %v8328_v36 }
 0x4f4   : > { %v3958_v31 = vsel %vm1907_vm10, %v3766_v16, %v3877_v24  ;;  %v3687_v41 = vpop.permute.xlu0 %3686  ;;  %v2854_v24 = vld [vmem:[#allocation2 + $0x180] sm:$0xff] }
 0x4f5   : > { %3324 = vrot.lane.b32.xlu1 %v3808_v54, %s4817_s9  ;;  %4707 = vmatprep.mubr.msk.f32.mxu1 %vm1952_vm11, %v3958_v31  ;;  %v3767_v17 = vsel %vm1714_vm9, %v3575_v3, %v3687_v41  ;;  %v4798_v31 = vld [vmem:[#allocation2 + $0xd8] sm:$0xff] }
 0x4f6   : > { %3134 = vrot.lane.b32.xlu0 %v3617_v15, %s4816_s8  ;;  %v8322_v41 = vld [vmem:[#allocation73_spill] sm:$0xff] }
 0x4f7   : > { %v3305_v23 = vpop.permute.xlu1 %3304  ;;  %v2618_v35 = vsel %vm253_vm0, %v4798_v31, %v8322_v41 }
 0x4f8   : > { %v3115_v13 = vpop.permute.xlu0 %3114  ;;  %v3384_v10 = vsel %vm1327_vm7, %v3192_v44, %v3305_v23  ;;  %v2810_v45 = vsel %vm748_vm4, %v2618_v35, %v8323_v63  ;;  %v4801_v35 = vld [vmem:[#allocation2 + $0xf8] sm:$0xff]  ;;  %v8331_v63 = vld [vmem:[#allocation18_spill] sm:$0xff] }
 0x4f9   : > { %3326 = vrot.lane.b32.xlu1 %v3235_v50, %s4817_s9  ;;  %v3193_v46 = vsel %vm1134_vm6, %v3001_v8, %v3115_v13  ;;  %v3002_v43 = vsel %vm941_vm5, %v2810_v45, %v8324_v49  ;;  %v3620_v13 = vld [vmem:[#allocation2 + $0x181] sm:$0xff]  ;;  %v2621_v45 = vsel %vm253_vm0, %v4801_v35, %v8331_v63  ;;  %v4315_v63 = vld [vmem:[%s4925_s28 + $0x18] sm:$0xff] }
 0x4fa   : > { %3898 = vrot.lane.b32.xlu0 %v3235_v50, %s4820_s22  ;;  %v3623_v8 = vld [vmem:[#allocation2 + $0x1a1] sm:$0xff] }
 0x4fb   : > { %v3307_v60 = vpop.permute.xlu1 %3306  ;;  %v8332_v49 = vld [vmem:[#allocation55_spill] sm:$0xff] }
 0x4fc   : > { %v3879_v61 = vpop.permute.xlu0 %3878  ;;  %v3385_v40 = vsel %vm1327_vm7, %v3193_v46, %v3307_v60 }
 0x4fd   : > { %v3959_v12 = vsel %vm1907_vm10, %v3767_v17, %v3879_v61  ;;  %2944 = vrot.lane.b32.xlu1 %v2852_v56, %s4815_s7 }
 0x4fe   : > { %3516 = vrot.lane.b32.xlu0 %v2852_v56, %s4818_s10  ;;  %4708 = vmatmul.mubr.msk.f32.gmra.mrb[14].mxu1 %vm1952_vm11, %v3959_v12  ;;  %v4799_v56 = vld [vmem:[#allocation2 + $0xe0] sm:$0xff]  ;;  %v8325_v12 = vld [vmem:[#allocation17_spill] sm:$0xff] }
 0x4ff   : > { %v3499_v28 = vpop.permute.xlu1 %3498 }
 0x500   : > { %v3497_v59 = vpop.permute.xlu0 %3496  ;;  %v3577_v42 = vsel %vm1521_vm8, %v3385_v40, %v3499_v28  ;;  %v2619_v28 = vsel %vm253_vm0, %v4799_v56, %v8325_v12 }
 0x501   : > { %3708 = vrot.lane.b32.xlu1 %v3618_v55, %s4819_s19  ;;  %v3576_v0 = vsel %vm1521_vm8, %v3384_v10, %v3497_v59  ;;  %v8326_v59 = vld [vmem:[#allocation10_spill] sm:$0xff] }
 0x502   : > { %3518 = vrot.lane.b32.xlu0 %v3427_v57, %s4818_s10 }
 0x503   : > { %v3117_v37 = vpop.permute.xlu1 %3116 }
 0x504   : > { %v3689_v38 = vpop.permute.xlu0 %3688  ;;  %v3194_v32 = vsel %vm1134_vm6, %v3002_v43, %v3117_v37  ;;  %v2813_v43 = vsel %vm748_vm4, %v2621_v45, %v8332_v49 }
 0x505   : > { %3136 = vrot.lane.b32.xlu1 %v3618_v55, %s4816_s8  ;;  %v3768_v7 = vsel %vm1714_vm9, %v3576_v0, %v3689_v38  ;;  %v2811_v55 = vsel %vm748_vm4, %v2619_v28, %v8326_v59  ;;  %v7577_v59 = vld [vmem:[%s7835_s4] ss:$0 sm:$0xff] }
 0x506   : > { %2946 = vrot.lane.b32.xlu0 %v3427_v57, %s4815_s7  ;;  %v3003_v57 = vsel %vm941_vm5, %v2811_v55, %v8327_v6  ;;  %v8334_v6 = vld [vmem:[#allocation22_spill] sm:$0xff] }
 0x507   : > { %v3881_v5 = vpop.permute.xlu1 %3880 }
 0x508   : > { %v3960_v19 = vsel %vm1907_vm10, %v3768_v7, %v3881_v5  ;;  %v3691_v20 = vpop.permute.xlu0 %3690 }
 0x509   : > { %3900 = vrot.lane.b32.xlu1 %v3810_v25, %s4820_s22  ;;  %4710 = vmatprep.mubr.msk.f32.mxu1 %vm1952_vm11, %v3960_v19  ;;  %v3769_v21 = vsel %vm1714_vm9, %v3577_v42, %v3691_v20  ;;  %v3239_v20 = vld [vmem:[#allocation2 + $0x18a] sm:$0xff]  ;;  %v3622_v42 = vld [vmem:[#allocation2 + $0x199] sm:$0xff] }
 0x50a   : > { %3710 = vrot.lane.b32.xlu0 %v3619_v18, %s4819_s19 }
 0x50b   : > { %v3309_v2 = vpop.permute.xlu1 %3308 }
 0x50c   : > { %v3119_v34 = vpop.permute.xlu0 %3118  ;;  %v3386_v50 = vsel %vm1327_vm7, %v3194_v32, %v3309_v2  ;;  %v8329_v2 = vld [vmem:[#allocation130_spill] sm:$0xff]  ;;  %v8333_v32 = vld [vmem:[#allocation21_spill] sm:$0xff] }
 0x50d   : > { %3328 = vrot.lane.b32.xlu1 %v3810_v25, %s4817_s9  ;;  %v3195_v39 = vsel %vm1134_vm6, %v3003_v57, %v3119_v34  ;;  %v3431_v25 = vld [vmem:[#allocation2 + $0x1a0] sm:$0xff]  ;;  %v2812_v58 = vsel %vm748_vm4, %v2620_v27, %v8329_v2  ;;  %v8330_v34 = vld [vmem:[#allocation135_spill] sm:$0xff]  ;;  %v4803_v2 = vld [vmem:[#allocation2 + $0x110] sm:$0xff] }
 0x50e   : > { %3138 = vrot.lane.b32.xlu0 %v3619_v18, %s4816_s8  ;;  %v3004_v46 = vsel %vm941_vm5, %v2812_v58, %v8330_v34  ;;  %v8336_v58 = vld [vmem:[#allocation75_spill] sm:$0xff]  ;;  %v8337_v34 = vld [vmem:[#allocation32_spill] sm:$0xff] }
 0x50f   : > { %v3311_v14 = vpop.permute.xlu1 %3310 }
 0x510   : > { %v3883_v54 = vpop.permute.xlu0 %3882  ;;  %v3387_v37 = vsel %vm1327_vm7, %v3195_v39, %v3311_v14  ;;  %v8335_v39 = vld [vmem:[#allocation79_spill] sm:$0xff] }
 0x511   : > { %v3961_v15 = vsel %vm1907_vm10, %v3769_v21, %v3883_v54  ;;  %3330 = vrot.lane.b32.xlu1 %v3237_v51, %s4817_s9 }
 0x512   : > { %3902 = vrot.lane.b32.xlu0 %v3237_v51, %s4820_s22  ;;  %4711 = vmatmul.mubr.msk.f32.gmra.mrb[16].mxu1 %vm1952_vm11, %v3961_v15  ;;  %v3815_v15 = vld [vmem:[#allocation2 + $0x1a2] sm:$0xff] }
 0x513   : > { %v3503_v52 = vpop.permute.xlu1 %3502 }
 0x514   : > { %v3501_v16 = vpop.permute.xlu0 %3500  ;;  %v3579_v44 = vsel %vm1521_vm8, %v3387_v37, %v3503_v52 }
 0x515   : > { %2948 = vrot.lane.b32.xlu1 %v2854_v24, %s4815_s7  ;;  %v3578_v53 = vsel %vm1521_vm8, %v3386_v50, %v3501_v16 }
 0x516   : > { %3520 = vrot.lane.b32.xlu0 %v2854_v24, %s4818_s10  ;;  %v3814_v24 = vld [vmem:[#allocation2 + $0x19a] sm:$0xff] }
 0x517   : > { %v3121_v23 = vpop.permute.xlu1 %3120 }
 0x518   : > { %v3693_v1 = vpop.permute.xlu0 %3692  ;;  %v3196_v14 = vsel %vm1134_vm6, %v3004_v46, %v3121_v23 }
 0x519   : > { %3712 = vrot.lane.b32.xlu1 %v3620_v13, %s4819_s19  ;;  %v3770_v3 = vsel %vm1714_vm9, %v3578_v53, %v3693_v1  ;;  %v3005_v1 = vsel %vm941_vm5, %v2813_v43, %v8333_v32  ;;  %v4314_v43 = vld [vmem:[%s4925_s28 + $0x10] sm:$0xff] }
 0x51a   : > { %3522 = vrot.lane.b32.xlu0 %v3429_v11, %s4818_s10 }
 0x51b   : > { %v3885_v60 = vpop.permute.xlu1 %3884 }
 0x51c   : > { %v3962_v17 = vsel %vm1907_vm10, %v3770_v3, %v3885_v60  ;;  %v3695_v61 = vpop.permute.xlu0 %3694 }
 0x51d   : > { %3140 = vrot.lane.b32.xlu1 %v3620_v13, %s4816_s8  ;;  %4713 = vmatprep.mubr.msk.f32.mxu1 %vm1952_vm11, %v3962_v17  ;;  %v3771_v10 = vsel %vm1714_vm9, %v3579_v44, %v3695_v61 }
 0x51e   : > { %2950 = vrot.lane.b32.xlu0 %v3429_v11, %s4815_s7 }
 0x51f   : > { %v3313_v4 = vpop.permute.xlu1 %3312 }
 0x520   : > { %v3123_v29 = vpop.permute.xlu0 %3122  ;;  %v3388_v54 = vsel %vm1327_vm7, %v3196_v14, %v3313_v4  ;;  %v4802_v4 = vld [vmem:[#allocation2 + $0x108] sm:$0xff] }
 0x521   : > { %3904 = vrot.lane.b32.xlu1 %v3812_v30, %s4820_s22  ;;  %v3197_v50 = vsel %vm1134_vm6, %v3005_v1, %v3123_v29  ;;  %v2622_v57 = vsel %vm253_vm0, %v4802_v4, %v8334_v6 }
 0x522   : > { %3714 = vrot.lane.b32.xlu0 %v3621_v48, %s4819_s19 }
 0x523   : > { %v3315_v38 = vpop.permute.xlu1 %3314 }
 0x524   : > { %v3887_v0 = vpop.permute.xlu0 %3886  ;;  %v3389_v11 = vsel %vm1327_vm7, %v3197_v50, %v3315_v38  ;;  %v4312_v38 = vld [vmem:[%s4925_s28] sm:$0xff] }
 0x525   : > { %v3963_v7 = vsel %vm1907_vm10, %v3771_v10, %v3887_v0  ;;  %3332 = vrot.lane.b32.xlu1 %v3812_v30, %s4817_s9  ;;  %v4313_v30 = vld [vmem:[%s4925_s28 + $0x8] sm:$0xff]  ;;  %v8338_v50 = vld [vmem:[#allocation74_spill] sm:$0xff] }
 0x526   : > { %3142 = vrot.lane.b32.xlu0 %v3621_v48, %s4816_s8  ;;  %4714 = vmatmul.mubr.msk.f32.gmra.mrb[18].mxu1 %vm1952_vm11, %v3963_v7  ;;  %v2814_v48 = vsel %vm748_vm4, %v2622_v57, %v8335_v39  ;;  %v8341_v39 = vld [vmem:[#allocation30_spill] sm:$0xff] }
 0x527   : > { %v2933_v5 = vpop.permute.xlu1 %2932 }
 0x528   : > { %v3505_v19 = vpop.permute.xlu0 %3504  ;;  %v3006_v10 = vsel %vm941_vm5, %v2814_v48, %v2933_v5 }
 0x529   : > { %3334 = vrot.lane.b32.xlu1 %v3239_v20, %s4817_s9  ;;  %v3580_v51 = vsel %vm1521_vm8, %v3388_v54, %v3505_v19 }
 0x52a   : > { %3906 = vrot.lane.b32.xlu0 %v3239_v20, %s4820_s22 }
 0x52b   : > { %v3697_v18 = vpop.permute.xlu1 %3696 }
 0x52c   : > { %v3507_v22 = vpop.permute.xlu0 %3506  ;;  %v3772_v52 = vsel %vm1714_vm9, %v3580_v51, %v3697_v18 }
 0x52d   : > { %3526 = vrot.lane.b32.xlu1 %v3431_v25, %s4818_s10  ;;  %v3581_v53 = vsel %vm1521_vm8, %v3389_v11, %v3507_v22  ;;  %v2624_v11 = vsel %vm253_vm0, %v7325_v47, %v8338_v50 }
 0x52e   : > { %3524 = vrot.lane.b32.xlu0 %v3430_v9, %s4818_s10 }
 0x52f   : > { %v3125_v40 = vpop.permute.xlu1 %3124 }
 0x530   : > { %v7551_v21 = vpop.permute.xlu0 %2934  ;;  %v3198_v19 = vsel %vm1134_vm6, %v3006_v10, %v3125_v40 }
 0x531   : > { %3718 = vrot.lane.b32.xlu1 %v3623_v8, %s4819_s19  ;;  %v2623_v8 = vsel %vm253_vm0, %v4803_v2, %v8336_v58 }
 0x532   : > { %3716 = vrot.lane.b32.xlu0 %v3622_v42, %s4819_s19  ;;  %s7592_s19 = scalar_lea.vmem %s7837_s6, %s4542_s25  ;;  %v2815_v46 = vsel %vm748_vm4, %v2623_v8, %v8337_v34 }
 0x533   : > { %v3889_v16 = vpop.permute.xlu1 %3888  ;;  %v3007_v42 = vsel %vm941_vm5, %v2815_v46, %v7551_v21 }
 0x534   : > { %v3964_v31 = vsel %vm1907_vm10, %v3772_v52, %v3889_v16  ;;  %v3699_v41 = vpop.permute.xlu0 %3698 }
 0x535   : > { %3910 = vrot.lane.b32.xlu1 %v3815_v15, %s4820_s22  ;;  %4716 = vmatprep.mubr.msk.f32.mxu1 %vm1952_vm11, %v3964_v31  ;;  %v3773_v60 = vsel %vm1714_vm9, %v3581_v53, %v3699_v41 }
 0x536   : > { %3908 = vrot.lane.b32.xlu0 %v3814_v24, %s4820_s22 }
 0x537   : > { %v3317_v23 = vpop.permute.xlu1 %3316 }
 0x538   : > { %v3127_v13 = vpop.permute.xlu0 %3126  ;;  %v3390_v18 = vsel %vm1327_vm7, %v3198_v19, %v3317_v23 }
 0x539   : > { %v3199_v54 = vsel %vm1134_vm6, %v3007_v42, %v3127_v13 }
 0x53b   : > { %v3319_v3 = vpop.permute.xlu1 %3318 }
 0x53c   : > { %v3891_v17 = vpop.permute.xlu0 %3890  ;;  %v3391_v51 = vsel %vm1327_vm7, %v3199_v54, %v3319_v3  ;;  %v8339_v3 = vld [vmem:[#allocation100_spill] sm:$0xff] }
 0x53d   : > { %v3965_v61 = vsel %vm1907_vm10, %v3773_v60, %v3891_v17  ;;  %v2816_v60 = vsel %vm748_vm4, %v2624_v11, %v8339_v3 }
 0x53e   : > { %4717 = vmatmul.mubr.msk.f32.gmra.mrb[20].mxu1 %vm1952_vm11, %v3965_v61 }
 0x53f   : > { %v2937_v56 = vpop.permute.xlu1 %2936 }
 0x540   : > { %v3509_v12 = vpop.permute.xlu0 %3508  ;;  %v3008_v17 = vsel %vm941_vm5, %v2816_v60, %v2937_v56  ;;  %v8340_v56 = vld [vmem:[#allocation96_spill] sm:$0xff] }
 0x541   : > { %v3582_v5 = vsel %vm1521_vm8, %v3390_v18, %v3509_v12 }
 0x543   : > { %v3701_v28 = vpop.permute.xlu1 %3700 }
 0x544   : > { %v3511_v55 = vpop.permute.xlu0 %3510  ;;  %v3774_v22 = vsel %vm1714_vm9, %v3582_v5, %v3701_v28  ;;  %v4317_v5 = vld [vmem:[%s4925_s28 + $0x28] sm:$0xff] }
 0x545   : > { %v4688_v29 = vpop.f32.mrb[0].mxu1  ;;  %v3583_v15 = vsel %vm1521_vm8, %v3391_v51, %v3511_v55 }
 0x546   : > { %v4159_v37 = vadd.f32 %v4688_v29, %v7577_v59  ;;  %v4153_v44 = vpop.f32.mrb[1].mxu1 }
 0x547   : > { %v4154_v0 = vadd.f32 %v7577_v59, %v4153_v44  ;;  %v3129_v7 = vpop.permute.xlu1 %3128 }
 0x548   : > { %v4345_v20 = vadd.f32 %v4313_v30, %v4159_v37  ;;  %v2939_v25 = vpop.permute.xlu0 %2938  ;;  %v3200_v12 = vsel %vm1134_vm6, %v3008_v17, %v3129_v7  ;;  %v2625_v30 = vsel %vm253_vm0, %v7336_v62, %v8340_v56 }
 0x549   : > { %v4344_v9 = vadd.f32 %v4312_v38, %v4154_v0  ;;  %v2817_v48 = vsel %vm748_vm4, %v2625_v30, %v8341_v39 }
 0x54a   : > { %4377 = vst.msk [vmem:[%s7592_s19 + $0x8] sm:$0xff] %vm253_vm0, %v4345_v20  ;;  %v3009_v44 = vsel %vm941_vm5, %v2817_v48, %v2939_v25  ;;  %v2436_v48 = vld [vmem:[#allocation2 + $0x150] sm:$0xff] }
 0x54b   : > { %4376 = vst.msk [vmem:[%s7592_s19] sm:$0xff] %vm253_vm0, %v4344_v9  ;;  %v3893_v33 = vpop.permute.xlu1 %3892 }
 0x54c   : > { %v3966_v36 = vsel %vm1907_vm10, %v3774_v22, %v3893_v33  ;;  %v3703_v27 = vpop.permute.xlu0 %3702  ;;  %v4316_v33 = vld [vmem:[%s4925_s28 + $0x20] sm:$0xff] }
 0x54d   : > { %4719 = vmatprep.mubr.msk.f32.mxu1 %vm1952_vm11, %v3966_v36  ;;  %v3775_v16 = vsel %vm1714_vm9, %v3583_v15, %v3703_v27 }
 0x54f   : > { %v3321_v40 = vpop.permute.xlu1 %3320 }
 0x550   : > { %v3131_v14 = vpop.permute.xlu0 %3130  ;;  %v3392_v55 = vsel %vm1327_vm7, %v3200_v12, %v3321_v40  ;;  %v8342_v40 = vld [vmem:[#allocation95_spill] sm:$0xff] }
 0x551   : > { %v3201_v10 = vsel %vm1134_vm6, %v3009_v44, %v3131_v14  ;;  %v2626_v42 = vsel %vm253_vm0, %v7375_v26, %v8342_v40  ;;  %v8343_v14 = vld [vmem:[#allocation19_spill] sm:$0xff]  ;;  %v8346_v44 = vld [vmem:[#allocation6_spill] sm:$0xff] }
 0x552   : > { %v2818_v54 = vsel %vm748_vm4, %v2626_v42, %v8343_v14  ;;  %v4320_v40 = vld [vmem:[%s4925_s28 + $0x40] sm:$0xff]  ;;  %v8349_v42 = vld [vmem:[#allocation99_spill] sm:$0xff] }
 0x553   : > { %v3323_v52 = vpop.permute.xlu1 %3322 }
 0x554   : > { %v3895_v24 = vpop.permute.xlu0 %3894  ;;  %v3393_v0 = vsel %vm1327_vm7, %v3201_v10, %v3323_v52  ;;  %v8347_v10 = vld [vmem:[#allocation61_spill] sm:$0xff] }
 0x555   : > { %v3967_v31 = vsel %vm1907_vm10, %v3775_v16, %v3895_v24 }
 0x556   : > { %4720 = vmatmul.mubr.msk.f32.gmra.mrb[22].mxu1 %vm1952_vm11, %v3967_v31 }
 0x557   : > { %v2941_v41 = vpop.permute.xlu1 %2940 }
 0x558   : > { %v3513_v21 = vpop.permute.xlu0 %3512  ;;  %v3010_v51 = vsel %vm941_vm5, %v2818_v54, %v2941_v41  ;;  %v8344_v41 = vld [vmem:[#allocation8_spill] sm:$0xff] }
 0x559   : > { %v4691_v35 = vpop.f32.mrb[2].mxu1  ;;  %v3584_v4 = vsel %vm1521_vm8, %v3392_v55, %v3513_v21 }
 0x55a   : > { %v4169_v45 = vadd.f32 %v4691_v35, %v7577_v59  ;;  %v4163_v49 = vpop.f32.mrb[3].mxu1 }
 0x55b   : > { %v4164_v23 = vadd.f32 %v7577_v59, %v4163_v49  ;;  %v3705_v32 = vpop.permute.xlu1 %3704 }
 0x55c   : > { %v4347_v1 = vadd.f32 %v4315_v63, %v4169_v45  ;;  %v3515_v13 = vpop.permute.xlu0 %3514  ;;  %v3776_v47 = vsel %vm1714_vm9, %v3584_v4, %v3705_v32  ;;  %v2435_v45 = vld [vmem:[#allocation2 + $0x140] sm:$0xff] }
 0x55d   : > { %v4346_v53 = vadd.f32 %v4314_v43, %v4164_v23  ;;  %v3585_v7 = vsel %vm1521_vm8, %v3393_v0, %v3515_v13  ;;  %v2627_v49 = vsel %vm253_vm0, %v2435_v45, %v8344_v41  ;;  %v8345_v43 = vld [vmem:[#allocation78_spill] sm:$0xff] }
 0x55e   : > { %4379 = vst.msk [vmem:[%s7592_s19 + $0x18] sm:$0xff] %vm253_vm0, %v4347_v1  ;;  %v2819_v23 = vsel %vm748_vm4, %v2627_v49, %v8345_v43 }
 0x55f   : > { %4378 = vst.msk [vmem:[%s7592_s19 + $0x10] sm:$0xff] %vm253_vm0, %v4346_v53  ;;  %v3133_v61 = vpop.permute.xlu1 %3132  ;;  %v4319_v53 = vld [vmem:[%s4925_s28 + $0x38] sm:$0xff] }
 0x560   : > { %v2943_v28 = vpop.permute.xlu0 %2942  ;;  %v3202_v52 = vsel %vm1134_vm6, %v3010_v51, %v3133_v61  ;;  %v4318_v61 = vld [vmem:[%s4925_s28 + $0x30] sm:$0xff] }
 0x561   : > { %v3011_v1 = vsel %vm941_vm5, %v2819_v23, %v2943_v28  ;;  %v2438_v23 = vld [vmem:[#allocation2 + $0x168] sm:$0xff] }
 0x563   : > { %v3897_v6 = vpop.permute.xlu1 %3896 }
 0x564   : > { %v3968_v57 = vsel %vm1907_vm10, %v3776_v47, %v3897_v6  ;;  %v3707_v29 = vpop.permute.xlu0 %3706 }
 0x565   : > { %4722 = vmatprep.mubr.msk.f32.mxu1 %vm1952_vm11, %v3968_v57  ;;  %v3777_v20 = vsel %vm1714_vm9, %v3585_v7, %v3707_v29 }
 0x567   : > { %v3325_v37 = vpop.permute.xlu1 %3324 }
 0x568   : > { %v3135_v38 = vpop.permute.xlu0 %3134  ;;  %v3394_v24 = vsel %vm1327_vm7, %v3202_v52, %v3325_v37 }
 0x569   : > { %v3203_v50 = vsel %vm1134_vm6, %v3011_v1, %v3135_v38  ;;  %v2628_v38 = vsel %vm253_vm0, %v2436_v48, %v8346_v44  ;;  %v8350_v1 = vld [vmem:[#allocation51_spill] sm:$0xff] }
 0x56a   : > { %v2820_v0 = vsel %vm748_vm4, %v2628_v38, %v8347_v10  ;;  %v4323_v10 = vld [vmem:[%s4925_s28 + $0x58] sm:$0xff] }
 0x56b   : > { %v3327_v19 = vpop.permute.xlu1 %3326 }
 0x56c   : > { %v3899_v62 = vpop.permute.xlu0 %3898  ;;  %v3395_v3 = vsel %vm1327_vm7, %v3203_v50, %v3327_v19  ;;  %v8351_v50 = vld [vmem:[#allocation129_spill] sm:$0xff] }
 0x56d   : > { %v3969_v18 = vsel %vm1907_vm10, %v3777_v20, %v3899_v62  ;;  %v4694_v9 = vpop.f32.mrb[4].mxu1 }
 0x56e   : > { %v4179_v22 = vadd.f32 %v4694_v9, %v7577_v59  ;;  %v4173_v25 = vpop.f32.mrb[5].mxu1  ;;  %4723 = vmatmul.mubr.msk.f32.gmra.mrb[24].mxu1 %vm1952_vm11, %v3969_v18 }
 0x56f   : > { %v4174_v36 = vadd.f32 %v7577_v59, %v4173_v25  ;;  %v2945_v27 = vpop.permute.xlu1 %2944 }
 0x570   : > { %v4349_v2 = vadd.f32 %v4317_v5, %v4179_v22  ;;  %v3517_v58 = vpop.permute.xlu0 %3516  ;;  %v3012_v7 = vsel %vm941_vm5, %v2820_v0, %v2945_v27  ;;  %v8348_v27 = vld [vmem:[#allocation53_spill] sm:$0xff] }
 0x571   : > { %v4348_v8 = vadd.f32 %v4316_v33, %v4174_v36  ;;  %v3586_v31 = vsel %vm1521_vm8, %v3394_v24, %v3517_v58  ;;  %v2437_v36 = vld [vmem:[#allocation2 + $0x158] sm:$0xff]  ;;  %v4321_v58 = vld [vmem:[%s4925_s28 + $0x48] sm:$0xff] }
 0x572   : > { %4381 = vst.msk [vmem:[%s7592_s19 + $0x28] sm:$0xff] %vm253_vm0, %v4349_v2 }
 0x573   : > { %4380 = vst.msk [vmem:[%s7592_s19 + $0x20] sm:$0xff] %vm253_vm0, %v4348_v8  ;;  %v3709_v34 = vpop.permute.xlu1 %3708  ;;  %v2629_v8 = vsel %vm253_vm0, %v2437_v36, %v8348_v27  ;;  %v4324_v36 = vld [vmem:[%s4925_s28 + $0x60] sm:$0xff] }
 0x574   : > { %v3519_v46 = vpop.permute.xlu0 %3518  ;;  %v3778_v21 = vsel %vm1714_vm9, %v3586_v31, %v3709_v34  ;;  %v2821_v14 = vsel %vm748_vm4, %v2629_v8, %v8349_v42  ;;  %v4326_v42 = vld [vmem:[%s4925_s28 + $0x70] sm:$0xff] }
 0x575   : > { %v3587_v12 = vsel %vm1521_vm8, %v3395_v3, %v3519_v46 }
 0x577   : > { %v3137_v15 = vpop.permute.xlu1 %3136 }
 0x578   : > { %v2947_v16 = vpop.permute.xlu0 %2946  ;;  %v3204_v20 = vsel %vm1134_vm6, %v3012_v7, %v3137_v15 }
 0x579   : > { %v3013_v15 = vsel %vm941_vm5, %v2821_v14, %v2947_v16 }
 0x57b   : > { %v3901_v35 = vpop.permute.xlu1 %3900 }
 0x57c   : > { %v3970_v26 = vsel %vm1907_vm10, %v3778_v21, %v3901_v35  ;;  %v3711_v63 = vpop.permute.xlu0 %3710 }
 0x57d   : > { %4725 = vmatprep.mubr.msk.f32.mxu1 %vm1952_vm11, %v3970_v26  ;;  %v3779_v28 = vsel %vm1714_vm9, %v3587_v12, %v3711_v63 }
 0x57f   : > { %v3329_v32 = vpop.permute.xlu1 %3328 }
 0x580   : > { %v3139_v13 = vpop.permute.xlu0 %3138  ;;  %v3396_v18 = vsel %vm1327_vm7, %v3204_v20, %v3329_v32  ;;  %v2439_v32 = vld [vmem:[#allocation2 + $0x170] sm:$0xff] }
 0x581   : > { %v4697_v11 = vpop.f32.mrb[6].mxu1  ;;  %v3205_v31 = vsel %vm1134_vm6, %v3013_v15, %v3139_v13  ;;  %v2630_v13 = vsel %vm253_vm0, %v2438_v23, %v8350_v1  ;;  %v4322_v20 = vld [vmem:[%s4925_s28 + $0x50] sm:$0xff] }
 0x582   : > { %v4189_v60 = vadd.f32 %v4697_v11, %v7577_v59  ;;  %v4183_v17 = vpop.f32.mrb[7].mxu1  ;;  %v2631_v11 = vsel %vm253_vm0, %v2439_v32, %v8351_v50  ;;  %v4333_v50 = vld [vmem:[%s4925_s28 + $0xa8] sm:$0xff] }
 0x583   : > { %v4184_v55 = vadd.f32 %v7577_v59, %v4183_v17  ;;  %v3331_v4 = vpop.permute.xlu1 %3330  ;;  %v8353_v17 = vld [vmem:[#allocation16_spill] sm:$0xff] }
 0x584   : > { %v4351_v47 = vadd.f32 %v4319_v53, %v4189_v60  ;;  %v3903_v6 = vpop.permute.xlu0 %3902  ;;  %v3397_v35 = vsel %vm1327_vm7, %v3205_v31, %v3331_v4  ;;  %v8352_v53 = vld [vmem:[#allocation133_spill] sm:$0xff] }
 0x585   : > { %v4350_v57 = vadd.f32 %v4318_v61, %v4184_v55  ;;  %v3971_v29 = vsel %vm1907_vm10, %v3779_v28, %v3903_v6  ;;  %v2822_v3 = vsel %vm748_vm4, %v2630_v13, %v8352_v53  ;;  %v2823_v61 = vsel %vm748_vm4, %v2631_v11, %v8353_v17 }
 0x586   : > { %4383 = vst.msk [vmem:[%s7592_s19 + $0x38] sm:$0xff] %vm253_vm0, %v4351_v47  ;;  %4726 = vmatmul.mubr.msk.f32.gmra.mrb[26].mxu1 %vm1952_vm11, %v3971_v29 }
 0x587   : > { %4382 = vst.msk [vmem:[%s7592_s19 + $0x30] sm:$0xff] %vm253_vm0, %v4350_v57  ;;  %v2949_v56 = vpop.permute.xlu1 %2948 }
 0x588   : > { %v3521_v30 = vpop.permute.xlu0 %3520  ;;  %v3014_v12 = vsel %vm941_vm5, %v2822_v3, %v2949_v56  ;;  %v4332_v3 = vld [vmem:[%s4925_s28 + $0xa0] sm:$0xff] }
 0x589   : > { %v3588_v9 = vsel %vm1521_vm8, %v3396_v18, %v3521_v30 }
 0x58b   : > { %v3713_v39 = vpop.permute.xlu1 %3712 }
 0x58c   : > { %v3523_v37 = vpop.permute.xlu0 %3522  ;;  %v3780_v5 = vsel %vm1714_vm9, %v3588_v9, %v3713_v39 }
 0x58d   : > { %v3589_v26 = vsel %vm1521_vm8, %v3397_v35, %v3523_v37 }
 0x58f   : > { %v3141_v19 = vpop.permute.xlu1 %3140 }
 0x590   : > { %v2951_v62 = vpop.permute.xlu0 %2950  ;;  %v3206_v4 = vsel %vm1134_vm6, %v3014_v12, %v3141_v19 }
 0x591   : > { %v3015_v28 = vsel %vm941_vm5, %v2823_v61, %v2951_v62 }
 0x593   : > { %v3905_v22 = vpop.permute.xlu1 %3904 }
 0x594   : > { %v3972_v25 = vsel %vm1907_vm10, %v3780_v5, %v3905_v22  ;;  %v3715_v33 = vpop.permute.xlu0 %3714  ;;  %v4325_v22 = vld [vmem:[%s4925_s28 + $0x68] sm:$0xff] }
 0x595   : > { %v4700_v2 = vpop.f32.mrb[8].mxu1  ;;  %4728 = vmatprep.mubr.msk.f32.mxu1 %vm1952_vm11, %v3972_v25  ;;  %v3781_v45 = vsel %vm1714_vm9, %v3589_v26, %v3715_v33 }
 0x596   : > { %v4199_v34 = vadd.f32 %v4700_v2, %v7577_v59  ;;  %v4193_v46 = vpop.f32.mrb[9].mxu1 }
 0x597   : > { %v4194_v54 = vadd.f32 %v7577_v59, %v4193_v46  ;;  %v3333_v51 = vpop.permute.xlu1 %3332 }
 0x598   : > { %v4353_v52 = vadd.f32 %v4321_v58, %v4199_v34  ;;  %v3143_v24 = vpop.permute.xlu0 %3142  ;;  %v3398_v47 = vsel %vm1327_vm7, %v3206_v4, %v3333_v51  ;;  %v4327_v34 = vld [vmem:[%s4925_s28 + $0x78] sm:$0xff] }
 0x599   : > { %v4352_v21 = vadd.f32 %v4320_v40, %v4194_v54  ;;  %v3207_v6 = vsel %vm1134_vm6, %v3015_v28, %v3143_v24 }
 0x59a   : > { %4385 = vst.msk [vmem:[%s7592_s19 + $0x48] sm:$0xff] %vm253_vm0, %v4353_v52  ;;  %v4329_v52 = vld [vmem:[%s4925_s28 + $0x88] sm:$0xff] }
 0x59b   : > { %4384 = vst.msk [vmem:[%s7592_s19 + $0x40] sm:$0xff] %vm253_vm0, %v4352_v21  ;;  %v3335_v63 = vpop.permute.xlu1 %3334  ;;  %v4328_v21 = vld [vmem:[%s4925_s28 + $0x80] sm:$0xff] }
 0x59c   : > { %v3907_v41 = vpop.permute.xlu0 %3906  ;;  %v3399_v57 = vsel %vm1327_vm7, %v3207_v6, %v3335_v63 }
 0x59d   : > { %v3973_v49 = vsel %vm1907_vm10, %v3781_v45, %v3907_v41  ;;  %v4331_v41 = vld [vmem:[%s4925_s28 + $0x98] sm:$0xff] }
 0x59e   : > { %4729 = vmatmul.mubr.msk.f32.gmra.mrb[28].mxu1 %vm1952_vm11, %v3973_v49 }
 0x59f   : > { %v3527_v16 = vpop.permute.xlu1 %3526 }
 0x5a0   : > { %v3525_v43 = vpop.permute.xlu0 %3524  ;;  %v3591_v39 = vsel %vm1521_vm8, %v3399_v57, %v3527_v16 }
 0x5a1   : > { %v3590_v29 = vsel %vm1521_vm8, %v3398_v47, %v3525_v43  ;;  %v4330_v43 = vld [vmem:[%s4925_s28 + $0x90] sm:$0xff] }
 0x5a2   : > { %v4334_v47 = vld [vmem:[%s4925_s28 + $0xb0] sm:$0xff] }
 0x5a3   : > { %v3719_v60 = vpop.permute.xlu1 %3718 }
 0x5a4   : > { %v3717_v55 = vpop.permute.xlu0 %3716  ;;  %v3783_v37 = vsel %vm1714_vm9, %v3591_v39, %v3719_v60  ;;  %v4337_v39 = vld [vmem:[%s4925_s28 + $0xc8] sm:$0xff] }
 0x5a5   : > { %v3782_v56 = vsel %vm1714_vm9, %v3590_v29, %v3717_v55  ;;  %v4335_v55 = vld [vmem:[%s4925_s28 + $0xb8] sm:$0xff] }
 0x5a7   : > { %v3911_v30 = vpop.permute.xlu1 %3910 }
 0x5a8   : > { %v3909_v48 = vpop.permute.xlu0 %3908  ;;  %v3975_v0 = vsel %vm1907_vm10, %v3783_v37, %v3911_v30  ;;  %v4336_v37 = vld [vmem:[%s4925_s28 + $0xc0] sm:$0xff] }
 0x5a9   : > { %v3974_v44 = vsel %vm1907_vm10, %v3782_v56, %v3909_v48  ;;  %v4703_v38 = vpop.f32.mrb[10].mxu1 }
 0x5aa   : > { %v4209_v7 = vadd.f32 %v4703_v38, %v7577_v59  ;;  %v4203_v19 = vpop.f32.mrb[11].mxu1  ;;  %4731 = vmatprep.mubr.msk.f32.mxu1 %vm1952_vm11, %v3974_v44 }
 0x5ab   : > { %v4204_v62 = vadd.f32 %v7577_v59, %v4203_v19  ;;  %4732 = vmatmul.mubr.msk.f32.gmra.mrb[30].mxu1 %vm1952_vm11, %v3975_v0 }
 0x5ac   : > { %v4355_v18 = vadd.f32 %v4323_v10, %v4209_v7  ;;  %v4339_v7 = vld [vmem:[%s4925_s28 + $0xd8] sm:$0xff] }
 0x5ad   : > { %v4354_v9 = vadd.f32 %v4322_v20, %v4204_v62  ;;  %v4338_v62 = vld [vmem:[%s4925_s28 + $0xd0] sm:$0xff] }
 0x5ae   : > { %4387 = vst.msk [vmem:[%s7592_s19 + $0x58] sm:$0xff] %vm253_vm0, %v4355_v18 }
 0x5af   : > { %4386 = vst.msk [vmem:[%s7592_s19 + $0x50] sm:$0xff] %vm253_vm0, %v4354_v9 }
 0x5bd   : > { %v4706_v5 = vpop.f32.mrb[12].mxu1 }
 0x5be   : > { %v4219_v25 = vadd.f32 %v4706_v5, %v7577_v59  ;;  %v4213_v33 = vpop.f32.mrb[13].mxu1 }
 0x5bf   : > { %v4214_v2 = vadd.f32 %v7577_v59, %v4213_v33 }
 0x5c0   : > { %v4357_v58 = vadd.f32 %v4325_v22, %v4219_v25  ;;  %v4341_v25 = vld [vmem:[%s4925_s28 + $0xe8] sm:$0xff] }
 0x5c1   : > { %v4356_v27 = vadd.f32 %v4324_v36, %v4214_v2  ;;  %v4340_v2 = vld [vmem:[%s4925_s28 + $0xe0] sm:$0xff] }
 0x5c2   : > { %4389 = vst.msk [vmem:[%s7592_s19 + $0x68] sm:$0xff] %vm253_vm0, %v4357_v58 }
 0x5c3   : > { %4388 = vst.msk [vmem:[%s7592_s19 + $0x60] sm:$0xff] %vm253_vm0, %v4356_v27 }
 0x5d1   : > { %v4709_v8 = vpop.f32.mrb[14].mxu1 }
 0x5d2   : > { %v4229_v46 = vadd.f32 %v4709_v8, %v7577_v59  ;;  %v4223_v40 = vpop.f32.mrb[15].mxu1 }
 0x5d3   : > { %v4224_v14 = vadd.f32 %v7577_v59, %v4223_v40 }
 0x5d4   : > { %v4359_v54 = vadd.f32 %v4327_v34, %v4229_v46  ;;  %v4343_v46 = vld [vmem:[%s4925_s28 + $0xf8] sm:$0xff] }
 0x5d5   : > { %v4358_v51 = vadd.f32 %v4326_v42, %v4224_v14  ;;  %v4342_v14 = vld [vmem:[%s4925_s28 + $0xf0] sm:$0xff] }
 0x5d6   : > { %4391 = vst.msk [vmem:[%s7592_s19 + $0x78] sm:$0xff] %vm253_vm0, %v4359_v54 }
 0x5d7   : > { %4390 = vst.msk [vmem:[%s7592_s19 + $0x70] sm:$0xff] %vm253_vm0, %v4358_v51 }
 0x5e5   : > { %v4712_v15 = vpop.f32.mrb[16].mxu1 }
 0x5e6   : > { %v4239_v24 = vadd.f32 %v4712_v15, %v7577_v59  ;;  %v4233_v31 = vpop.f32.mrb[17].mxu1 }
 0x5e7   : > { %v4234_v35 = vadd.f32 %v7577_v59, %v4233_v31 }
 0x5e8   : > { %v4361_v26 = vadd.f32 %v4329_v52, %v4239_v24 }
 0x5e9   : > { %v4360_v63 = vadd.f32 %v4328_v21, %v4234_v35 }
 0x5ea   : > { %4393 = vst.msk [vmem:[%s7592_s19 + $0x88] sm:$0xff] %vm253_vm0, %v4361_v26 }
 0x5eb   : > { %4392 = vst.msk [vmem:[%s7592_s19 + $0x80] sm:$0xff] %vm253_vm0, %v4360_v63 }
 0x5f9   : > { %v4715_v45 = vpop.f32.mrb[18].mxu1 }
 0x5fa   : > { %v4249_v49 = vadd.f32 %v4715_v45, %v7577_v59  ;;  %v4243_v16 = vpop.f32.mrb[19].mxu1 }
 0x5fb   : > { %v4244_v23 = vadd.f32 %v7577_v59, %v4243_v16 }
 0x5fc   : > { %v4363_v32 = vadd.f32 %v4331_v41, %v4249_v49 }
 0x5fd   : > { %v4362_v1 = vadd.f32 %v4330_v43, %v4244_v23 }
 0x5fe   : > { %4395 = vst.msk [vmem:[%s7592_s19 + $0x98] sm:$0xff] %vm253_vm0, %v4363_v32 }
 0x5ff   : > { %4394 = vst.msk [vmem:[%s7592_s19 + $0x90] sm:$0xff] %vm253_vm0, %v4362_v1 }
 0x611   : > { %v4718_v13 = vpop.f32.mrb[20].mxu1 }
 0x612   : > { %v4259_v11 = vadd.f32 %v4718_v13, %v7577_v59  ;;  %v4253_v53 = vpop.f32.mrb[21].mxu1 }
 0x613   : > { %v4254_v60 = vadd.f32 %v7577_v59, %v4253_v53 }
 0x614   : > { %v4365_v17 = vadd.f32 %v4333_v50, %v4259_v11 }
 0x615   : > { %v4364_v61 = vadd.f32 %v4332_v3, %v4254_v60 }
 0x616   : > { %4397 = vst.msk [vmem:[%s7592_s19 + $0xa8] sm:$0xff] %vm253_vm0, %v4365_v17 }
 0x617   : > { %4396 = vst.msk [vmem:[%s7592_s19 + $0xa0] sm:$0xff] %vm253_vm0, %v4364_v61 }
 0x629   : > { %v4721_v12 = vpop.f32.mrb[22].mxu1 }
 0x62a   : > { %v4269_v4 = vadd.f32 %v4721_v12, %v7577_v59  ;;  %v4263_v28 = vpop.f32.mrb[23].mxu1 }
 0x62b   : > { %v4264_v6 = vadd.f32 %v7577_v59, %v4263_v28 }
 0x62c   : > { %v4367_v57 = vadd.f32 %v4335_v55, %v4269_v4 }
 0x62d   : > { %v4366_v29 = vadd.f32 %v4334_v47, %v4264_v6 }
 0x62e   : > { %4399 = vst.msk [vmem:[%s7592_s19 + $0xb8] sm:$0xff] %vm253_vm0, %v4367_v57 }
 0x62f   : > { %4398 = vst.msk [vmem:[%s7592_s19 + $0xb0] sm:$0xff] %vm253_vm0, %v4366_v29 }
 0x641   : > { %v4724_v30 = vpop.f32.mrb[24].mxu1 }
 0x642   : > { %v4279_v56 = vadd.f32 %v4724_v30, %v7577_v59  ;;  %v4273_v48 = vpop.f32.mrb[25].mxu1 }
 0x643   : > { %v4274_v44 = vadd.f32 %v7577_v59, %v4273_v48 }
 0x644   : > { %v4369_v38 = vadd.f32 %v4337_v39, %v4279_v56 }
 0x645   : > { %v4368_v10 = vadd.f32 %v4336_v37, %v4274_v44 }
 0x646   : > { %4401 = vst.msk [vmem:[%s7592_s19 + $0xc8] sm:$0xff] %vm253_vm0, %v4369_v38 }
 0x647   : > { %4400 = vst.msk [vmem:[%s7592_s19 + $0xc0] sm:$0xff] %vm253_vm0, %v4368_v10 }
 0x659   : > { %v4727_v0 = vpop.f32.mrb[26].mxu1 }
 0x65a   : > { %v4289_v19 = vadd.f32 %v4727_v0, %v7577_v59  ;;  %v4283_v20 = vpop.f32.mrb[27].mxu1 }
 0x65b   : > { %v4284_v18 = vadd.f32 %v7577_v59, %v4283_v20 }
 0x65c   : > { %v4371_v9 = vadd.f32 %v4339_v7, %v4289_v19 }
 0x65d   : > { %v4370_v5 = vadd.f32 %v4338_v62, %v4284_v18 }
 0x65e   : > { %4403 = vst.msk [vmem:[%s7592_s19 + $0xd8] sm:$0xff] %vm253_vm0, %v4371_v9 }
 0x65f   : > { %4402 = vst.msk [vmem:[%s7592_s19 + $0xd0] sm:$0xff] %vm253_vm0, %v4370_v5 }
 0x671   : > { %v4730_v22 = vpop.f32.mrb[28].mxu1 }
 0x672   : > { %v4299_v33 = vadd.f32 %v4730_v22, %v7577_v59  ;;  %v4293_v36 = vpop.f32.mrb[29].mxu1 }
 0x673   : > { %v4294_v58 = vadd.f32 %v7577_v59, %v4293_v36 }
 0x674   : > { %v4373_v27 = vadd.f32 %v4341_v25, %v4299_v33 }
 0x675   : > { %v4372_v8 = vadd.f32 %v4340_v2, %v4294_v58 }
 0x676   : > { %4405 = vst.msk [vmem:[%s7592_s19 + $0xe8] sm:$0xff] %vm253_vm0, %v4373_v27 }
 0x677   : > { %4404 = vst.msk [vmem:[%s7592_s19 + $0xe0] sm:$0xff] %vm253_vm0, %v4372_v8 }
 0x67e   : > { %v4733_v34 = vpop.f32.mrb[30].mxu1 }
 0x67f   : > { %v4309_v40 = vadd.f32 %v4733_v34, %v7577_v59  ;;  %v4303_v42 = vpop.f32.mrb[31].mxu1 }
 0x680   : > { %v4304_v54 = vadd.f32 %v7577_v59, %v4303_v42 }
 0x681   : > { %v4375_v51 = vadd.f32 %v4343_v46, %v4309_v40 }
 0x682   : > { %v4374_v15 = vadd.f32 %v4342_v14, %v4304_v54 }
 0x683   : > { %4407 = vst.msk [vmem:[%s7592_s19 + $0xf8] sm:$0xff] %vm253_vm0, %v4375_v51 }
 0x684   : > { %4406 = vst.msk [vmem:[%s7592_s19 + $0xf0] sm:$0xff] %vm253_vm0, %v4374_v15 }
 0x685 PF: > { %s17_s23 = sadd.s32 1, %s4810_s23  }
 0x686   : > { %p14_p4 = scmp.ge.s32.totalorder %s17_s23, 4  }
 0x688   :  { %16 = sbr.rel (!%p14_p4) target bundleno = 2 (0x2), region = 77 }

</bundles_post_ra>
